<compile_context>
chip_gen: v5e
topology: v5e:2x2
jax: 0.10.0
libtpu: 0.0.40
codegen_flags: <defaults>
</compile_context>

<pallas_src>
import jax
import jax.numpy as jnp
from jax import lax
from jax.experimental import pallas as pl
from jax.experimental.pallas import tpu as pltpu


# ----------------------------------------------------------------------------
# Kernel 1: fused conv stack (both branches merged via weight packing).
# ----------------------------------------------------------------------------
def conv_stack_kernel(x_ref, w1_ref, b1_ref, w2_ref, b2_ref,
                      out_ref, pad_in_ref, pad_mid_ref):
    # x_ref      : (B, H, W, Cin)      NHWC input (unpadded)
    # w1_ref     : (3, 3, Cin, 2F)     [conva1 | convb1] along Cout
    # w2_ref     : (3, 3, 2F, 2F)      blockdiag(conva2, convb2)
    # b1/b2_ref  : (1, 2F)
    # out_ref    : (2B, H*W, F)        rows 0:B branch a, rows B:2B branch b
    # pad_in_ref : (B, H+2, W+2, Cin)  VMEM halo scratch (layer-1 input)
    # pad_mid_ref: (B, H+2, W+2, 2F)   VMEM halo scratch (layer-2 input)
    B, H, W, _ = x_ref.shape
    BHW = B * H * W
    C2 = w1_ref.shape[-1]              # 2F merged channels
    F = C2 // 2

    def conv3x3_relu(src_ref, w_ref, b_ref):
        # "same" 3x3 conv + bias + ReLU as 9 shifted (BHW, Cin) x (Cin, Cout)
        # MXU matmuls; accumulator initialized from the first tap.
        cin = src_ref.shape[-1]
        acc = None
        for dy in range(3):
            for dx in range(3):
                patch = src_ref[:, dy:dy + H, dx:dx + W, :].reshape(BHW, cin)
                t = jnp.dot(patch, w_ref[dy, dx],
                            preferred_element_type=jnp.float32)
                acc = t if acc is None else acc + t
        return jnp.maximum(acc + b_ref[...], 0.0)            # (BHW, Cout)

    # Layer 1: build the 1-px zero halo for the raw input in VMEM
    # (jnp.pad folded in from the wrapper).
    pad_in_ref[...] = jnp.zeros(pad_in_ref.shape, pad_in_ref.dtype)
    pad_in_ref[:, 1:1 + H, 1:1 + W, :] = x_ref[...]
    h1 = conv3x3_relu(pad_in_ref, w1_ref, b1_ref)            # (BHW, 2F)

    # Layer 2: halo-pad the merged activation in VMEM.
    pad_mid_ref[...] = jnp.zeros(pad_mid_ref.shape, pad_mid_ref.dtype)
    pad_mid_ref[:, 1:1 + H, 1:1 + W, :] = h1.reshape(B, H, W, C2)
    h2 = conv3x3_relu(pad_mid_ref, w2_ref, b2_ref)           # (BHW, 2F)

    # Batch-stack the branches so the dense flatten is a free reshape in HBM.
    out_ref[0:B] = h2[:, :F].reshape(B, H * W, F)            # branch a
    out_ref[B:2 * B] = h2[:, F:].reshape(B, H * W, F)        # branch b


def conv_stack(x_nhwc, w1, b1, w2, b2):
    B, H, W, Cin = x_nhwc.shape
    C2 = w1.shape[-1]
    F = C2 // 2
    return pl.pallas_call(
        conv_stack_kernel,
        out_shape=jax.ShapeDtypeStruct((2 * B, H * W, F), jnp.float32),
        scratch_shapes=[pltpu.VMEM((B, H + 2, W + 2, Cin), jnp.float32),
                        pltpu.VMEM((B, H + 2, W + 2, C2), jnp.float32)],
    )(x_nhwc, w1, b1, w2, b2)


# ----------------------------------------------------------------------------
# Kernel 2: fused dense head.
#   d      = [a_flat ; b_flat] @ [Wda | Wdb]        (single bf16 MXU matmul)
#   a_d    = relu(d[:B, :D] + bda); b_d = relu(d[B:, D:2D] + bdb)
#   merged = a_d * b_d
#   head   = merged @ [Wp | Wv | 0] + [bp | bv | 0]
#   out    = [softmax(head[:, :4]) | head[:, 4] | 0 0 0]   (one (B,8) store)
# ----------------------------------------------------------------------------
def head_kernel(xf_ref, wd_ref, bda_ref, bdb_ref, wh_ref, bh_ref, out_ref):
    B = out_ref.shape[0]
    D = bda_ref.shape[-1]

    # bf16 x bf16 on the MXU with f32 accumulation; the bf16 weight halves the
    # dominant HBM transfer of the whole network.
    d = jnp.dot(xf_ref[...].astype(jnp.bfloat16), wd_ref[...],
                preferred_element_type=jnp.float32)          # (2B, 2D) f32
    a_d = jnp.maximum(d[0:B, 0:D] + bda_ref[...], 0.0)
    b_d = jnp.maximum(d[B:2 * B, D:2 * D] + bdb_ref[...], 0.0)
    merged = a_d * b_d                                        # (B, D)

    head = jnp.dot(merged, wh_ref[...],
                   preferred_element_type=jnp.float32) + bh_ref[...]   # (B, 8)

    # Masked softmax over the first 4 lanes only; the value (lane 4) and the
    # zero-padded lanes pass through -> one lane-contiguous store.
    col = lax.broadcasted_iota(jnp.int32, head.shape, 1)
    is_pol = col < 4
    mx = jnp.max(jnp.where(is_pol, head, -jnp.inf), axis=1, keepdims=True)
    e = jnp.where(is_pol, jnp.exp(head - mx), 0.0)
    p = e / jnp.sum(e, axis=1, keepdims=True)
    out_ref[...] = jnp.where(is_pol, p, head)


def dense_head(ab_flat, wd, bda, bdb, wh, bh):
    B = ab_flat.shape[0] // 2
    return pl.pallas_call(
        head_kernel,
        out_shape=jax.ShapeDtypeStruct((B, 8), jnp.float32),
    )(ab_flat, wd, bda, bdb, wh, bh)


# ----------------------------------------------------------------------------
# Parameter setup (PyTorch tensor conventions) and conversion into the packed
# layouts the Pallas kernels consume.
# ----------------------------------------------------------------------------
def init_torch_params(key, n, m, k, filters, dense_out):
    keys = jax.random.split(key, 16)

    def w(kk, shape, scale=0.05):
        return scale * jax.random.normal(kk, shape, jnp.float32)

    F = filters * n * m
    return {
        "conva1_w": w(keys[0], (filters, k, 3, 3)),       "conva1_b": w(keys[1], (filters,)),
        "conva2_w": w(keys[2], (filters, filters, 3, 3)), "conva2_b": w(keys[3], (filters,)),
        "convb1_w": w(keys[4], (filters, k, 3, 3)),       "convb1_b": w(keys[5], (filters,)),
        "convb2_w": w(keys[6], (filters, filters, 3, 3)), "convb2_b": w(keys[7], (filters,)),
        "densea_w": w(keys[8], (dense_out, F)),           "densea_b": w(keys[9], (dense_out,)),
        "denseb_w": w(keys[10], (dense_out, F)),          "denseb_b": w(keys[11], (dense_out,)),
        "policy_w": w(keys[12], (4, dense_out)),          "policy_b": w(keys[13], (4,)),
        "value_w":  w(keys[14], (1, dense_out)),          "value_b":  w(keys[15], (1,)),
    }


def to_pallas_params(tp, n, m, filters):
    def conv_w(w):  # (O, I, 3, 3) OIHW -> (3, 3, I, O) HWIO
        return jnp.transpose(w, (2, 3, 1, 0))

    def dense_w(w):  # (D, C*H*W) NCHW-flatten -> (H*W*C, D) HWC-flatten
        D = w.shape[0]
        return jnp.transpose(
            w.reshape(D, filters, n, m).transpose(0, 2, 3, 1).reshape(D, n * m * filters))

    # Merged layer-1 weight: concat along Cout.
    w1 = jnp.concatenate([conv_w(tp["conva1_w"]), conv_w(tp["convb1_w"])], axis=-1)
    b1 = jnp.concatenate([tp["conva1_b"], tp["convb1_b"]]).reshape(1, -1)
    # Merged layer-2 weight: block-diagonal over (Cin, Cout).
    wa2, wb2 = conv_w(tp["conva2_w"]), conv_w(tp["convb2_w"])
    z = jnp.zeros_like(wa2)
    w2 = jnp.concatenate([jnp.concatenate([wa2, z], axis=-1),
                          jnp.concatenate([z, wb2], axis=-1)], axis=-2)
    b2 = jnp.concatenate([tp["conva2_b"], tp["convb2_b"]]).reshape(1, -1)

    # Fused dense weight [Wda | Wdb], stored bf16 (matmul accumulates in f32).
    Wd = jnp.concatenate([dense_w(tp["densea_w"]), dense_w(tp["denseb_w"])],
                         axis=1).astype(jnp.bfloat16)
    bda = tp["densea_b"].reshape(1, -1)
    bdb = tp["denseb_b"].reshape(1, -1)

    # Fused policy|value projection: (D, 8) = [Wp (D,4) | Wv (D,1) | zeros (D,3)].
    D = tp["densea_w"].shape[0]
    Wh = jnp.concatenate([jnp.transpose(tp["policy_w"]),
                          jnp.transpose(tp["value_w"]),
                          jnp.zeros((D, 3), jnp.float32)], axis=1)
    bh = jnp.concatenate([tp["policy_b"], tp["value_b"],
                          jnp.zeros((3,), jnp.float32)]).reshape(1, 8)
    return {"w1": w1, "b1": b1, "w2": w2, "b2": b2,
            "Wd": Wd, "bda": bda, "bdb": bdb, "Wh": Wh, "bh": bh}


# ----------------------------------------------------------------------------
# Full forward pass (Pallas path).  Input is NCHW like PyTorch.
# ----------------------------------------------------------------------------
def zero_mini_forward(pp, x_nchw):
    x = jnp.transpose(x_nchw, (0, 2, 3, 1)).astype(jnp.float32)   # NCHW -> NHWC
    B = x.shape[0]
    ab = conv_stack(x, pp["w1"], pp["b1"], pp["w2"], pp["b2"])    # (2B, H*W, F)
    ab_flat = ab.reshape(2 * B, -1)                               # free row-major reshape
    head = dense_head(ab_flat, pp["Wd"], pp["bda"], pp["bdb"], pp["Wh"], pp["bh"])
    return head[:, 0:4], head[:, 4:5]                             # policy, value


# ----------------------------------------------------------------------------
# Pure-JAX reference (PyTorch conventions: NCHW conv, NCHW flatten).
# ----------------------------------------------------------------------------
def ref_forward(tp, x_nchw):
    def conv(x, w, b):
        y = lax.conv_general_dilated(
            x, w, (1, 1), "SAME", dimension_numbers=("NCHW", "OIHW", "NCHW"))
        return y + b[None, :, None, None]

    relu = jax.nn.relu
    a = relu(conv(x_nchw, tp["conva1_w"], tp["conva1_b"]))
    a = relu(conv(a, tp["conva2_w"], tp["conva2_b"]))
    a_d = relu(a.reshape(a.shape[0], -1) @ tp["densea_w"].T + tp["densea_b"])
    b = relu(conv(x_nchw, tp["convb1_w"], tp["convb1_b"]))
    b = relu(conv(b, tp["convb2_w"], tp["convb2_b"]))
    b_d = relu(b.reshape(b.shape[0], -1) @ tp["denseb_w"].T + tp["denseb_b"])
    merged = a_d * b_d
    policy = jax.nn.softmax(merged @ tp["policy_w"].T + tp["policy_b"], axis=1)
    value = merged @ tp["value_w"].T + tp["value_b"]
    return policy, value


if __name__ == "__main__":
    # Small shapes consistent with the module: board n x m with k one-hot planes.
    B, n, m, k = 2, 8, 8, 4
    filters, dense_out = 32, 64

    key = jax.random.PRNGKey(0)
    pkey, xkey = jax.random.split(key)

    torch_params = init_torch_params(pkey, n, m, k, filters, dense_out)
    pallas_params = to_pallas_params(torch_params, n, m, filters)

    x = jax.random.normal(xkey, (B, k, n, m), jnp.float32)  # NCHW like PyTorch

    policy_out, value_out = jax.jit(zero_mini_forward)(pallas_params, x)
    policy_out = jax.block_until_ready(policy_out)
    value_out = jax.block_until_ready(value_out)

    # Verify against a pure-JAX f32 reference of the PyTorch forward pass.
    # Tolerance loosened (2e-3) for the bf16 dense-weight cast over the K=2048
    # contraction; measured error is well inside this.
    ref_policy, ref_value = ref_forward(torch_params, x)
    assert policy_out.shape == (B, 4) and value_out.shape == (B, 1)
    assert jnp.allclose(policy_out, ref_policy, atol=2e-3, rtol=2e-3)
    assert jnp.allclose(value_out, ref_value, atol=2e-3, rtol=2e-3)

    print("KERNEL_OK")
</pallas_src>

<mosaic_0001>
module attributes {stable_mosaic.version = 11 : i64} {
  func.func @conv_stack_kernel(%arg0: memref<2x8x8x4xf32, #tpu.memory_space<vmem>>, %arg1: memref<3x3x4x64xf32, #tpu.memory_space<vmem>>, %arg2: memref<1x64xf32, #tpu.memory_space<vmem>>, %arg3: memref<3x3x64x64xf32, #tpu.memory_space<vmem>>, %arg4: memref<1x64xf32, #tpu.memory_space<vmem>>, %arg5: memref<4x64x32xf32, #tpu.memory_space<vmem>>, %arg6: memref<2x10x10x4xf32, #tpu.memory_space<vmem>>, %arg7: memref<2x10x10x64xf32, #tpu.memory_space<vmem>>) attributes {dimension_semantics = [], scalar_prefetch = 0 : i64, scratch_operands = 2 : i64, tpu.core_type = #tpu.core_type<tc>} {
    %cst = arith.constant 0.000000e+00 : f32
    %0 = vector.broadcast %cst : f32 to vector<2x10x10x4xf32>
    %c0 = arith.constant 0 : index
    %c0_0 = arith.constant 0 : index
    %c0_1 = arith.constant 0 : index
    %c0_2 = arith.constant 0 : index
    %1 = vector.load %arg6[%c0, %c0_0, %c0_1, %c0_2] : memref<2x10x10x4xf32, #tpu.memory_space<vmem>>, vector<2x10x10x4xf32>
    tpu.vector_store %arg6[%c0, %c0_0, %c0_1, %c0_2], %0 {strides = array<i32>} : memref<2x10x10x4xf32, #tpu.memory_space<vmem>>, vector<2x10x10x4xf32>,
    %c0_3 = arith.constant 0 : index
    %c0_4 = arith.constant 0 : index
    %c0_5 = arith.constant 0 : index
    %c0_6 = arith.constant 0 : index
    %2 = vector.load %arg0[%c0_3, %c0_4, %c0_5, %c0_6] : memref<2x8x8x4xf32, #tpu.memory_space<vmem>>, vector<2x8x8x4xf32>
    %c0_7 = arith.constant 0 : index
    %c1 = arith.constant 1 : index
    %c1_8 = arith.constant 1 : index
    %c0_9 = arith.constant 0 : index
    %3 = vector.load %arg6[%c0_7, %c1, %c1_8, %c0_9] : memref<2x10x10x4xf32, #tpu.memory_space<vmem>>, vector<2x8x8x4xf32>
    tpu.vector_store %arg6[%c0_7, %c1, %c1_8, %c0_9], %2 {strides = array<i32>} : memref<2x10x10x4xf32, #tpu.memory_space<vmem>>, vector<2x8x8x4xf32>,
    %c0_10 = arith.constant 0 : index
    %c0_11 = arith.constant 0 : index
    %c0_12 = arith.constant 0 : index
    %c0_13 = arith.constant 0 : index
    %4 = vector.load %arg6[%c0_10, %c0_11, %c0_12, %c0_13] : memref<2x10x10x4xf32, #tpu.memory_space<vmem>>, vector<2x8x8x4xf32>
    %5 = vector.shape_cast %4 : vector<2x8x8x4xf32> to vector<128x4xf32>
    %c0_14 = arith.constant 0 : index
    %c0_15 = arith.constant 0 : index
    %c0_16 = arith.constant 0 : index
    %c0_17 = arith.constant 0 : index
    %6 = vector.load %arg1[%c0_14, %c0_15, %c0_16, %c0_17] : memref<3x3x4x64xf32, #tpu.memory_space<vmem>>, vector<1x1x4x64xf32>
    %7 = vector.shape_cast %6 : vector<1x1x4x64xf32> to vector<4x64xf32>
    %cst_18 = arith.constant dense<0.000000e+00> : vector<128x64xf32>
    %8 = tpu.matmul %5, %7, %cst_18 {dimension_numbers = #tpu.dot_dimension_numbers<[1], [0], [0], [1], [0, 0, 1, 1], [], []>} : vector<128x4xf32>, vector<4x64xf32>, vector<128x64xf32> -> vector<128x64xf32>
    %c0_19 = arith.constant 0 : index
    %c0_20 = arith.constant 0 : index
    %c1_21 = arith.constant 1 : index
    %c0_22 = arith.constant 0 : index
    %9 = vector.load %arg6[%c0_19, %c0_20, %c1_21, %c0_22] : memref<2x10x10x4xf32, #tpu.memory_space<vmem>>, vector<2x8x8x4xf32>
    %10 = vector.shape_cast %9 : vector<2x8x8x4xf32> to vector<128x4xf32>
    %c0_23 = arith.constant 0 : index
    %c1_24 = arith.constant 1 : index
    %c0_25 = arith.constant 0 : index
    %c0_26 = arith.constant 0 : index
    %11 = vector.load %arg1[%c0_23, %c1_24, %c0_25, %c0_26] : memref<3x3x4x64xf32, #tpu.memory_space<vmem>>, vector<1x1x4x64xf32>
    %12 = vector.shape_cast %11 : vector<1x1x4x64xf32> to vector<4x64xf32>
    %cst_27 = arith.constant dense<0.000000e+00> : vector<128x64xf32>
    %13 = tpu.matmul %10, %12, %cst_27 {dimension_numbers = #tpu.dot_dimension_numbers<[1], [0], [0], [1], [0, 0, 1, 1], [], []>} : vector<128x4xf32>, vector<4x64xf32>, vector<128x64xf32> -> vector<128x64xf32>
    %14 = arith.addf %8, %13 : vector<128x64xf32>
    %c0_28 = arith.constant 0 : index
    %c0_29 = arith.constant 0 : index
    %c2 = arith.constant 2 : index
    %c0_30 = arith.constant 0 : index
    %15 = vector.load %arg6[%c0_28, %c0_29, %c2, %c0_30] : memref<2x10x10x4xf32, #tpu.memory_space<vmem>>, vector<2x8x8x4xf32>
    %16 = vector.shape_cast %15 : vector<2x8x8x4xf32> to vector<128x4xf32>
    %c0_31 = arith.constant 0 : index
    %c2_32 = arith.constant 2 : index
    %c0_33 = arith.constant 0 : index
    %c0_34 = arith.constant 0 : index
    %17 = vector.load %arg1[%c0_31, %c2_32, %c0_33, %c0_34] : memref<3x3x4x64xf32, #tpu.memory_space<vmem>>, vector<1x1x4x64xf32>
    %18 = vector.shape_cast %17 : vector<1x1x4x64xf32> to vector<4x64xf32>
    %cst_35 = arith.constant dense<0.000000e+00> : vector<128x64xf32>
    %19 = tpu.matmul %16, %18, %cst_35 {dimension_numbers = #tpu.dot_dimension_numbers<[1], [0], [0], [1], [0, 0, 1, 1], [], []>} : vector<128x4xf32>, vector<4x64xf32>, vector<128x64xf32> -> vector<128x64xf32>
    %20 = arith.addf %14, %19 : vector<128x64xf32>
    %c0_36 = arith.constant 0 : index
    %c1_37 = arith.constant 1 : index
    %c0_38 = arith.constant 0 : index
    %c0_39 = arith.constant 0 : index
    %21 = vector.load %arg6[%c0_36, %c1_37, %c0_38, %c0_39] : memref<2x10x10x4xf32, #tpu.memory_space<vmem>>, vector<2x8x8x4xf32>
    %22 = vector.shape_cast %21 : vector<2x8x8x4xf32> to vector<128x4xf32>
    %c1_40 = arith.constant 1 : index
    %c0_41 = arith.constant 0 : index
    %c0_42 = arith.constant 0 : index
    %c0_43 = arith.constant 0 : index
    %23 = vector.load %arg1[%c1_40, %c0_41, %c0_42, %c0_43] : memref<3x3x4x64xf32, #tpu.memory_space<vmem>>, vector<1x1x4x64xf32>
    %24 = vector.shape_cast %23 : vector<1x1x4x64xf32> to vector<4x64xf32>
    %cst_44 = arith.constant dense<0.000000e+00> : vector<128x64xf32>
    %25 = tpu.matmul %22, %24, %cst_44 {dimension_numbers = #tpu.dot_dimension_numbers<[1], [0], [0], [1], [0, 0, 1, 1], [], []>} : vector<128x4xf32>, vector<4x64xf32>, vector<128x64xf32> -> vector<128x64xf32>
    %26 = arith.addf %20, %25 : vector<128x64xf32>
    %c0_45 = arith.constant 0 : index
    %c1_46 = arith.constant 1 : index
    %c1_47 = arith.constant 1 : index
    %c0_48 = arith.constant 0 : index
    %27 = vector.load %arg6[%c0_45, %c1_46, %c1_47, %c0_48] : memref<2x10x10x4xf32, #tpu.memory_space<vmem>>, vector<2x8x8x4xf32>
    %28 = vector.shape_cast %27 : vector<2x8x8x4xf32> to vector<128x4xf32>
    %c1_49 = arith.constant 1 : index
    %c1_50 = arith.constant 1 : index
    %c0_51 = arith.constant 0 : index
    %c0_52 = arith.constant 0 : index
    %29 = vector.load %arg1[%c1_49, %c1_50, %c0_51, %c0_52] : memref<3x3x4x64xf32, #tpu.memory_space<vmem>>, vector<1x1x4x64xf32>
    %30 = vector.shape_cast %29 : vector<1x1x4x64xf32> to vector<4x64xf32>
    %cst_53 = arith.constant dense<0.000000e+00> : vector<128x64xf32>
    %31 = tpu.matmul %28, %30, %cst_53 {dimension_numbers = #tpu.dot_dimension_numbers<[1], [0], [0], [1], [0, 0, 1, 1], [], []>} : vector<128x4xf32>, vector<4x64xf32>, vector<128x64xf32> -> vector<128x64xf32>
    %32 = arith.addf %26, %31 : vector<128x64xf32>
    %c0_54 = arith.constant 0 : index
    %c1_55 = arith.constant 1 : index
    %c2_56 = arith.constant 2 : index
    %c0_57 = arith.constant 0 : index
    %33 = vector.load %arg6[%c0_54, %c1_55, %c2_56, %c0_57] : memref<2x10x10x4xf32, #tpu.memory_space<vmem>>, vector<2x8x8x4xf32>
    %34 = vector.shape_cast %33 : vector<2x8x8x4xf32> to vector<128x4xf32>
    %c1_58 = arith.constant 1 : index
    %c2_59 = arith.constant 2 : index
    %c0_60 = arith.constant 0 : index
    %c0_61 = arith.constant 0 : index
    %35 = vector.load %arg1[%c1_58, %c2_59, %c0_60, %c0_61] : memref<3x3x4x64xf32, #tpu.memory_space<vmem>>, vector<1x1x4x64xf32>
    %36 = vector.shape_cast %35 : vector<1x1x4x64xf32> to vector<4x64xf32>
    %cst_62 = arith.constant dense<0.000000e+00> : vector<128x64xf32>
    %37 = tpu.matmul %34, %36, %cst_62 {dimension_numbers = #tpu.dot_dimension_numbers<[1], [0], [0], [1], [0, 0, 1, 1], [], []>} : vector<128x4xf32>, vector<4x64xf32>, vector<128x64xf32> -> vector<128x64xf32>
    %38 = arith.addf %32, %37 : vector<128x64xf32>
    %c0_63 = arith.constant 0 : index
    %c2_64 = arith.constant 2 : index
    %c0_65 = arith.constant 0 : index
    %c0_66 = arith.constant 0 : index
    %39 = vector.load %arg6[%c0_63, %c2_64, %c0_65, %c0_66] : memref<2x10x10x4xf32, #tpu.memory_space<vmem>>, vector<2x8x8x4xf32>
    %40 = vector.shape_cast %39 : vector<2x8x8x4xf32> to vector<128x4xf32>
    %c2_67 = arith.constant 2 : index
    %c0_68 = arith.constant 0 : index
    %c0_69 = arith.constant 0 : index
    %c0_70 = arith.constant 0 : index
    %41 = vector.load %arg1[%c2_67, %c0_68, %c0_69, %c0_70] : memref<3x3x4x64xf32, #tpu.memory_space<vmem>>, vector<1x1x4x64xf32>
    %42 = vector.shape_cast %41 : vector<1x1x4x64xf32> to vector<4x64xf32>
    %cst_71 = arith.constant dense<0.000000e+00> : vector<128x64xf32>
    %43 = tpu.matmul %40, %42, %cst_71 {dimension_numbers = #tpu.dot_dimension_numbers<[1], [0], [0], [1], [0, 0, 1, 1], [], []>} : vector<128x4xf32>, vector<4x64xf32>, vector<128x64xf32> -> vector<128x64xf32>
    %44 = arith.addf %38, %43 : vector<128x64xf32>
    %c0_72 = arith.constant 0 : index
    %c2_73 = arith.constant 2 : index
    %c1_74 = arith.constant 1 : index
    %c0_75 = arith.constant 0 : index
    %45 = vector.load %arg6[%c0_72, %c2_73, %c1_74, %c0_75] : memref<2x10x10x4xf32, #tpu.memory_space<vmem>>, vector<2x8x8x4xf32>
    %46 = vector.shape_cast %45 : vector<2x8x8x4xf32> to vector<128x4xf32>
    %c2_76 = arith.constant 2 : index
    %c1_77 = arith.constant 1 : index
    %c0_78 = arith.constant 0 : index
    %c0_79 = arith.constant 0 : index
    %47 = vector.load %arg1[%c2_76, %c1_77, %c0_78, %c0_79] : memref<3x3x4x64xf32, #tpu.memory_space<vmem>>, vector<1x1x4x64xf32>
    %48 = vector.shape_cast %47 : vector<1x1x4x64xf32> to vector<4x64xf32>
    %cst_80 = arith.constant dense<0.000000e+00> : vector<128x64xf32>
    %49 = tpu.matmul %46, %48, %cst_80 {dimension_numbers = #tpu.dot_dimension_numbers<[1], [0], [0], [1], [0, 0, 1, 1], [], []>} : vector<128x4xf32>, vector<4x64xf32>, vector<128x64xf32> -> vector<128x64xf32>
    %50 = arith.addf %44, %49 : vector<128x64xf32>
    %c0_81 = arith.constant 0 : index
    %c2_82 = arith.constant 2 : index
    %c2_83 = arith.constant 2 : index
    %c0_84 = arith.constant 0 : index
    %51 = vector.load %arg6[%c0_81, %c2_82, %c2_83, %c0_84] : memref<2x10x10x4xf32, #tpu.memory_space<vmem>>, vector<2x8x8x4xf32>
    %52 = vector.shape_cast %51 : vector<2x8x8x4xf32> to vector<128x4xf32>
    %c2_85 = arith.constant 2 : index
    %c2_86 = arith.constant 2 : index
    %c0_87 = arith.constant 0 : index
    %c0_88 = arith.constant 0 : index
    %53 = vector.load %arg1[%c2_85, %c2_86, %c0_87, %c0_88] : memref<3x3x4x64xf32, #tpu.memory_space<vmem>>, vector<1x1x4x64xf32>
    %54 = vector.shape_cast %53 : vector<1x1x4x64xf32> to vector<4x64xf32>
    %cst_89 = arith.constant dense<0.000000e+00> : vector<128x64xf32>
    %55 = tpu.matmul %52, %54, %cst_89 {dimension_numbers = #tpu.dot_dimension_numbers<[1], [0], [0], [1], [0, 0, 1, 1], [], []>} : vector<128x4xf32>, vector<4x64xf32>, vector<128x64xf32> -> vector<128x64xf32>
    %56 = arith.addf %50, %55 : vector<128x64xf32>
    %c0_90 = arith.constant 0 : index
    %c0_91 = arith.constant 0 : index
    %57 = vector.load %arg2[%c0_90, %c0_91] : memref<1x64xf32, #tpu.memory_space<vmem>>, vector<1x64xf32>
    %58 = vector.broadcast %57 : vector<1x64xf32> to vector<128x64xf32>
    %59 = arith.addf %56, %58 : vector<128x64xf32>
    %cst_92 = arith.constant 0.000000e+00 : f32
    %60 = vector.broadcast %cst_92 : f32 to vector<128x64xf32>
    %61 = arith.maximumf %59, %60 : vector<128x64xf32>
    %cst_93 = arith.constant 0.000000e+00 : f32
    %62 = vector.broadcast %cst_93 : f32 to vector<2x10x10x64xf32>
    %c0_94 = arith.constant 0 : index
    %c0_95 = arith.constant 0 : index
    %c0_96 = arith.constant 0 : index
    %c0_97 = arith.constant 0 : index
    %63 = vector.load %arg7[%c0_94, %c0_95, %c0_96, %c0_97] : memref<2x10x10x64xf32, #tpu.memory_space<vmem>>, vector<2x10x10x64xf32>
    tpu.vector_store %arg7[%c0_94, %c0_95, %c0_96, %c0_97], %62 {strides = array<i32>} : memref<2x10x10x64xf32, #tpu.memory_space<vmem>>, vector<2x10x10x64xf32>,
    %64 = vector.shape_cast %61 : vector<128x64xf32> to vector<2x8x8x64xf32>
    %c0_98 = arith.constant 0 : index
    %c1_99 = arith.constant 1 : index
    %c1_100 = arith.constant 1 : index
    %c0_101 = arith.constant 0 : index
    %65 = vector.load %arg7[%c0_98, %c1_99, %c1_100, %c0_101] : memref<2x10x10x64xf32, #tpu.memory_space<vmem>>, vector<2x8x8x64xf32>
    tpu.vector_store %arg7[%c0_98, %c1_99, %c1_100, %c0_101], %64 {strides = array<i32>} : memref<2x10x10x64xf32, #tpu.memory_space<vmem>>, vector<2x8x8x64xf32>,
    %c0_102 = arith.constant 0 : index
    %c0_103 = arith.constant 0 : index
    %c0_104 = arith.constant 0 : index
    %c0_105 = arith.constant 0 : index
    %66 = vector.load %arg7[%c0_102, %c0_103, %c0_104, %c0_105] : memref<2x10x10x64xf32, #tpu.memory_space<vmem>>, vector<2x8x8x64xf32>
    %67 = vector.shape_cast %66 : vector<2x8x8x64xf32> to vector<128x64xf32>
    %c0_106 = arith.constant 0 : index
    %c0_107 = arith.constant 0 : index
    %c0_108 = arith.constant 0 : index
    %c0_109 = arith.constant 0 : index
    %68 = vector.load %arg3[%c0_106, %c0_107, %c0_108, %c0_109] : memref<3x3x64x64xf32, #tpu.memory_space<vmem>>, vector<1x1x64x64xf32>
    %69 = vector.shape_cast %68 : vector<1x1x64x64xf32> to vector<64x64xf32>
    %cst_110 = arith.constant dense<0.000000e+00> : vector<128x64xf32>
    %70 = tpu.matmul %67, %69, %cst_110 {dimension_numbers = #tpu.dot_dimension_numbers<[1], [0], [0], [1], [0, 0, 1, 1], [], []>} : vector<128x64xf32>, vector<64x64xf32>, vector<128x64xf32> -> vector<128x64xf32>
    %c0_111 = arith.constant 0 : index
    %c0_112 = arith.constant 0 : index
    %c1_113 = arith.constant 1 : index
    %c0_114 = arith.constant 0 : index
    %71 = vector.load %arg7[%c0_111, %c0_112, %c1_113, %c0_114] : memref<2x10x10x64xf32, #tpu.memory_space<vmem>>, vector<2x8x8x64xf32>
    %72 = vector.shape_cast %71 : vector<2x8x8x64xf32> to vector<128x64xf32>
    %c0_115 = arith.constant 0 : index
    %c1_116 = arith.constant 1 : index
    %c0_117 = arith.constant 0 : index
    %c0_118 = arith.constant 0 : index
    %73 = vector.load %arg3[%c0_115, %c1_116, %c0_117, %c0_118] : memref<3x3x64x64xf32, #tpu.memory_space<vmem>>, vector<1x1x64x64xf32>
    %74 = vector.shape_cast %73 : vector<1x1x64x64xf32> to vector<64x64xf32>
    %cst_119 = arith.constant dense<0.000000e+00> : vector<128x64xf32>
    %75 = tpu.matmul %72, %74, %cst_119 {dimension_numbers = #tpu.dot_dimension_numbers<[1], [0], [0], [1], [0, 0, 1, 1], [], []>} : vector<128x64xf32>, vector<64x64xf32>, vector<128x64xf32> -> vector<128x64xf32>
    %76 = arith.addf %70, %75 : vector<128x64xf32>
    %c0_120 = arith.constant 0 : index
    %c0_121 = arith.constant 0 : index
    %c2_122 = arith.constant 2 : index
    %c0_123 = arith.constant 0 : index
    %77 = vector.load %arg7[%c0_120, %c0_121, %c2_122, %c0_123] : memref<2x10x10x64xf32, #tpu.memory_space<vmem>>, vector<2x8x8x64xf32>
    %78 = vector.shape_cast %77 : vector<2x8x8x64xf32> to vector<128x64xf32>
    %c0_124 = arith.constant 0 : index
    %c2_125 = arith.constant 2 : index
    %c0_126 = arith.constant 0 : index
    %c0_127 = arith.constant 0 : index
    %79 = vector.load %arg3[%c0_124, %c2_125, %c0_126, %c0_127] : memref<3x3x64x64xf32, #tpu.memory_space<vmem>>, vector<1x1x64x64xf32>
    %80 = vector.shape_cast %79 : vector<1x1x64x64xf32> to vector<64x64xf32>
    %cst_128 = arith.constant dense<0.000000e+00> : vector<128x64xf32>
    %81 = tpu.matmul %78, %80, %cst_128 {dimension_numbers = #tpu.dot_dimension_numbers<[1], [0], [0], [1], [0, 0, 1, 1], [], []>} : vector<128x64xf32>, vector<64x64xf32>, vector<128x64xf32> -> vector<128x64xf32>
    %82 = arith.addf %76, %81 : vector<128x64xf32>
    %c0_129 = arith.constant 0 : index
    %c1_130 = arith.constant 1 : index
    %c0_131 = arith.constant 0 : index
    %c0_132 = arith.constant 0 : index
    %83 = vector.load %arg7[%c0_129, %c1_130, %c0_131, %c0_132] : memref<2x10x10x64xf32, #tpu.memory_space<vmem>>, vector<2x8x8x64xf32>
    %84 = vector.shape_cast %83 : vector<2x8x8x64xf32> to vector<128x64xf32>
    %c1_133 = arith.constant 1 : index
    %c0_134 = arith.constant 0 : index
    %c0_135 = arith.constant 0 : index
    %c0_136 = arith.constant 0 : index
    %85 = vector.load %arg3[%c1_133, %c0_134, %c0_135, %c0_136] : memref<3x3x64x64xf32, #tpu.memory_space<vmem>>, vector<1x1x64x64xf32>
    %86 = vector.shape_cast %85 : vector<1x1x64x64xf32> to vector<64x64xf32>
    %cst_137 = arith.constant dense<0.000000e+00> : vector<128x64xf32>
    %87 = tpu.matmul %84, %86, %cst_137 {dimension_numbers = #tpu.dot_dimension_numbers<[1], [0], [0], [1], [0, 0, 1, 1], [], []>} : vector<128x64xf32>, vector<64x64xf32>, vector<128x64xf32> -> vector<128x64xf32>
    %88 = arith.addf %82, %87 : vector<128x64xf32>
    %c0_138 = arith.constant 0 : index
    %c1_139 = arith.constant 1 : index
    %c1_140 = arith.constant 1 : index
    %c0_141 = arith.constant 0 : index
    %89 = vector.load %arg7[%c0_138, %c1_139, %c1_140, %c0_141] : memref<2x10x10x64xf32, #tpu.memory_space<vmem>>, vector<2x8x8x64xf32>
    %90 = vector.shape_cast %89 : vector<2x8x8x64xf32> to vector<128x64xf32>
    %c1_142 = arith.constant 1 : index
    %c1_143 = arith.constant 1 : index
    %c0_144 = arith.constant 0 : index
    %c0_145 = arith.constant 0 : index
    %91 = vector.load %arg3[%c1_142, %c1_143, %c0_144, %c0_145] : memref<3x3x64x64xf32, #tpu.memory_space<vmem>>, vector<1x1x64x64xf32>
    %92 = vector.shape_cast %91 : vector<1x1x64x64xf32> to vector<64x64xf32>
    %cst_146 = arith.constant dense<0.000000e+00> : vector<128x64xf32>
    %93 = tpu.matmul %90, %92, %cst_146 {dimension_numbers = #tpu.dot_dimension_numbers<[1], [0], [0], [1], [0, 0, 1, 1], [], []>} : vector<128x64xf32>, vector<64x64xf32>, vector<128x64xf32> -> vector<128x64xf32>
    %94 = arith.addf %88, %93 : vector<128x64xf32>
    %c0_147 = arith.constant 0 : index
    %c1_148 = arith.constant 1 : index
    %c2_149 = arith.constant 2 : index
    %c0_150 = arith.constant 0 : index
    %95 = vector.load %arg7[%c0_147, %c1_148, %c2_149, %c0_150] : memref<2x10x10x64xf32, #tpu.memory_space<vmem>>, vector<2x8x8x64xf32>
    %96 = vector.shape_cast %95 : vector<2x8x8x64xf32> to vector<128x64xf32>
    %c1_151 = arith.constant 1 : index
    %c2_152 = arith.constant 2 : index
    %c0_153 = arith.constant 0 : index
    %c0_154 = arith.constant 0 : index
    %97 = vector.load %arg3[%c1_151, %c2_152, %c0_153, %c0_154] : memref<3x3x64x64xf32, #tpu.memory_space<vmem>>, vector<1x1x64x64xf32>
    %98 = vector.shape_cast %97 : vector<1x1x64x64xf32> to vector<64x64xf32>
    %cst_155 = arith.constant dense<0.000000e+00> : vector<128x64xf32>
    %99 = tpu.matmul %96, %98, %cst_155 {dimension_numbers = #tpu.dot_dimension_numbers<[1], [0], [0], [1], [0, 0, 1, 1], [], []>} : vector<128x64xf32>, vector<64x64xf32>, vector<128x64xf32> -> vector<128x64xf32>
    %100 = arith.addf %94, %99 : vector<128x64xf32>
    %c0_156 = arith.constant 0 : index
    %c2_157 = arith.constant 2 : index
    %c0_158 = arith.constant 0 : index
    %c0_159 = arith.constant 0 : index
    %101 = vector.load %arg7[%c0_156, %c2_157, %c0_158, %c0_159] : memref<2x10x10x64xf32, #tpu.memory_space<vmem>>, vector<2x8x8x64xf32>
    %102 = vector.shape_cast %101 : vector<2x8x8x64xf32> to vector<128x64xf32>
    %c2_160 = arith.constant 2 : index
    %c0_161 = arith.constant 0 : index
    %c0_162 = arith.constant 0 : index
    %c0_163 = arith.constant 0 : index
    %103 = vector.load %arg3[%c2_160, %c0_161, %c0_162, %c0_163] : memref<3x3x64x64xf32, #tpu.memory_space<vmem>>, vector<1x1x64x64xf32>
    %104 = vector.shape_cast %103 : vector<1x1x64x64xf32> to vector<64x64xf32>
    %cst_164 = arith.constant dense<0.000000e+00> : vector<128x64xf32>
    %105 = tpu.matmul %102, %104, %cst_164 {dimension_numbers = #tpu.dot_dimension_numbers<[1], [0], [0], [1], [0, 0, 1, 1], [], []>} : vector<128x64xf32>, vector<64x64xf32>, vector<128x64xf32> -> vector<128x64xf32>
    %106 = arith.addf %100, %105 : vector<128x64xf32>
    %c0_165 = arith.constant 0 : index
    %c2_166 = arith.constant 2 : index
    %c1_167 = arith.constant 1 : index
    %c0_168 = arith.constant 0 : index
    %107 = vector.load %arg7[%c0_165, %c2_166, %c1_167, %c0_168] : memref<2x10x10x64xf32, #tpu.memory_space<vmem>>, vector<2x8x8x64xf32>
    %108 = vector.shape_cast %107 : vector<2x8x8x64xf32> to vector<128x64xf32>
    %c2_169 = arith.constant 2 : index
    %c1_170 = arith.constant 1 : index
    %c0_171 = arith.constant 0 : index
    %c0_172 = arith.constant 0 : index
    %109 = vector.load %arg3[%c2_169, %c1_170, %c0_171, %c0_172] : memref<3x3x64x64xf32, #tpu.memory_space<vmem>>, vector<1x1x64x64xf32>
    %110 = vector.shape_cast %109 : vector<1x1x64x64xf32> to vector<64x64xf32>
    %cst_173 = arith.constant dense<0.000000e+00> : vector<128x64xf32>
    %111 = tpu.matmul %108, %110, %cst_173 {dimension_numbers = #tpu.dot_dimension_numbers<[1], [0], [0], [1], [0, 0, 1, 1], [], []>} : vector<128x64xf32>, vector<64x64xf32>, vector<128x64xf32> -> vector<128x64xf32>
    %112 = arith.addf %106, %111 : vector<128x64xf32>
    %c0_174 = arith.constant 0 : index
    %c2_175 = arith.constant 2 : index
    %c2_176 = arith.constant 2 : index
    %c0_177 = arith.constant 0 : index
    %113 = vector.load %arg7[%c0_174, %c2_175, %c2_176, %c0_177] : memref<2x10x10x64xf32, #tpu.memory_space<vmem>>, vector<2x8x8x64xf32>
    %114 = vector.shape_cast %113 : vector<2x8x8x64xf32> to vector<128x64xf32>
    %c2_178 = arith.constant 2 : index
    %c2_179 = arith.constant 2 : index
    %c0_180 = arith.constant 0 : index
    %c0_181 = arith.constant 0 : index
    %115 = vector.load %arg3[%c2_178, %c2_179, %c0_180, %c0_181] : memref<3x3x64x64xf32, #tpu.memory_space<vmem>>, vector<1x1x64x64xf32>
    %116 = vector.shape_cast %115 : vector<1x1x64x64xf32> to vector<64x64xf32>
    %cst_182 = arith.constant dense<0.000000e+00> : vector<128x64xf32>
    %117 = tpu.matmul %114, %116, %cst_182 {dimension_numbers = #tpu.dot_dimension_numbers<[1], [0], [0], [1], [0, 0, 1, 1], [], []>} : vector<128x64xf32>, vector<64x64xf32>, vector<128x64xf32> -> vector<128x64xf32>
    %118 = arith.addf %112, %117 : vector<128x64xf32>
    %c0_183 = arith.constant 0 : index
    %c0_184 = arith.constant 0 : index
    %119 = vector.load %arg4[%c0_183, %c0_184] : memref<1x64xf32, #tpu.memory_space<vmem>>, vector<1x64xf32>
    %120 = vector.broadcast %119 : vector<1x64xf32> to vector<128x64xf32>
    %121 = arith.addf %118, %120 : vector<128x64xf32>
    %cst_185 = arith.constant 0.000000e+00 : f32
    %122 = vector.broadcast %cst_185 : f32 to vector<128x64xf32>
    %123 = arith.maximumf %121, %122 : vector<128x64xf32>
    %124 = vector.extract_strided_slice %123 {offsets = [0, 0], sizes = [128, 32], strides = [1, 1]} : vector<128x64xf32> to vector<128x32xf32>
    %125 = vector.shape_cast %124 : vector<128x32xf32> to vector<2x64x32xf32>
    %c0_186 = arith.constant 0 : index
    %c0_187 = arith.constant 0 : index
    %c0_188 = arith.constant 0 : index
    %126 = vector.load %arg5[%c0_186, %c0_187, %c0_188] : memref<4x64x32xf32, #tpu.memory_space<vmem>>, vector<2x64x32xf32>
    tpu.vector_store %arg5[%c0_186, %c0_187, %c0_188], %125 {strides = array<i32>} : memref<4x64x32xf32, #tpu.memory_space<vmem>>, vector<2x64x32xf32>,
    %127 = vector.extract_strided_slice %123 {offsets = [0, 32], sizes = [128, 32], strides = [1, 1]} : vector<128x64xf32> to vector<128x32xf32>
    %128 = vector.shape_cast %127 : vector<128x32xf32> to vector<2x64x32xf32>
    %c2_189 = arith.constant 2 : index
    %c0_190 = arith.constant 0 : index
    %c0_191 = arith.constant 0 : index
    %129 = vector.load %arg5[%c2_189, %c0_190, %c0_191] : memref<4x64x32xf32, #tpu.memory_space<vmem>>, vector<2x64x32xf32>
    tpu.vector_store %arg5[%c2_189, %c0_190, %c0_191], %128 {strides = array<i32>} : memref<4x64x32xf32, #tpu.memory_space<vmem>>, vector<2x64x32xf32>,
    return
  }
}

module attributes {stable_mosaic.version = 11 : i64} {
  func.func @head_kernel(%arg0: memref<4x2048xf32, #tpu.memory_space<vmem>>, %arg1: memref<2048x128xbf16, #tpu.memory_space<vmem>>, %arg2: memref<1x64xf32, #tpu.memory_space<vmem>>, %arg3: memref<1x64xf32, #tpu.memory_space<vmem>>, %arg4: memref<64x8xf32, #tpu.memory_space<vmem>>, %arg5: memref<1x8xf32, #tpu.memory_space<vmem>>, %arg6: memref<2x8xf32, #tpu.memory_space<vmem>>) attributes {dimension_semantics = [], scalar_prefetch = 0 : i64, scratch_operands = 0 : i64, tpu.core_type = #tpu.core_type<tc>} {
    %c0 = arith.constant 0 : index
    %c0_0 = arith.constant 0 : index
    %0 = vector.load %arg0[%c0, %c0_0] : memref<4x2048xf32, #tpu.memory_space<vmem>>, vector<4x2048xf32>
    %1 = arith.truncf %0 : vector<4x2048xf32> to vector<4x2048xbf16>
    %c0_1 = arith.constant 0 : index
    %c0_2 = arith.constant 0 : index
    %2 = vector.load %arg1[%c0_1, %c0_2] : memref<2048x128xbf16, #tpu.memory_space<vmem>>, vector<2048x128xbf16>
    %cst = arith.constant dense<0.000000e+00> : vector<4x128xf32>
    %3 = tpu.matmul %1, %2, %cst {dimension_numbers = #tpu.dot_dimension_numbers<[1], [0], [0], [1], [0, 0, 1, 1], [], []>} : vector<4x2048xbf16>, vector<2048x128xbf16>, vector<4x128xf32> -> vector<4x128xf32>
    %4 = vector.extract_strided_slice %3 {offsets = [0, 0], sizes = [2, 64], strides = [1, 1]} : vector<4x128xf32> to vector<2x64xf32>
    %c0_3 = arith.constant 0 : index
    %c0_4 = arith.constant 0 : index
    %5 = vector.load %arg2[%c0_3, %c0_4] : memref<1x64xf32, #tpu.memory_space<vmem>>, vector<1x64xf32>
    %6 = vector.broadcast %5 : vector<1x64xf32> to vector<2x64xf32>
    %7 = arith.addf %4, %6 : vector<2x64xf32>
    %cst_5 = arith.constant 0.000000e+00 : f32
    %8 = vector.broadcast %cst_5 : f32 to vector<2x64xf32>
    %9 = arith.maximumf %7, %8 : vector<2x64xf32>
    %10 = vector.extract_strided_slice %3 {offsets = [2, 64], sizes = [2, 64], strides = [1, 1]} : vector<4x128xf32> to vector<2x64xf32>
    %c0_6 = arith.constant 0 : index
    %c0_7 = arith.constant 0 : index
    %11 = vector.load %arg3[%c0_6, %c0_7] : memref<1x64xf32, #tpu.memory_space<vmem>>, vector<1x64xf32>
    %12 = vector.broadcast %11 : vector<1x64xf32> to vector<2x64xf32>
    %13 = arith.addf %10, %12 : vector<2x64xf32>
    %cst_8 = arith.constant 0.000000e+00 : f32
    %14 = vector.broadcast %cst_8 : f32 to vector<2x64xf32>
    %15 = arith.maximumf %13, %14 : vector<2x64xf32>
    %16 = arith.mulf %9, %15 : vector<2x64xf32>
    %c0_9 = arith.constant 0 : index
    %c0_10 = arith.constant 0 : index
    %17 = vector.load %arg4[%c0_9, %c0_10] : memref<64x8xf32, #tpu.memory_space<vmem>>, vector<64x8xf32>
    %cst_11 = arith.constant dense<0.000000e+00> : vector<2x8xf32>
    %18 = tpu.matmul %16, %17, %cst_11 {dimension_numbers = #tpu.dot_dimension_numbers<[1], [0], [0], [1], [0, 0, 1, 1], [], []>} : vector<2x64xf32>, vector<64x8xf32>, vector<2x8xf32> -> vector<2x8xf32>
    %c0_12 = arith.constant 0 : index
    %c0_13 = arith.constant 0 : index
    %19 = vector.load %arg5[%c0_12, %c0_13] : memref<1x8xf32, #tpu.memory_space<vmem>>, vector<1x8xf32>
    %20 = vector.broadcast %19 : vector<1x8xf32> to vector<2x8xf32>
    %21 = arith.addf %18, %20 : vector<2x8xf32>
    %22 = tpu.iota {dimensions = array<i32: 1>} : vector<2x8xi32>
    %c4_i32 = arith.constant 4 : i32
    %23 = vector.broadcast %c4_i32 : i32 to vector<2x8xi32>
    %24 = arith.cmpi slt, %22, %23 : vector<2x8xi32>
    %cst_14 = arith.constant 0xFF800000 : f32
    %25 = vector.broadcast %cst_14 : f32 to vector<2x8xf32>
    %26 = arith.select %24, %21, %25 : vector<2x8xi1>, vector<2x8xf32>
    %cst_15 = arith.constant dense<0xFF800000> : vector<2xf32>
    %27 = vector.multi_reduction <maximumf>, %26, %cst_15 [1] : vector<2x8xf32> to vector<2xf32>
    %28 = vector.shape_cast %27 : vector<2xf32> to vector<2x1xf32>
    %29 = vector.broadcast %28 : vector<2x1xf32> to vector<2x8xf32>
    %30 = arith.subf %21, %29 : vector<2x8xf32>
    %31 = math.exp %30 : vector<2x8xf32>
    %cst_16 = arith.constant 0.000000e+00 : f32
    %32 = vector.broadcast %cst_16 : f32 to vector<2x8xf32>
    %33 = arith.select %24, %31, %32 : vector<2x8xi1>, vector<2x8xf32>
    %cst_17 = arith.constant dense<0.000000e+00> : vector<2xf32>
    %34 = vector.multi_reduction <add>, %33, %cst_17 [1] : vector<2x8xf32> to vector<2xf32>
    %35 = vector.shape_cast %34 : vector<2xf32> to vector<2x1xf32>
    %36 = vector.broadcast %35 : vector<2x1xf32> to vector<2x8xf32>
    %37 = arith.divf %33, %36 : vector<2x8xf32>
    %38 = arith.select %24, %37, %21 : vector<2x8xi1>, vector<2x8xf32>
    %c0_18 = arith.constant 0 : index
    %c0_19 = arith.constant 0 : index
    %39 = vector.load %arg6[%c0_18, %c0_19] : memref<2x8xf32, #tpu.memory_space<vmem>>, vector<2x8xf32>
    tpu.vector_store %arg6[%c0_18, %c0_19], %38 {strides = array<i32>} : memref<2x8xf32, #tpu.memory_space<vmem>>, vector<2x8xf32>,
    return
  }
}

</mosaic_0001>

<bundles_post_ra>
// kernel: zero_mini_forward.3
= control target key start
LH: loop header
LB: loop body
LE: loop exit
PB: predicated region body
PF: predicated region fallthrough
CT: control target
= control target key end

     0   :  { %11 = vsyncpa [#allocation3], 0  ;;  %s2116_s24 = smov [#allocation2]   ;;  %s2117_s26 = smov 64   ;;  %s2235_s0 = inlined_call_operand.vmem [shape: f32[4,2048], index: 0, kind: input, shape index: {}]   ;;  %s2236_s1 = inlined_call_operand.hbm [shape: bf16[2048,128], index: 1, kind: input, shape index: {}]   ;;  %s2237_s2 = inlined_call_operand.vmem [shape: f32[1,64], index: 2, kind: input, shape index: {}]   ;;  %s2238_s3 = inlined_call_operand.vmem [shape: f32[1,64], index: 3, kind: input, shape index: {}]   ;;  %s2239_s4 = inlined_call_operand.vmem [shape: f32[64,8], index: 4, kind: input, shape index: {}]   ;;  %s2240_s5 = inlined_call_operand.vmem [shape: f32[1,8], index: 5, kind: input, shape index: {}]   ;;  %s2241_s6 = inlined_call_operand.vmem [shape: f32[2,8], index: 6, kind: output, shape index: {}]  }
   0x1   :  { %s18_s23 = sshll.u32 %s2236_s1, 4  ;;  %s20_s25 = sshll.u32 %s2116_s24, 4  ;;  %s19_s23 = int_to_ptr.hbm [resolvable:$true] %s18_s23  ;;  %s21_s25 = int_to_ptr.vmem [resolvable:$true] %s20_s25 }
   0x2   :  { %s2118_s27 = smov 4  }
   0x3   :  { %26 = dma.hbm_to_vmem [thread:$0]  %s19_s23, 16384, %s21_s25, [#allocation3], %s2117_s26, %s2117_s26, %s2118_s27  }
   0x4   :  { %2114 = dma.done.wait [#allocation3], 16384  }
   0x5   :  { %2115 = vsyncadd [#allocation3], 4294950912  ;;  %v1959_v0 = vld [vmem:[#allocation2 + $0x38] sm:$0xff]  ;;  %v1958_v4 = vld [vmem:[#allocation2 + $0x30] sm:$0xff]  ;;  %vm1378_vm0 = vcmask 523264   ;;  %vm1406_vm2 = vcmask 58368  }
   0x6   :  { %v1967_v1 = vld [vmem:[#allocation2 + $0x78] sm:$0xff]  ;;  %1138 = vmatpush.bf16.msra.mxu0 %v1959_v0  ;;  %v1966_v5 = vld [vmem:[#allocation2 + $0x70] sm:$0xff]  ;;  %v1957_v8 = vld [vmem:[#allocation2 + $0x28] sm:$0xff] }
   0x7   :  { %v1975_v2 = vld [vmem:[#allocation2 + $0xb8] sm:$0xff]  ;;  %1151 = vmatpush.bf16.msra.mxu1 %v1967_v1  ;;  %v1974_v6 = vld [vmem:[#allocation2 + $0xb0] sm:$0xff]  ;;  %v1965_v9 = vld [vmem:[#allocation2 + $0x68] sm:$0xff] }
   0x8   :  { %v1983_v3 = vld [vmem:[#allocation2 + $0xf8] sm:$0xff]  ;;  %1164 = vmatpush.bf16.msra.mxu2 %v1975_v2  ;;  %v1982_v7 = vld [vmem:[#allocation2 + $0xf0] sm:$0xff]  ;;  %v1973_v10 = vld [vmem:[#allocation2 + $0xa8] sm:$0xff] }
   0x9   :  { %1177 = vmatpush.bf16.msra.mxu3 %v1983_v3  ;;  %v1981_v11 = vld [vmem:[#allocation2 + $0xe8] sm:$0xff]  ;;  %v1956_v12 = vld [vmem:[#allocation2 + $0x20] sm:$0xff]  ;;  %v1955_v16 = vld [vmem:[#allocation2 + $0x18] sm:$0xff] }
   0xa   :  { %1139 = vmatpush.bf16.msra.mxu0 %v1958_v4  ;;  %v1964_v13 = vld [vmem:[#allocation2 + $0x60] sm:$0xff]  ;;  %v1963_v17 = vld [vmem:[#allocation2 + $0x58] sm:$0xff]  ;;  %v1954_v20 = vld [vmem:[#allocation2 + $0x10] sm:$0xff] }
   0xb   :  { %1152 = vmatpush.bf16.msra.mxu1 %v1966_v5  ;;  %v1972_v14 = vld [vmem:[#allocation2 + $0xa0] sm:$0xff]  ;;  %v1971_v18 = vld [vmem:[#allocation2 + $0x98] sm:$0xff]  ;;  %v1962_v22 = vld [vmem:[#allocation2 + $0x50] sm:$0xff] }
   0xc   :  { %1165 = vmatpush.bf16.msra.mxu2 %v1974_v6  ;;  %v1980_v15 = vld [vmem:[#allocation2 + $0xe0] sm:$0xff]  ;;  %v1979_v19 = vld [vmem:[#allocation2 + $0xd8] sm:$0xff]  ;;  %v1970_v24 = vld [vmem:[#allocation2 + $0x90] sm:$0xff] }
   0xd   :  { %1178 = vmatpush.bf16.msra.mxu3 %v1982_v7  ;;  %v40_v21 = vld [vmem:[%s2235_s0 + $0x8] sm:$0xff]  ;;  %v39_v23 = vld [vmem:[%s2235_s0] sm:$0xff]  ;;  %v1978_v25 = vld [vmem:[#allocation2 + $0xd0] sm:$0xff] }
   0xe   :  { %1140 = vmatpush.bf16.msra.mxu0 %v1957_v8  ;;  %57 = vst [vmem:[#allocation1 + $0x10] ss:$2 sm:$0xff] %v40_v21  ;;  %v1953_v26 = vld [vmem:[#allocation2 + $0x8] sm:$0xff]  ;;  %v44_v30 = vld [vmem:[%s2235_s0 + $0x28] sm:$0xff]  ;;  %v43_v32 = vld [vmem:[%s2235_s0 + $0x20] sm:$0xff] }
   0xf   :  { %1153 = vmatpush.bf16.msra.mxu1 %v1965_v9  ;;  %55 = vst [vmem:[#allocation1] ss:$2 sm:$0xff] %v39_v23  ;;  %v1961_v27 = vld [vmem:[#allocation2 + $0x48] sm:$0xff]  ;;  %v1952_v31 = vld [vmem:[#allocation2] sm:$0xff]  ;;  %v1991_v40 = vld [vmem:[#allocation2 + $0x138] sm:$0xff] }
  0x10   :  { %1166 = vmatpush.bf16.msra.mxu2 %v1973_v10  ;;  %v1969_v28 = vld [vmem:[#allocation2 + $0x88] sm:$0xff]  ;;  %v1960_v35 = vld [vmem:[#allocation2 + $0x40] sm:$0xff]  ;;  %v1999_v41 = vld [vmem:[#allocation2 + $0x178] sm:$0xff] }
  0x11   :  { %1179 = vmatpush.bf16.msra.mxu3 %v1981_v11  ;;  %v1977_v29 = vld [vmem:[#allocation2 + $0xc8] sm:$0xff]  ;;  %v1968_v36 = vld [vmem:[#allocation2 + $0x80] sm:$0xff]  ;;  %v2007_v42 = vld [vmem:[#allocation2 + $0x1b8] sm:$0xff] }
  0x12   :  { %1141 = vmatpush.bf16.msra.mxu0 %v1956_v12  ;;  %v1976_v37 = vld [vmem:[#allocation2 + $0xc0] sm:$0xff]  ;;  %v2015_v43 = vld [vmem:[#allocation2 + $0x1f8] sm:$0xff]  ;;  %v42_v44 = vld [vmem:[%s2235_s0 + $0x18] sm:$0xff] }
  0x13   :  { %1154 = vmatpush.bf16.msra.mxu1 %v1964_v13  ;;  %61 = vst [vmem:[#allocation1 + $0x30] ss:$2 sm:$0xff] %v42_v44  ;;  %v41_v47 = vld [vmem:[%s2235_s0 + $0x10] sm:$0xff]  ;;  %v1990_v50 = vld [vmem:[#allocation2 + $0x130] sm:$0xff]  ;;  %v1988_v61 = vld [vmem:[#allocation2 + $0x120] sm:$0xff] }
  0x14   :  { %1167 = vmatpush.bf16.msra.mxu2 %v1972_v14  ;;  %59 = vst [vmem:[#allocation1 + $0x20] ss:$2 sm:$0xff] %v41_v47  ;;  %v1998_v51 = vld [vmem:[#allocation2 + $0x170] sm:$0xff]  ;;  %v1989_v54 = vld [vmem:[#allocation2 + $0x128] sm:$0xff]  ;;  %v1996_v62 = vld [vmem:[#allocation2 + $0x160] sm:$0xff] }
  0x15   :  { %1180 = vmatpush.bf16.msra.mxu3 %v1980_v15  ;;  %v64_v33 = vld.sshfl [vmem:[#allocation1 + $0x10] sm:$0xff pattern:$0x75316420]  ;;  %v65_v34 = vld.sshfl [vmem:[#allocation1 + $0x18] sm:$0xff pattern:$0x75316420] }
  0x16   :  { %1142 = vmatpush.bf16.msra.mxu0 %v1955_v16  ;;  %71 = vst [vmem:[#allocation1 + $0x10] ss:$2 sm:$0xff] %v44_v30  ;;  %v62_v38 = vld.sshfl [vmem:[#allocation1] sm:$0xff pattern:$0x75316420]  ;;  %v100_v45 = vpack.c.bf16 %v64_v33, %v64_v33  ;;  %v101_v48 = vpack.c.bf16 %v65_v34, %v65_v34  ;;  %v2006_v52 = vld [vmem:[#allocation2 + $0x1b0] sm:$0xff] }
  0x17   :  { %1155 = vmatpush.bf16.msra.mxu1 %v1963_v17  ;;  %v63_v39 = vld.sshfl [vmem:[#allocation1 + $0x8] sm:$0xff pattern:$0x75316420]  ;;  %v98_v46 = vpack.c.bf16 %v62_v38, %v62_v38  ;;  %v2014_v53 = vld [vmem:[#allocation2 + $0x1f0] sm:$0xff]  ;;  %v1997_v56 = vld [vmem:[#allocation2 + $0x168] sm:$0xff] }
  0x18   :  { %1168 = vmatpush.bf16.msra.mxu2 %v1971_v18  ;;  %70 = vst [vmem:[#allocation1] ss:$2 sm:$0xff] %v43_v32  ;;  %v99_v49 = vpack.c.bf16 %v63_v39, %v63_v39  ;;  %v46_v55 = vld [vmem:[%s2235_s0 + $0x38] sm:$0xff]  ;;  %v2005_v57 = vld [vmem:[#allocation2 + $0x1a8] sm:$0xff]  ;;  %v2004_v2 = vld [vmem:[#allocation2 + $0x1a0] sm:$0xff] }
  0x19   :  { %1181 = vmatpush.bf16.msra.mxu3 %v1979_v19  ;;  %v2013_v58 = vld [vmem:[#allocation2 + $0x1e8] sm:$0xff]  ;;  %v2012_v3 = vld [vmem:[#allocation2 + $0x1e0] sm:$0xff]  ;;  %v1987_v4 = vld [vmem:[#allocation2 + $0x118] sm:$0xff] }
  0x1a   :  { %1143 = vmatpush.bf16.msra.mxu0 %v1954_v20  ;;  %v2180_v59 = vld.sshfl [vmem:[#allocation1 + $0x30] sm:$0xff pattern:$0x75316420]  ;;  %v2182_v60 = vld.sshfl [vmem:[#allocation1 + $0x38] sm:$0xff pattern:$0x75316420] }
  0x1b   :  { %1156 = vmatpush.bf16.msra.mxu1 %v1962_v22  ;;  %73 = vst [vmem:[#allocation1 + $0x30] ss:$2 sm:$0xff] %v46_v55  ;;  %v45_v63 = vld [vmem:[%s2235_s0 + $0x30] sm:$0xff]  ;;  %v66_v0 = vld.sshfl [vmem:[#allocation1 + $0x20] sm:$0xff pattern:$0x75316420] }
  0x1c   :  { %1169 = vmatpush.bf16.msra.mxu2 %v1970_v24  ;;  %v67_v1 = vld.sshfl [vmem:[#allocation1 + $0x28] sm:$0xff pattern:$0x75316420]  ;;  %v1995_v5 = vld [vmem:[#allocation2 + $0x158] sm:$0xff]  ;;  %v1986_v8 = vld [vmem:[#allocation2 + $0x110] sm:$0xff]  ;;  %v104_v24 = vpack.c.bf16 %v2180_v59, %v2180_v59 }
  0x1d   :  { %1182 = vmatpush.bf16.msra.mxu3 %v1978_v25  ;;  %72 = vst [vmem:[#allocation1 + $0x20] ss:$2 sm:$0xff] %v45_v63  ;;  %v2003_v6 = vld [vmem:[#allocation2 + $0x198] sm:$0xff]  ;;  %v1994_v9 = vld [vmem:[#allocation2 + $0x150] sm:$0xff]  ;;  %v1985_v12 = vld [vmem:[#allocation2 + $0x108] sm:$0xff]  ;;  %v102_v25 = vpack.c.bf16 %v66_v0, %v66_v0 }
  0x1e   :  { %1144 = vmatpush.bf16.msra.mxu0 %v1953_v26  ;;  %v2011_v7 = vld [vmem:[#allocation2 + $0x1d8] sm:$0xff]  ;;  %v2002_v10 = vld [vmem:[#allocation2 + $0x190] sm:$0xff]  ;;  %v1993_v13 = vld [vmem:[#allocation2 + $0x148] sm:$0xff]  ;;  %v105_v26 = vpack.c.bf16 %v2182_v60, %v2182_v60 }
  0x1f   :  { %1157 = vmatpush.bf16.msra.mxu1 %v1961_v27  ;;  %v2010_v11 = vld [vmem:[#allocation2 + $0x1d0] sm:$0xff]  ;;  %v2001_v14 = vld [vmem:[#allocation2 + $0x188] sm:$0xff]  ;;  %v1984_v16 = vld [vmem:[#allocation2 + $0x100] sm:$0xff]  ;;  %v103_v27 = vpack.c.bf16 %v67_v1, %v67_v1 }
  0x20   :  { %1170 = vmatpush.bf16.msra.mxu2 %v1969_v28  ;;  %v2009_v15 = vld [vmem:[#allocation2 + $0x1c8] sm:$0xff]  ;;  %v1992_v17 = vld [vmem:[#allocation2 + $0x140] sm:$0xff]  ;;  %v2023_v20 = vld [vmem:[#allocation2 + $0x238] sm:$0xff] }
  0x21   :  { %1183 = vmatpush.bf16.msra.mxu3 %v1977_v29  ;;  %v2000_v18 = vld [vmem:[#allocation2 + $0x180] sm:$0xff]  ;;  %v2031_v21 = vld [vmem:[#allocation2 + $0x278] sm:$0xff]  ;;  %v2022_v28 = vld [vmem:[#allocation2 + $0x230] sm:$0xff] }
  0x22   :  { %1145 = vmatpush.bf16.msra.mxu0 %v1952_v31  ;;  %v2008_v19 = vld [vmem:[#allocation2 + $0x1c0] sm:$0xff]  ;;  %v2039_v22 = vld [vmem:[#allocation2 + $0x2b8] sm:$0xff]  ;;  %v2030_v29 = vld [vmem:[#allocation2 + $0x270] sm:$0xff] }
  0x23   :  { %1158 = vmatpush.bf16.msra.mxu1 %v1960_v35  ;;  %v2047_v23 = vld [vmem:[#allocation2 + $0x2f8] sm:$0xff]  ;;  %v2038_v30 = vld [vmem:[#allocation2 + $0x2b0] sm:$0xff]  ;;  %v2021_v32 = vld [vmem:[#allocation2 + $0x228] sm:$0xff] }
  0x24   :  { %1171 = vmatpush.bf16.msra.mxu2 %v1968_v36  ;;  %v2046_v31 = vld [vmem:[#allocation2 + $0x2f0] sm:$0xff]  ;;  %v2029_v33 = vld [vmem:[#allocation2 + $0x268] sm:$0xff]  ;;  %v2020_v36 = vld [vmem:[#allocation2 + $0x220] sm:$0xff] }
  0x25   :  { %1184 = vmatpush.bf16.msra.mxu3 %v1976_v37  ;;  %1146 = vmatmul.bf16.vlgmr.msra.gmra.mxu0 %v98_v46  ;;  %v2037_v34 = vld [vmem:[#allocation2 + $0x2a8] sm:$0xff]  ;;  %v2028_v37 = vld [vmem:[#allocation2 + $0x260] sm:$0xff]  ;;  %v2018_v44 = vld [vmem:[#allocation2 + $0x210] sm:$0xff] }
  0x26   :  { %1190 = vmatpush.bf16.msrb.mxu0 %v1991_v40  ;;  %1159 = vmatmul.bf16.vlgmr.msra.gmra.mxu1 %v99_v49  ;;  %v2045_v35 = vld [vmem:[#allocation2 + $0x2e8] sm:$0xff]  ;;  %v2036_v38 = vld [vmem:[#allocation2 + $0x2a0] sm:$0xff]  ;;  %v2019_v40 = vld [vmem:[#allocation2 + $0x218] sm:$0xff] }
  0x27   :  { %1203 = vmatpush.bf16.msrb.mxu1 %v1999_v41  ;;  %1172 = vmatmul.bf16.vlgmr.msra.gmra.mxu2 %v100_v45  ;;  %v2044_v39 = vld [vmem:[#allocation2 + $0x2e0] sm:$0xff]  ;;  %v2027_v41 = vld [vmem:[#allocation2 + $0x258] sm:$0xff]  ;;  %v2026_v45 = vld [vmem:[#allocation2 + $0x250] sm:$0xff] }
  0x28   :  { %1216 = vmatpush.bf16.msrb.mxu2 %v2007_v42  ;;  %1185 = vmatmul.bf16.vlgmr.msra.gmra.mxu3 %v101_v48  ;;  %v2035_v42 = vld [vmem:[#allocation2 + $0x298] sm:$0xff]  ;;  %v2034_v46 = vld [vmem:[#allocation2 + $0x290] sm:$0xff]  ;;  %v2017_v48 = vld [vmem:[#allocation2 + $0x208] sm:$0xff] }
  0x29   :  { %1229 = vmatpush.bf16.msrb.mxu3 %v2015_v43  ;;  %v2043_v43 = vld [vmem:[#allocation2 + $0x2d8] sm:$0xff]  ;;  %v2042_v47 = vld [vmem:[#allocation2 + $0x2d0] sm:$0xff]  ;;  %v2025_v49 = vld [vmem:[#allocation2 + $0x248] sm:$0xff] }
  0x2a   :  { %1191 = vmatpush.bf16.msrb.mxu0 %v1990_v50  ;;  %v2033_v50 = vld [vmem:[#allocation2 + $0x288] sm:$0xff]  ;;  %v2040_v55 = vld [vmem:[#allocation2 + $0x2c0] sm:$0xff]  ;;  %v2079_v63 = vld [vmem:[#allocation2 + $0x3f8] sm:$0xff] }
  0x2b   :  { %1204 = vmatpush.bf16.msrb.mxu1 %v1998_v51  ;;  %v2041_v51 = vld [vmem:[#allocation2 + $0x2c8] sm:$0xff]  ;;  %v75_v60 = vld.sshfl [vmem:[#allocation1 + $0x8] sm:$0xff pattern:$0x75316420] }
  0x2c   :  { %1217 = vmatpush.bf16.msrb.mxu2 %v2006_v52  ;;  %v2016_v52 = vld [vmem:[#allocation2 + $0x200] sm:$0xff]  ;;  %v76_v59 = vld.sshfl [vmem:[#allocation1 + $0x10] sm:$0xff pattern:$0x75316420] }
  0x2d   :  { %1230 = vmatpush.bf16.msrb.mxu3 %v2014_v53  ;;  %v2024_v53 = vld [vmem:[#allocation2 + $0x240] sm:$0xff]  ;;  %v108_v1 = vpack.c.bf16 %v76_v59, %v76_v59 }
  0x2e   :  { %1192 = vmatpush.bf16.msrb.mxu0 %v1989_v54  ;;  %v2032_v54 = vld [vmem:[#allocation2 + $0x280] sm:$0xff] }
  0x2f   :  { %1205 = vmatpush.bf16.msrb.mxu1 %v1997_v56  ;;  %v2055_v56 = vld [vmem:[#allocation2 + $0x338] sm:$0xff] }
  0x30   :  { %1218 = vmatpush.bf16.msrb.mxu2 %v2005_v57  ;;  %v2063_v57 = vld [vmem:[#allocation2 + $0x378] sm:$0xff] }
  0x31   :  { %1231 = vmatpush.bf16.msrb.mxu3 %v2013_v58  ;;  %v74_v58 = vld.sshfl [vmem:[#allocation1] sm:$0xff pattern:$0x75316420] }
  0x32   :  { %1193 = vmatpush.bf16.msrb.mxu0 %v1988_v61  ;;  %v77_v61 = vld.sshfl [vmem:[#allocation1 + $0x18] sm:$0xff pattern:$0x75316420]  ;;  %v106_v0 = vpack.c.bf16 %v74_v58, %v74_v58 }
  0x33   :  { %1206 = vmatpush.bf16.msrb.mxu1 %v1996_v62  ;;  %v2071_v62 = vld [vmem:[#allocation2 + $0x3b8] sm:$0xff] }
  0x34   :  { %1219 = vmatpush.bf16.msrb.mxu2 %v2004_v2  ;;  %v107_v2 = vpack.c.bf16 %v75_v60, %v75_v60 }
  0x35   :  { %1232 = vmatpush.bf16.msrb.mxu3 %v2012_v3  ;;  %v109_v3 = vpack.c.bf16 %v77_v61, %v77_v61 }
  0x36   :  { %1194 = vmatpush.bf16.msrb.mxu0 %v1987_v4  ;;  %v2054_v4 = vld [vmem:[#allocation2 + $0x330] sm:$0xff] }
  0x37   :  { %1207 = vmatpush.bf16.msrb.mxu1 %v1995_v5  ;;  %v2062_v5 = vld [vmem:[#allocation2 + $0x370] sm:$0xff] }
  0x38   :  { %1220 = vmatpush.bf16.msrb.mxu2 %v2003_v6  ;;  %v2070_v6 = vld [vmem:[#allocation2 + $0x3b0] sm:$0xff] }
  0x39   :  { %1233 = vmatpush.bf16.msrb.mxu3 %v2011_v7  ;;  %v2078_v7 = vld [vmem:[#allocation2 + $0x3f0] sm:$0xff] }
  0x3a   :  { %1195 = vmatpush.bf16.msrb.mxu0 %v1986_v8  ;;  %v2083_v8 = vld [vmem:[%s2238_s3] ss:$0 sm:$0xff] }
  0x3b   :  { %1208 = vmatpush.bf16.msrb.mxu1 %v1994_v9  ;;  %v2053_v9 = vld [vmem:[#allocation2 + $0x328] sm:$0xff]  ;;  %1355 = vrot.lane.b32.xlu0 %v2083_v8, %s2117_s26 }
  0x3c   :  { %1221 = vmatpush.bf16.msrb.mxu2 %v2002_v10  ;;  %v2061_v10 = vld [vmem:[#allocation2 + $0x368] sm:$0xff] }
  0x3d   :  { %1234 = vmatpush.bf16.msrb.mxu3 %v2010_v11  ;;  %v2069_v11 = vld [vmem:[#allocation2 + $0x3a8] sm:$0xff] }
  0x3e   :  { %1196 = vmatpush.bf16.msrb.mxu0 %v1985_v12  ;;  %v2077_v12 = vld [vmem:[#allocation2 + $0x3e8] sm:$0xff] }
  0x3f   :  { %1209 = vmatpush.bf16.msrb.mxu1 %v1993_v13  ;;  %v2052_v13 = vld [vmem:[#allocation2 + $0x320] sm:$0xff]  ;;  %v1372_v8 = vld [vmem:[%s2239_s4 + $0x30] sm:$0xff] }
  0x40   :  { %1222 = vmatpush.bf16.msrb.mxu2 %v2001_v14  ;;  %v2060_v14 = vld [vmem:[#allocation2 + $0x360] sm:$0xff] }
  0x41   :  { %1235 = vmatpush.bf16.msrb.mxu3 %v2009_v15  ;;  %v2068_v15 = vld [vmem:[#allocation2 + $0x3a0] sm:$0xff] }
  0x42   :  { %1197 = vmatpush.bf16.msrb.mxu0 %v1984_v16  ;;  %v2076_v16 = vld [vmem:[#allocation2 + $0x3e0] sm:$0xff] }
  0x43   :  { %1210 = vmatpush.bf16.msrb.mxu1 %v1992_v17  ;;  %v2051_v17 = vld [vmem:[#allocation2 + $0x318] sm:$0xff] }
  0x44   :  { %1223 = vmatpush.bf16.msrb.mxu2 %v2000_v18  ;;  %v2059_v18 = vld [vmem:[#allocation2 + $0x358] sm:$0xff] }
  0x45   :  { %1236 = vmatpush.bf16.msrb.mxu3 %v2008_v19  ;;  %1198 = vmatmul.bf16.vlgmr.msrb.gmra.mxu0 %v102_v25  ;;  %v2067_v19 = vld [vmem:[#allocation2 + $0x398] sm:$0xff]  ;;  %v2049_v25 = vld [vmem:[#allocation2 + $0x308] sm:$0xff] }
  0x46   :  { %1242 = vmatpush.bf16.msra.mxu0 %v2023_v20  ;;  %1211 = vmatmul.bf16.vlgmr.msrb.gmra.mxu1 %v103_v27  ;;  %v2075_v20 = vld [vmem:[#allocation2 + $0x3d8] sm:$0xff]  ;;  %v2065_v27 = vld [vmem:[#allocation2 + $0x388] sm:$0xff] }
  0x47   :  { %1255 = vmatpush.bf16.msra.mxu1 %v2031_v21  ;;  %1224 = vmatmul.bf16.vlgmr.msrb.gmra.mxu2 %v104_v24  ;;  %v2050_v21 = vld [vmem:[#allocation2 + $0x310] sm:$0xff] }
  0x48   :  { %1268 = vmatpush.bf16.msra.mxu2 %v2039_v22  ;;  %1237 = vmatmul.bf16.vlgmr.msrb.gmra.mxu3 %v105_v26  ;;  %v2058_v22 = vld [vmem:[#allocation2 + $0x350] sm:$0xff]  ;;  %v2057_v26 = vld [vmem:[#allocation2 + $0x348] sm:$0xff] }
  0x49   :  { %1281 = vmatpush.bf16.msra.mxu3 %v2047_v23  ;;  %v2066_v23 = vld [vmem:[#allocation2 + $0x390] sm:$0xff] }
  0x4a   :  { %1243 = vmatpush.bf16.msra.mxu0 %v2022_v28  ;;  %v2074_v24 = vld [vmem:[#allocation2 + $0x3d0] sm:$0xff]  ;;  %v2073_v28 = vld [vmem:[#allocation2 + $0x3c8] sm:$0xff] }
  0x4b   :  { %1256 = vmatpush.bf16.msra.mxu1 %v2030_v29  ;;  %v2048_v29 = vld [vmem:[#allocation2 + $0x300] sm:$0xff] }
  0x4c   :  { %1269 = vmatpush.bf16.msra.mxu2 %v2038_v30  ;;  %v2056_v30 = vld [vmem:[#allocation2 + $0x340] sm:$0xff] }
  0x4d   :  { %1282 = vmatpush.bf16.msra.mxu3 %v2046_v31  ;;  %v2064_v31 = vld [vmem:[#allocation2 + $0x380] sm:$0xff] }
  0x4e   :  { %1244 = vmatpush.bf16.msra.mxu0 %v2021_v32  ;;  %v2072_v32 = vld [vmem:[#allocation2 + $0x3c0] sm:$0xff] }
  0x4f   :  { %1257 = vmatpush.bf16.msra.mxu1 %v2029_v33  ;;  %v78_v33 = vld.sshfl [vmem:[#allocation1 + $0x20] sm:$0xff pattern:$0x75316420] }
  0x50   :  { %1270 = vmatpush.bf16.msra.mxu2 %v2037_v34  ;;  %v79_v34 = vld.sshfl [vmem:[#allocation1 + $0x28] sm:$0xff pattern:$0x75316420] }
  0x51   :  { %1283 = vmatpush.bf16.msra.mxu3 %v2045_v35  ;;  %v80_v35 = vld.sshfl [vmem:[#allocation1 + $0x30] sm:$0xff pattern:$0x75316420] }
  0x52   :  { %1245 = vmatpush.bf16.msra.mxu0 %v2020_v36  ;;  %v81_v36 = vld.sshfl [vmem:[#allocation1 + $0x38] sm:$0xff pattern:$0x75316420] }
  0x53   :  { %1258 = vmatpush.bf16.msra.mxu1 %v2028_v37  ;;  %v110_v37 = vpack.c.bf16 %v78_v33, %v78_v33 }
  0x54   :  { %1271 = vmatpush.bf16.msra.mxu2 %v2036_v38  ;;  %v111_v38 = vpack.c.bf16 %v79_v34, %v79_v34 }
  0x55   :  { %1284 = vmatpush.bf16.msra.mxu3 %v2044_v39  ;;  %v112_v39 = vpack.c.bf16 %v80_v35, %v80_v35  ;;  %v1366_v35 = vld [vmem:[%s2239_s4] sm:$0xff] }
  0x56   :  { %1246 = vmatpush.bf16.msra.mxu0 %v2019_v40  ;;  %v113_v40 = vpack.c.bf16 %v81_v36, %v81_v36  ;;  %v2084_v36 = vld [vmem:[%s2237_s2] ss:$0 sm:$0xff] }
  0x57   :  { %1259 = vmatpush.bf16.msra.mxu1 %v2027_v41 }
  0x58   :  { %1272 = vmatpush.bf16.msra.mxu2 %v2035_v42 }
  0x59   :  { %1285 = vmatpush.bf16.msra.mxu3 %v2043_v43 }
  0x5a   :  { %1247 = vmatpush.bf16.msra.mxu0 %v2018_v44 }
  0x5b   :  { %1260 = vmatpush.bf16.msra.mxu1 %v2026_v45 }
  0x5c   :  { %1273 = vmatpush.bf16.msra.mxu2 %v2034_v46 }
  0x5d   :  { %1286 = vmatpush.bf16.msra.mxu3 %v2042_v47 }
  0x5e   :  { %1248 = vmatpush.bf16.msra.mxu0 %v2017_v48 }
  0x5f   :  { %1261 = vmatpush.bf16.msra.mxu1 %v2025_v49 }
  0x60   :  { %1274 = vmatpush.bf16.msra.mxu2 %v2033_v50 }
  0x61   :  { %1287 = vmatpush.bf16.msra.mxu3 %v2041_v51 }
  0x62   :  { %1249 = vmatpush.bf16.msra.mxu0 %v2016_v52 }
  0x63   :  { %1262 = vmatpush.bf16.msra.mxu1 %v2024_v53 }
  0x64   :  { %1275 = vmatpush.bf16.msra.mxu2 %v2032_v54 }
  0x65   :  { %1288 = vmatpush.bf16.msra.mxu3 %v2040_v55  ;;  %1250 = vmatmul.bf16.vlgmr.msra.gmra.mxu0 %v106_v0 }
  0x66   :  { %1294 = vmatpush.bf16.msrb.mxu0 %v2055_v56  ;;  %1263 = vmatmul.bf16.vlgmr.msra.gmra.mxu1 %v107_v2 }
  0x67   :  { %1307 = vmatpush.bf16.msrb.mxu1 %v2063_v57  ;;  %1276 = vmatmul.bf16.vlgmr.msra.gmra.mxu2 %v108_v1 }
  0x68   :  { %1320 = vmatpush.bf16.msrb.mxu2 %v2071_v62  ;;  %1289 = vmatmul.bf16.vlgmr.msra.gmra.mxu3 %v109_v3 }
  0x69   :  { %1333 = vmatpush.bf16.msrb.mxu3 %v2079_v63 }
  0x6a   :  { %1295 = vmatpush.bf16.msrb.mxu0 %v2054_v4 }
  0x6b   :  { %1308 = vmatpush.bf16.msrb.mxu1 %v2062_v5 }
  0x6c   :  { %1321 = vmatpush.bf16.msrb.mxu2 %v2070_v6 }
  0x6d   :  { %1334 = vmatpush.bf16.msrb.mxu3 %v2078_v7  ;;  %v1373_v7 = vld [vmem:[%s2239_s4 + $0x38] sm:$0xff] }
  0x6e   :  { %1296 = vmatpush.bf16.msrb.mxu0 %v2053_v9 }
  0x6f   :  { %1309 = vmatpush.bf16.msrb.mxu1 %v2061_v10  ;;  %v1371_v10 = vld [vmem:[%s2239_s4 + $0x28] sm:$0xff] }
  0x70   :  { %1322 = vmatpush.bf16.msrb.mxu2 %v2069_v11 }
  0x71   :  { %1335 = vmatpush.bf16.msrb.mxu3 %v2077_v12  ;;  %v1370_v12 = vld [vmem:[%s2239_s4 + $0x20] sm:$0xff] }
  0x72   :  { %1297 = vmatpush.bf16.msrb.mxu0 %v2052_v13  ;;  %v1369_v13 = vld [vmem:[%s2239_s4 + $0x18] sm:$0xff] }
  0x73   :  { %1310 = vmatpush.bf16.msrb.mxu1 %v2060_v14 }
  0x74   :  { %1323 = vmatpush.bf16.msrb.mxu2 %v2068_v15  ;;  %v1368_v15 = vld [vmem:[%s2239_s4 + $0x10] sm:$0xff] }
  0x75   :  { %1336 = vmatpush.bf16.msrb.mxu3 %v2076_v16 }
  0x76   :  { %1298 = vmatpush.bf16.msrb.mxu0 %v2051_v17  ;;  %v1367_v17 = vld [vmem:[%s2239_s4 + $0x8] sm:$0xff] }
  0x77   :  { %1311 = vmatpush.bf16.msrb.mxu1 %v2059_v18 }
  0x78   :  { %1324 = vmatpush.bf16.msrb.mxu2 %v2067_v19 }
  0x79   :  { %1337 = vmatpush.bf16.msrb.mxu3 %v2075_v20 }
  0x7a   :  { %1299 = vmatpush.bf16.msrb.mxu0 %v2050_v21 }
  0x7b   :  { %1312 = vmatpush.bf16.msrb.mxu1 %v2058_v22 }
  0x7c   :  { %1325 = vmatpush.bf16.msrb.mxu2 %v2066_v23 }
  0x7d   :  { %1338 = vmatpush.bf16.msrb.mxu3 %v2074_v24 }
  0x7e   :  { %1300 = vmatpush.bf16.msrb.mxu0 %v2049_v25 }
  0x7f   :  { %1313 = vmatpush.bf16.msrb.mxu1 %v2057_v26 }
  0x80   :  { %1326 = vmatpush.bf16.msrb.mxu2 %v2065_v27 }
  0x81   :  { %1339 = vmatpush.bf16.msrb.mxu3 %v2073_v28 }
  0x82   :  { %1301 = vmatpush.bf16.msrb.mxu0 %v2048_v29 }
  0x83   :  { %1314 = vmatpush.bf16.msrb.mxu1 %v2056_v30 }
  0x84   :  { %1327 = vmatpush.bf16.msrb.mxu2 %v2064_v31 }
  0x85   :  { %1340 = vmatpush.bf16.msrb.mxu3 %v2072_v32  ;;  %1302 = vmatmul.bf16.vlgmr.msrb.gmra.mxu0 %v110_v37 }
  0x86   :  { %1315 = vmatmul.bf16.vlgmr.msrb.gmra.mxu1 %v111_v38  ;;  %1390 = vmatpush.msra.mxu0 %v1373_v7 }
  0x87   :  { %1328 = vmatmul.bf16.vlgmr.msrb.gmra.mxu2 %v112_v39 }
  0x88   :  { %1341 = vmatmul.bf16.vlgmr.msrb.gmra.mxu3 %v113_v40  ;;  %1391 = vmatpush.msra.mxu0 %v1372_v8 }
  0x8a   :  { %1392 = vmatpush.msra.mxu0 %v1371_v10 }
  0x8c   :  { %1393 = vmatpush.msra.mxu0 %v1370_v12 }
  0x8e   :  { %1394 = vmatpush.msra.mxu0 %v1369_v13 }
  0x90   :  { %1395 = vmatpush.msra.mxu0 %v1368_v15 }
  0x92   :  { %1396 = vmatpush.msra.mxu0 %v1367_v17 }
  0x94   :  { %1397 = vmatpush.msra.mxu0 %v1366_v35 }
  0xa2   :  { %v1147_v41 = vpop.f32.mrf.mxu0 }
  0xa3   :  { %v1160_v42 = vpop.f32.mrf.mxu1 }
  0xa4   :  { %v1161_v43 = vadd.f32 %v1160_v42, %v1147_v41  ;;  %v1402_v41 = vlaneseq }
  0xa6   :  { %v1403_v42 = vand.u32 127, %v1402_v41 }
  0xa8   :  { %vm1404_vm1 = vcmp.lt.s32.totalorder %v1403_v42, 4 }
  0xaa   :  { %v1173_v44 = vpop.f32.mrf.mxu2  ;;  %v1149_v47 = vpop.f32.mrf.mxu0 }
  0xab   :  { %v1174_v45 = vadd.f32 %v1173_v44, %v1161_v43  ;;  %v1186_v46 = vpop.f32.mrf.mxu3  ;;  %v1162_v49 = vpop.f32.mrf.mxu1  ;;  %v2085_v43 = vld [vmem:[%s2240_s5] ss:$0 sm:$0xff] }
  0xad   :  { %v1187_v48 = vadd.f32 %v1186_v46, %v1174_v45  ;;  %v1356_v28 = vpop.permute.xlu0 %1355 }
  0xb2   :  { %v1175_v50 = vpop.f32.mrf.mxu2 }
  0xb3   :  { %v1188_v51 = vpop.f32.mrf.mxu3 }
  0xc2   :  { %v1199_v52 = vpop.f32.mrf.mxu0 }
  0xc3   :  { %v1212_v53 = vpop.f32.mrf.mxu1  ;;  %v1200_v62 = vadd.f32 %v1199_v52, %v1187_v48 }
  0xc5   :  { %v1213_v2 = vadd.f32 %v1212_v53, %v1200_v62 }
  0xca   :  { %v1225_v54 = vpop.f32.mrf.mxu2  ;;  %v1201_v56 = vpop.f32.mrf.mxu0 }
  0xcb   :  { %v1238_v55 = vpop.f32.mrf.mxu3  ;;  %v1214_v57 = vpop.f32.mrf.mxu1  ;;  %v1226_v4 = vadd.f32 %v1225_v54, %v1213_v2 }
  0xcd   :  { %v1239_v9 = vadd.f32 %v1238_v55, %v1226_v4 }
  0xd2   :  { %v1227_v58 = vpop.f32.mrf.mxu2 }
  0xd3   :  { %v1240_v59 = vpop.f32.mrf.mxu3 }
  0xe2   :  { %v1251_v60 = vpop.f32.mrf.mxu0 }
  0xe3   :  { %v1264_v61 = vpop.f32.mrf.mxu1  ;;  %v1252_v11 = vadd.f32 %v1251_v60, %v1239_v9 }
  0xe5   :  { %v1265_v14 = vadd.f32 %v1264_v61, %v1252_v11 }
  0xea   :  { %v1277_v63 = vpop.f32.mrf.mxu2  ;;  %v1253_v1 = vpop.f32.mrf.mxu0 }
  0xeb   :  { %v1290_v0 = vpop.f32.mrf.mxu3  ;;  %v1266_v3 = vpop.f32.mrf.mxu1  ;;  %v1278_v16 = vadd.f32 %v1277_v63, %v1265_v14 }
  0xed   :  { %v1291_v18 = vadd.f32 %v1290_v0, %v1278_v16 }
  0xf2   :  { %v1279_v5 = vpop.f32.mrf.mxu2 }
  0xf3   :  { %v1292_v6 = vpop.f32.mrf.mxu3 }
 0x102   :  { %v1303_v19 = vpop.f32.mrf.mxu0 }
 0x103   :  { %v1316_v20 = vpop.f32.mrf.mxu1  ;;  %v1304_v21 = vadd.f32 %v1303_v19, %v1291_v18 }
 0x105   :  { %v1317_v22 = vadd.f32 %v1316_v20, %v1304_v21 }
 0x10a   :  { %v1329_v23 = vpop.f32.mrf.mxu2  ;;  %v1305_v26 = vpop.f32.mrf.mxu0 }
 0x10b   :  { %v1342_v24 = vpop.f32.mrf.mxu3  ;;  %v1330_v25 = vadd.f32 %v1329_v23, %v1317_v22  ;;  %v1318_v27 = vpop.f32.mrf.mxu1 }
 0x10d   :  { %v1343_v29 = vadd.f32 %v1342_v24, %v1330_v25 }
 0x10f   :  { %v1358_v30 = vadd.f32 %v1356_v28, %v1343_v29  ;;  %v1350_v37 = vadd.f32 %v2084_v36, %v1343_v29 }
 0x111   :  { %v1359_v31 = vmax.f32 %v1358_v30, 0.0  ;;  %v1351_v38 = vmax.f32 %v1350_v37, 0.0 }
 0x112   :  { %v1331_v32 = vpop.f32.mrf.mxu2 }
 0x113   :  { %v1344_v33 = vpop.f32.mrf.mxu3  ;;  %v1361_v34 = vrot.slane %v1359_v31, 2 }
 0x115   :  { %1362 = vrot.lane.b32.xlu0 %v1361_v34, %s2117_s26 }
 0x187   :  { %v1363_v39 = vpop.permute.xlu0 %1362 }
 0x188   :  { %v1365_v40 = vmul.f32 %v1363_v39, %v1351_v38 }
 0x18a   :  { %1951 = vmatmul.msk.f32.vlgmr.msra.gmra.mxu0 %vm1378_vm0, %v1365_v40 }
 0x207   :  { %v1399_v44 = vpop.f32.mrf.mxu0 }
 0x208   :  { %v1400_v45 = vadd.f32 %v2085_v43, %v1399_v44 }
 0x20a   :  { %v1405_v46 = vsel %vm1404_vm1, %v1400_v45, -inf }
 0x20b   :  { %v1407_v47 = vsel %vm1406_vm2, %v1405_v46, -inf }
 0x20c   :  { %1408 = vmax.xlane.f32.xlu1 %v1407_v47 }
 0x27f   :  { %v1409_v48 = vpop.xlane.xlu1 %1408 }
 0x280   :  { %v1410_v49 = vsub.f32 %v1400_v45, %v1409_v48 }
 0x282   :  { %v1411_v50 = vmul.f32 1.442695, %v1410_v49 }
 0x284   :  { %2086 = vpow2.f32 %v1411_v50 }
 0x28a   :  { %v2087_v51 = vpop.eup %2086 }
 0x28b   :  { %v1413_v52 = vsel %vm1404_vm1, %v2087_v51, 0.0 }
 0x28c   :  { %v1414_v53 = vsel %vm1406_vm2, %v1413_v52, 0.0 }
 0x28d   :  { %1415 = vadd.xlane.f32.xlu1 %v1414_v53 }
 0x300   :  { %v1416_v54 = vpop.xlane.xlu1 %1415 }
 0x301   :  { %2088 = vrcp.f32 %v1416_v54  ;;  %v1428_v58 = vand.u32 2147483648, %v1416_v54  ;;  %v1426_v60 = vand.u32 2147483647, %v1416_v54  ;;  %vm1422_vm4 = vweird.f32 %v1416_v54 }
 0x303   :  { %v1429_v62 = vor.u32 1.1754944e-38, %v1428_v58  ;;  %vm1427_vm6 = vcmp.eq.f32.partialorder %v1426_v60, 8.507059e+37 }
 0x307   :  { %v2089_v55 = vpop.eup %2088 }
 0x308   :  { %v1418_v56 = vmul.f32 %v2089_v55, %v1416_v54  ;;  %vm1423_vm3 = vweird.f32 %v2089_v55 }
 0x309   :  { %vm1424_vm5 = vmor %vm1422_vm4, %vm1423_vm3 }
 0x30a   :  { %v1419_v57 = vsub.f32 1.0, %v1418_v56 }
 0x30c   :  { %v1420_v59 = vmul.f32 %v2089_v55, %v1419_v57 }
 0x30e   :  { %v1421_v61 = vadd.f32 %v2089_v55, %v1420_v59 }
 0x310   :  { %v1425_v63 = vsel %vm1424_vm5, %v2089_v55, %v1421_v61 }
 0x311   :  { %v1430_v0 = vsel %vm1427_vm6, %v1429_v62, %v1425_v63 }
 0x312   :  { %v1431_v1 = vmul.f32 %v1430_v0, %v1413_v52 }
 0x314   :  { %v1432_v2 = vsel %vm1404_vm1, %v1431_v1, %v1400_v45 }
 0x315   :  { %1433 = vst.msk [vmem:[%s2241_s6] sm:$0x3] %vm1406_vm2, %v1432_v2 }
 0x316   :  { %1438 = vsyncpa [#allocation3], 1 }

// kernel: zero_mini_forward.2
= control target key start
LH: loop header
LB: loop body
LE: loop exit
PB: predicated region body
PF: predicated region fallthrough
CT: control target
= control target key end

     0   :  { %10 = vsyncpa [#allocation5], 0  ;;  %s3374_s21 = smov [#allocation4]   ;;  %s3375_s23 = smov 128   ;;  %s4859_s0 = inlined_call_operand.vmem [shape: f32[2,8,8,4], index: 0, kind: input, shape index: {}]   ;;  %s4860_s1 = inlined_call_operand.vmem [shape: f32[3,3,4,64], index: 1, kind: input, shape index: {}]   ;;  %s4861_s2 = inlined_call_operand.vmem [shape: f32[1,64], index: 2, kind: input, shape index: {}]   ;;  %s4862_s3 = inlined_call_operand.hbm [shape: f32[3,3,64,64], index: 3, kind: input, shape index: {}]   ;;  %s4863_s4 = inlined_call_operand.vmem [shape: f32[1,64], index: 4, kind: input, shape index: {}]   ;;  %s4864_s5 = inlined_call_operand.vmem [shape: f32[4,64,32], index: 5, kind: output, shape index: {}]  }
   0x1   :  { %s21_s20 = sshll.u32 %s4862_s3, 4  ;;  %s23_s22 = sshll.u32 %s3374_s21, 4  ;;  %s22_s20 = int_to_ptr.hbm [resolvable:$true] %s21_s20  ;;  %s24_s22 = int_to_ptr.vmem [resolvable:$true] %s23_s22 }
   0x2   :  { %s3376_s24 = smov 8  }
   0x3   :  { %29 = dma.hbm_to_vmem [thread:$0]  %s22_s20, 9216, %s24_s22, [#allocation5], %s3375_s23, %s3375_s23, %s3376_s24  }
   0x4   :  { %3372 = dma.done.wait [#allocation5], 9216  }
   0x5   :  { %3373 = vsyncadd [#allocation5], 4294958080  ;;  %vm36_vm0 = vcmask 31744   ;;  %vm38_vm1 = vcmask 25600   ;;  %v4865_v0 = vmov 0.0   ;;  %vm194_vm2 = vcmask 1043456  }
   0x6   :  { %58 = vst.msk [vmem:[#allocation2 + $0xa0] sm:$0xff] %vm36_vm0, %v4865_v0  ;;  %v3018_v1 = vld [vmem:[%s4860_s1 + $0x4] sm:$0xf]  ;;  %v127_v2 = vld [vmem:[%s4860_s1] sm:$0xf]  ;;  %v87_v11 = vld [vmem:[%s4859_s0 + $0x48] sm:$0xff] }
   0x7   :  { %59 = vst.msk [vmem:[#allocation2 + $0xa8] sm:$0x3] %vm38_vm1, %v4865_v0  ;;  %3339 = vmatpush.msk.msra.mxu2 %vm194_vm2, %v3018_v1  ;;  %3340 = vmatpush.msk.msra.mxu3 %vm194_vm2, %v127_v2  ;;  %v3053_v4 = vld [vmem:[%s4860_s1 + $0x8] sm:$0xf]  ;;  %v3071_v6 = vld [vmem:[%s4860_s1 + $0xc] sm:$0xf] }
   0x8   :  { %37 = vst.msk [vmem:[#allocation2] sm:$0xff] %vm36_vm0, %v4865_v0  ;;  %3019 = vmatpush.msk.msra.mxu0 %vm194_vm2, %v3018_v1  ;;  %3036 = vmatpush.msk.msra.mxu1 %vm194_vm2, %v127_v2  ;;  %v3089_v9 = vld [vmem:[%s4860_s1 + $0x10] sm:$0xf]  ;;  %v86_v10 = vld [vmem:[%s4859_s0 + $0x40] sm:$0xff]  ;;  %v79_v14 = vld [vmem:[%s4859_s0 + $0x8] sm:$0xff]  ;;  %vm1466_vm3 = vcmask 523264  }
   0x9   :  { %39 = vst.msk [vmem:[#allocation2 + $0x8] sm:$0x3] %vm38_vm1, %v4865_v0  ;;  %3054 = vmatpush.msk.msrb.mxu2 %vm194_vm2, %v3053_v4  ;;  %3072 = vmatpush.msk.msrb.mxu3 %vm194_vm2, %v3071_v6  ;;  %v78_v12 = vld [vmem:[%s4859_s0] sm:$0xff]  ;;  %v88_v13 = vld [vmem:[%s4859_s0 + $0x50] sm:$0xff]  ;;  %v89_v15 = vld [vmem:[%s4859_s0 + $0x58] sm:$0xff]  ;;  %vm1468_vm4 = vcmask 517120  }
   0xa   :  { %40 = vst.msk [vmem:[#allocation2 + $0x10] sm:$0xff] %vm36_vm0, %v4865_v0  ;;  %3090 = vmatpush.msk.msrb.mxu0 %vm194_vm2, %v3089_v9  ;;  %v80_v16 = vld [vmem:[%s4859_s0 + $0x10] sm:$0xff]  ;;  %v90_v17 = vld [vmem:[%s4859_s0 + $0x60] sm:$0xff]  ;;  %v81_v18 = vld [vmem:[%s4859_s0 + $0x18] sm:$0xff]  ;;  %vm2915_vm5 = vcmask 261120   ;;  %s3378_s24 = smov 96  }
   0xb   :  { %41 = vst.msk [vmem:[#allocation2 + $0x18] sm:$0x3] %vm38_vm1, %v4865_v0  ;;  %v91_v21 = vld [vmem:[%s4859_s0 + $0x68] sm:$0xff]  ;;  %v82_v24 = vld [vmem:[%s4859_s0 + $0x20] sm:$0xff]  ;;  %v92_v29 = vld [vmem:[%s4859_s0 + $0x70] sm:$0xff] }
   0xc   :  { %42 = vst.msk [vmem:[#allocation2 + $0x20] sm:$0xff] %vm36_vm0, %v4865_v0  ;;  %v83_v30 = vld [vmem:[%s4859_s0 + $0x28] sm:$0xff]  ;;  %v84_v35 = vld [vmem:[%s4859_s0 + $0x30] sm:$0xff]  ;;  %v3125_v40 = vld [vmem:[%s4860_s1 + $0x18] sm:$0xf] }
   0xd   :  { %43 = vst.msk [vmem:[#allocation2 + $0x28] sm:$0x3] %vm38_vm1, %v4865_v0  ;;  %v119_v3 = vld [vmem:[#allocation2 + $0xa0] sm:$0xff]  ;;  %v3143_v41 = vld [vmem:[%s4860_s1 + $0x1c] sm:$0xf] }
   0xe   :  { %v136_v5 = vld [vmem:[#allocation2 + $0xa1] sm:$0xff]  ;;  %44 = vst.msk [vmem:[#allocation2 + $0x30] sm:$0xff] %vm36_vm0, %v4865_v0  ;;  %3045 = vmatmul.msk.f32.vlgmr.msra.gmra.mxu3 %vm36_vm0, %v119_v3  ;;  %v3107_v47 = vld [vmem:[%s4860_s1 + $0x14] sm:$0xf]  ;;  %v85_v60 = vld [vmem:[%s4859_s0 + $0x38] sm:$0xff] }
   0xf   :  { %3028 = vmatmul.msk.f32.vlgmr.msra.gmra.mxu2 %vm36_vm0, %v136_v5  ;;  %45 = vst.msk [vmem:[#allocation2 + $0x38] sm:$0x3] %vm38_vm1, %v4865_v0  ;;  %v111_v8 = vld [vmem:[#allocation2] sm:$0xff]  ;;  %3144 = vmatpush.msk.msra.mxu3 %vm194_vm2, %v3143_v41 }
  0x10   :  { %46 = vst.msk [vmem:[#allocation2 + $0x40] sm:$0xff] %vm36_vm0, %v4865_v0  ;;  %v128_v7 = vld [vmem:[#allocation2 + $0x1] sm:$0xff]  ;;  %3037 = vmatmul.msk.f32.vlgmr.msra.gmra.mxu1 %vm36_vm0, %v111_v8  ;;  %3126 = vmatpush.msk.msra.mxu2 %vm194_vm2, %v3125_v40 }
  0x11   :  { %47 = vst.msk [vmem:[#allocation2 + $0x48] sm:$0x3] %vm38_vm1, %v4865_v0  ;;  %3020 = vmatmul.msk.f32.vlgmr.msra.gmra.mxu0 %vm36_vm0, %v128_v7  ;;  %v3161_v46 = vld [vmem:[%s4860_s1 + $0x20] sm:$0xf]  ;;  %3108 = vmatpush.msk.msrb.mxu1 %vm194_vm2, %v3107_v47 }
  0x12   :  { %48 = vst.msk [vmem:[#allocation2 + $0x50] sm:$0xff] %vm36_vm0, %v4865_v0  ;;  %3162 = vmatpush.msk.msra.mxu0 %vm194_vm2, %v3161_v46  ;;  %v379_v56 = vld [vmem:[#allocation2 + $0x2] sm:$0xff] }
  0x13   :  { %49 = vst.msk [vmem:[#allocation2 + $0x58] sm:$0x3] %vm38_vm1, %v4865_v0  ;;  %v387_v5 = vld [vmem:[#allocation2 + $0xa2] sm:$0xff] }
  0x14   :  { %50 = vst.msk [vmem:[#allocation2 + $0x60] sm:$0xff] %vm36_vm0, %v4865_v0 }
  0x15   :  { %51 = vst.msk [vmem:[#allocation2 + $0x68] sm:$0x3] %vm38_vm1, %v4865_v0 }
  0x16   :  { %52 = vst.msk [vmem:[#allocation2 + $0x70] sm:$0xff] %vm36_vm0, %v4865_v0 }
  0x17   :  { %53 = vst.msk [vmem:[#allocation2 + $0x78] sm:$0x3] %vm38_vm1, %v4865_v0 }
  0x18   :  { %54 = vst.msk [vmem:[#allocation2 + $0x80] sm:$0xff] %vm36_vm0, %v4865_v0 }
  0x19   :  { %55 = vst.msk [vmem:[#allocation2 + $0x88] sm:$0x3] %vm38_vm1, %v4865_v0 }
  0x1a   :  { %56 = vst.msk [vmem:[#allocation2 + $0x90] sm:$0xff] %vm36_vm0, %v4865_v0 }
  0x1b   :  { %57 = vst.msk [vmem:[#allocation2 + $0x98] sm:$0x3] %vm38_vm1, %v4865_v0 }
  0x1c   :  { %60 = vst.msk [vmem:[#allocation2 + $0xb0] sm:$0xff] %vm36_vm0, %v4865_v0 }
  0x1d   :  { %61 = vst.msk [vmem:[#allocation2 + $0xb8] sm:$0x3] %vm38_vm1, %v4865_v0 }
  0x1e   :  { %62 = vst.msk [vmem:[#allocation2 + $0xc0] sm:$0xff] %vm36_vm0, %v4865_v0 }
  0x1f   :  { %63 = vst.msk [vmem:[#allocation2 + $0xc8] sm:$0x3] %vm38_vm1, %v4865_v0 }
  0x20   :  { %64 = vst.msk [vmem:[#allocation2 + $0xd0] sm:$0xff] %vm36_vm0, %v4865_v0 }
  0x21   :  { %65 = vst.msk [vmem:[#allocation2 + $0xd8] sm:$0x3] %vm38_vm1, %v4865_v0 }
  0x22   :  { %66 = vst.msk [vmem:[#allocation2 + $0xe0] sm:$0xff] %vm36_vm0, %v4865_v0 }
  0x23   :  { %67 = vst.msk [vmem:[#allocation2 + $0xe8] sm:$0x3] %vm38_vm1, %v4865_v0 }
  0x24   :  { %68 = vst.msk [vmem:[#allocation2 + $0xf0] sm:$0xff] %vm36_vm0, %v4865_v0 }
  0x25   :  { %69 = vst.msk [vmem:[#allocation2 + $0xf8] sm:$0x3] %vm38_vm1, %v4865_v0 }
  0x26   :  { %70 = vst.msk [vmem:[#allocation2 + $0x100] sm:$0xff] %vm36_vm0, %v4865_v0 }
  0x27   :  { %71 = vst.msk [vmem:[#allocation2 + $0x108] sm:$0x3] %vm38_vm1, %v4865_v0 }
  0x28   :  { %72 = vst.msk [vmem:[#allocation2 + $0x110] sm:$0xff] %vm36_vm0, %v4865_v0 }
  0x29   :  { %73 = vst.msk [vmem:[#allocation2 + $0x118] sm:$0x3] %vm38_vm1, %v4865_v0 }
  0x2a   :  { %74 = vst.msk [vmem:[#allocation2 + $0x120] sm:$0xff] %vm36_vm0, %v4865_v0 }
  0x2b   :  { %75 = vst.msk [vmem:[#allocation2 + $0x128] sm:$0x3] %vm38_vm1, %v4865_v0 }
  0x2c   :  { %76 = vst.msk [vmem:[#allocation2 + $0x130] sm:$0xff] %vm36_vm0, %v4865_v0 }
  0x2d   :  { %77 = vst.msk [vmem:[#allocation2 + $0x138] sm:$0x3] %vm38_vm1, %v4865_v0  ;;  %v1572_v0 = vld [vmem:[#allocation4 + $0x70] sm:$0xff] }
  0x2e   :  { %103 = vst.msk [vmem:[#allocation2 + $0xb1] sm:$0xff] %vm36_vm0, %v86_v10 }
  0x2f   :  { %104 = vst.msk [vmem:[#allocation2 + $0xc1] sm:$0xff] %vm36_vm0, %v87_v11 }
  0x30   :  { %95 = vst.msk [vmem:[#allocation2 + $0x11] sm:$0xff] %vm36_vm0, %v78_v12 }
  0x31   :  { %105 = vst.msk [vmem:[#allocation2 + $0xd1] sm:$0xff] %vm36_vm0, %v88_v13 }
  0x32   :  { %96 = vst.msk [vmem:[#allocation2 + $0x21] sm:$0xff] %vm36_vm0, %v79_v14 }
  0x33   :  { %106 = vst.msk [vmem:[#allocation2 + $0xe1] sm:$0xff] %vm36_vm0, %v89_v15 }
  0x34   :  { %97 = vst.msk [vmem:[#allocation2 + $0x31] sm:$0xff] %vm36_vm0, %v80_v16 }
  0x35   :  { %v3552_v19 = vld [vmem:[#allocation2 + $0xb1] sm:$0xff]  ;;  %107 = vst.msk [vmem:[#allocation2 + $0xf1] sm:$0xff] %vm36_vm0, %v90_v17 }
  0x36   :  { %v3554_v20 = vld [vmem:[#allocation2 + $0xb0] sm:$0xff]  ;;  %3029 = vmatmul.msk.f32.gmra.mxu2 %vm36_vm0, %v3552_v19  ;;  %98 = vst.msk [vmem:[#allocation2 + $0x41] sm:$0xff] %vm36_vm0, %v81_v18  ;;  %v3578_v25 = vld [vmem:[#allocation2 + $0xc1] sm:$0xff]  ;;  %v93_v17 = vld [vmem:[%s4859_s0 + $0x78] sm:$0xff] }
  0x37   :  { %3046 = vmatmul.msk.f32.gmra.mxu3 %vm36_vm0, %v3554_v20  ;;  %v3565_v22 = vld [vmem:[#allocation2 + $0x11] sm:$0xff]  ;;  %108 = vst.msk [vmem:[#allocation2 + $0x101] sm:$0xff] %vm36_vm0, %v91_v21  ;;  %v3580_v26 = vld [vmem:[#allocation2 + $0xc0] sm:$0xff] }
  0x38   :  { %v3567_v23 = vld [vmem:[#allocation2 + $0x10] sm:$0xff]  ;;  %3021 = vmatmul.msk.f32.gmra.mxu0 %vm36_vm0, %v3565_v22  ;;  %99 = vst.msk [vmem:[#allocation2 + $0x51] sm:$0xff] %vm36_vm0, %v82_v24  ;;  %v3802_v11 = vld [vmem:[#allocation2 + $0xc2] sm:$0xff] }
  0x39   :  { %3038 = vmatmul.msk.f32.gmra.mxu1 %vm36_vm0, %v3567_v23  ;;  %v3582_v27 = vld [vmem:[#allocation2 + $0x21] sm:$0xff]  ;;  %109 = vst.msk [vmem:[#allocation2 + $0x111] sm:$0xff] %vm36_vm0, %v92_v29  ;;  %v3602_v31 = vld [vmem:[#allocation2 + $0xd1] sm:$0xff] }
  0x3a   :  { %v3584_v28 = vld [vmem:[#allocation2 + $0x20] sm:$0xff]  ;;  %100 = vst.msk [vmem:[#allocation2 + $0x61] sm:$0xff] %vm36_vm0, %v83_v30  ;;  %v3604_v32 = vld [vmem:[#allocation2 + $0xd0] sm:$0xff] }
  0x3b   :  { %v3606_v33 = vld [vmem:[#allocation2 + $0x31] sm:$0xff]  ;;  %101 = vst.msk [vmem:[#allocation2 + $0x71] sm:$0xff] %vm36_vm0, %v84_v35  ;;  %v3622_v36 = vld [vmem:[#allocation2 + $0xe1] sm:$0xff] }
  0x3c   :  { %v3608_v34 = vld [vmem:[#allocation2 + $0x30] sm:$0xff]  ;;  %v3624_v37 = vld [vmem:[#allocation2 + $0xe0] sm:$0xff]  ;;  %102 = vst.msk [vmem:[#allocation2 + $0x81] sm:$0xff] %vm36_vm0, %v85_v60 }
  0x3d   :  { %v3626_v38 = vld [vmem:[#allocation2 + $0x41] sm:$0xff]  ;;  %v3646_v42 = vld [vmem:[#allocation2 + $0xf1] sm:$0xff]  ;;  %110 = vst.msk [vmem:[#allocation2 + $0x121] sm:$0xff] %vm36_vm0, %v93_v17 }
  0x3e   :  { %3030 = vmatmul.msk.f32.gmra.mxu2 %vm36_vm0, %v3578_v25  ;;  %v3628_v39 = vld [vmem:[#allocation2 + $0x40] sm:$0xff]  ;;  %v3648_v43 = vld [vmem:[#allocation2 + $0xf0] sm:$0xff] }
  0x3f   :  { %3047 = vmatmul.msk.f32.gmra.mxu3 %vm36_vm0, %v3580_v26  ;;  %v3650_v44 = vld [vmem:[#allocation2 + $0x51] sm:$0xff]  ;;  %v3670_v48 = vld [vmem:[#allocation2 + $0x101] sm:$0xff] }
  0x40   :  { %3022 = vmatmul.msk.f32.gmra.mxu0 %vm36_vm0, %v3582_v27  ;;  %v3652_v45 = vld [vmem:[#allocation2 + $0x50] sm:$0xff]  ;;  %v3672_v49 = vld [vmem:[#allocation2 + $0x100] sm:$0xff] }
  0x41   :  { %3039 = vmatmul.msk.f32.gmra.mxu1 %vm36_vm0, %v3584_v28  ;;  %v3674_v50 = vld [vmem:[#allocation2 + $0x61] sm:$0xff]  ;;  %v3686_v52 = vld [vmem:[#allocation2 + $0x111] sm:$0xff] }
  0x42   :  { %v3676_v51 = vld [vmem:[#allocation2 + $0x60] sm:$0xff]  ;;  %v3688_v53 = vld [vmem:[#allocation2 + $0x110] sm:$0xff] }
  0x43   :  { %v3690_v54 = vld [vmem:[#allocation2 + $0x71] sm:$0xff]  ;;  %v3711_v58 = vld [vmem:[#allocation2 + $0x22] sm:$0xff] }
  0x44   :  { %v3692_v55 = vld [vmem:[#allocation2 + $0x70] sm:$0xff]  ;;  %v3735_v61 = vld [vmem:[#allocation2 + $0x42] sm:$0xff] }
  0x45   :  { %v380_v57 = vld [vmem:[#allocation2 + $0x12] sm:$0xff]  ;;  %v3755_v63 = vld [vmem:[#allocation2 + $0x62] sm:$0xff] }
  0x46   :  { %3031 = vmatmul.msk.f32.gmra.mxu2 %vm36_vm0, %v3602_v31  ;;  %v3721_v59 = vld [vmem:[#allocation2 + $0x32] sm:$0xff]  ;;  %v3771_v2 = vld [vmem:[#allocation2 + $0x80] sm:$0xff] }
  0x47   :  { %3048 = vmatmul.msk.f32.gmra.mxu3 %vm36_vm0, %v3604_v32  ;;  %v3745_v62 = vld [vmem:[#allocation2 + $0x52] sm:$0xff]  ;;  %v3773_v3 = vld [vmem:[#allocation2 + $0x81] sm:$0xff] }
  0x48   :  { %3023 = vmatmul.msk.f32.gmra.mxu0 %vm36_vm0, %v3606_v33  ;;  %v3765_v1 = vld [vmem:[#allocation2 + $0x72] sm:$0xff]  ;;  %v3775_v4 = vld [vmem:[#allocation2 + $0x82] sm:$0xff] }
  0x49   :  { %3040 = vmatmul.msk.f32.gmra.mxu1 %vm36_vm0, %v3608_v34  ;;  %v388_v9 = vld [vmem:[#allocation2 + $0xb2] sm:$0xff] }
  0x4a   :  { %v3816_v16 = vld [vmem:[#allocation2 + $0xd2] sm:$0xff] }
  0x4b   :  { %v3848_v35 = vld [vmem:[#allocation2 + $0xf2] sm:$0xff] }
  0x4c   :  { %v3876_v17 = vld [vmem:[#allocation2 + $0x112] sm:$0xff] }
  0x4e   :  { %3032 = vmatmul.msk.f32.gmra.mxu2 %vm36_vm0, %v3622_v36 }
  0x4f   :  { %3049 = vmatmul.msk.f32.gmra.mxu3 %vm36_vm0, %v3624_v37 }
  0x50   :  { %3024 = vmatmul.msk.f32.gmra.mxu0 %vm36_vm0, %v3626_v38 }
  0x51   :  { %3041 = vmatmul.msk.f32.gmra.mxu1 %vm36_vm0, %v3628_v39 }
  0x56   :  { %3033 = vmatmul.msk.f32.gmra.mxu2 %vm36_vm0, %v3646_v42 }
  0x57   :  { %3050 = vmatmul.msk.f32.gmra.mxu3 %vm36_vm0, %v3648_v43 }
  0x58   :  { %3025 = vmatmul.msk.f32.gmra.mxu0 %vm36_vm0, %v3650_v44 }
  0x59   :  { %3042 = vmatmul.msk.f32.gmra.mxu1 %vm36_vm0, %v3652_v45 }
  0x5e   :  { %3034 = vmatmul.msk.f32.gmra.mxu2 %vm36_vm0, %v3670_v48 }
  0x5f   :  { %3051 = vmatmul.msk.f32.gmra.mxu3 %vm36_vm0, %v3672_v49 }
  0x60   :  { %3026 = vmatmul.msk.f32.gmra.mxu0 %vm36_vm0, %v3674_v50 }
  0x61   :  { %3043 = vmatmul.msk.f32.gmra.mxu1 %vm36_vm0, %v3676_v51 }
  0x66   :  { %3035 = vmatmul.msk.f32.gmra.mxu2 %vm36_vm0, %v3686_v52 }
  0x67   :  { %3052 = vmatmul.msk.f32.gmra.mxu3 %vm36_vm0, %v3688_v53 }
  0x68   :  { %3027 = vmatmul.msk.f32.gmra.mxu0 %vm36_vm0, %v3690_v54 }
  0x69   :  { %3044 = vmatmul.msk.f32.gmra.mxu1 %vm36_vm0, %v3692_v55 }
  0x6e   :  { %3055 = vmatmul.msk.f32.vlgmr.msrb.gmra.mxu2 %vm36_vm0, %v379_v56  ;;  %v3862_v56 = vld [vmem:[#allocation2 + $0x102] sm:$0xff] }
  0x6f   :  { %3073 = vmatmul.msk.f32.vlgmr.msrb.gmra.mxu3 %vm36_vm0, %v3567_v23 }
  0x70   :  { %3091 = vmatmul.msk.f32.vlgmr.msrb.gmra.mxu0 %vm36_vm0, %v3565_v22  ;;  %v3834_v22 = vld [vmem:[#allocation2 + $0xe2] sm:$0xff] }
  0x71   :  { %3109 = vmatmul.msk.f32.vlgmr.msrb.gmra.mxu1 %vm36_vm0, %v380_v57 }
  0x76   :  { %3056 = vmatmul.msk.f32.gmra.mxu2 %vm36_vm0, %v380_v57 }
  0x77   :  { %3074 = vmatmul.msk.f32.gmra.mxu3 %vm36_vm0, %v3584_v28 }
  0x78   :  { %3092 = vmatmul.msk.f32.gmra.mxu0 %vm36_vm0, %v3582_v27 }
  0x79   :  { %3110 = vmatmul.msk.f32.gmra.mxu1 %vm36_vm0, %v3711_v58 }
  0x7e   :  { %3057 = vmatmul.msk.f32.gmra.mxu2 %vm36_vm0, %v3711_v58 }
  0x7f   :  { %3075 = vmatmul.msk.f32.gmra.mxu3 %vm36_vm0, %v3608_v34 }
  0x80   :  { %3093 = vmatmul.msk.f32.gmra.mxu0 %vm36_vm0, %v3606_v33 }
  0x81   :  { %3111 = vmatmul.msk.f32.gmra.mxu1 %vm36_vm0, %v3721_v59 }
  0x86   :  { %3058 = vmatmul.msk.f32.gmra.mxu2 %vm36_vm0, %v3721_v59 }
  0x87   :  { %3076 = vmatmul.msk.f32.gmra.mxu3 %vm36_vm0, %v3628_v39 }
  0x88   :  { %3094 = vmatmul.msk.f32.gmra.mxu0 %vm36_vm0, %v3626_v38 }
  0x89   :  { %3112 = vmatmul.msk.f32.gmra.mxu1 %vm36_vm0, %v3735_v61 }
  0x8e   :  { %3059 = vmatmul.msk.f32.gmra.mxu2 %vm36_vm0, %v3735_v61  ;;  %v3785_v6 = vpop.f32.mrf.mxu0 }
  0x8f   :  { %3077 = vmatmul.msk.f32.gmra.mxu3 %vm36_vm0, %v3652_v45 }
  0x90   :  { %3095 = vmatmul.msk.f32.gmra.mxu0 %vm36_vm0, %v3650_v44 }
  0x91   :  { %3113 = vmatmul.msk.f32.gmra.mxu1 %vm36_vm0, %v3745_v62  ;;  %v3792_v8 = vpop.f32.mrf.mxu3 }
  0x92   :  { %v3790_v7 = vpop.f32.mrf.mxu2 }
  0x96   :  { %3060 = vmatmul.msk.f32.gmra.mxu2 %vm36_vm0, %v3745_v62 }
  0x97   :  { %3078 = vmatmul.msk.f32.gmra.mxu3 %vm36_vm0, %v3676_v51 }
  0x98   :  { %3096 = vmatmul.msk.f32.gmra.mxu0 %vm36_vm0, %v3674_v50 }
  0x99   :  { %3114 = vmatmul.msk.f32.gmra.mxu1 %vm36_vm0, %v3755_v63 }
  0x9e   :  { %3061 = vmatmul.msk.f32.gmra.mxu2 %vm36_vm0, %v3755_v63 }
  0x9f   :  { %3079 = vmatmul.msk.f32.gmra.mxu3 %vm36_vm0, %v3692_v55 }
  0xa0   :  { %3097 = vmatmul.msk.f32.gmra.mxu0 %vm36_vm0, %v3690_v54 }
  0xa1   :  { %3115 = vmatmul.msk.f32.gmra.mxu1 %vm36_vm0, %v3765_v1 }
  0xa6   :  { %3062 = vmatmul.msk.f32.gmra.mxu2 %vm36_vm0, %v3765_v1 }
  0xa7   :  { %3080 = vmatmul.msk.f32.gmra.mxu3 %vm36_vm0, %v3771_v2 }
  0xa8   :  { %3098 = vmatmul.msk.f32.gmra.mxu0 %vm36_vm0, %v3773_v3 }
  0xa9   :  { %3116 = vmatmul.msk.f32.gmra.mxu1 %vm36_vm0, %v3775_v4 }
  0xae   :  { %3063 = vmatmul.msk.f32.gmra.mxu2 %vm36_vm0, %v387_v5 }
  0xaf   :  { %3081 = vmatmul.msk.f32.gmra.mxu3 %vm36_vm0, %v3554_v20 }
  0xb0   :  { %3099 = vmatmul.msk.f32.gmra.mxu0 %vm36_vm0, %v3552_v19 }
  0xb1   :  { %3117 = vmatmul.msk.f32.gmra.mxu1 %vm36_vm0, %v388_v9 }
  0xb5   :  { %v3797_v10 = vpop.f32.mrf.mxu0 }
  0xb6   :  { %3064 = vmatmul.msk.f32.gmra.mxu2 %vm36_vm0, %v388_v9  ;;  %v1573_v9 = vld [vmem:[#allocation4 + $0x78] sm:$0xff] }
  0xb7   :  { %3082 = vmatmul.msk.f32.gmra.mxu3 %vm36_vm0, %v3580_v26  ;;  %1630 = vmatpush.msra.mxu1 %v1573_v9 }
  0xb8   :  { %3100 = vmatmul.msk.f32.gmra.mxu0 %vm36_vm0, %v3578_v25 }
  0xb9   :  { %3118 = vmatmul.msk.f32.gmra.mxu1 %vm36_vm0, %v3802_v11  ;;  %v242_v12 = vpop.f32.mrf.mxu2 }
  0xba   :  { %v358_v13 = vpop.f32.mrf.mxu3  ;;  %1631 = vmatpush.msra.mxu1 %v1572_v0 }
  0xbb   :  { %v3808_v14 = vadd.f32 %v358_v13, %v242_v12  ;;  %v331_v13 = vpop.f32.mrf.mxu1 }
  0xbd   :  { %4867 = vst [vmem:[#allocation7_spill] sm:$0xff] %v3808_v14  ;;  %v3810_v15 = vpop.f32.mrf.mxu0 }
  0xbe   :  { %3065 = vmatmul.msk.f32.gmra.mxu2 %vm36_vm0, %v3802_v11 }
  0xbf   :  { %3083 = vmatmul.msk.f32.gmra.mxu3 %vm36_vm0, %v3604_v32 }
  0xc0   :  { %3101 = vmatmul.msk.f32.gmra.mxu0 %vm36_vm0, %v3602_v31 }
  0xc1   :  { %3119 = vmatmul.msk.f32.gmra.mxu1 %vm36_vm0, %v3816_v16  ;;  %v245_v18 = vpop.f32.mrf.mxu2 }
  0xc2   :  { %v361_v19 = vpop.f32.mrf.mxu3 }
  0xc3   :  { %v3826_v20 = vadd.f32 %v361_v19, %v245_v18 }
  0xc5   :  { %4868 = vst [vmem:[#allocation8_spill] sm:$0xff] %v3826_v20  ;;  %v3828_v21 = vpop.f32.mrf.mxu0 }
  0xc6   :  { %3066 = vmatmul.msk.f32.gmra.mxu2 %vm36_vm0, %v3816_v16 }
  0xc7   :  { %3084 = vmatmul.msk.f32.gmra.mxu3 %vm36_vm0, %v3624_v37 }
  0xc8   :  { %3102 = vmatmul.msk.f32.gmra.mxu0 %vm36_vm0, %v3622_v36 }
  0xc9   :  { %3120 = vmatmul.msk.f32.gmra.mxu1 %vm36_vm0, %v3834_v22  ;;  %v248_v23 = vpop.f32.mrf.mxu2 }
  0xca   :  { %v364_v24 = vpop.f32.mrf.mxu3 }
  0xcb   :  { %v3840_v29 = vadd.f32 %v364_v24, %v248_v23  ;;  %v3884_v24 = vld [vmem:[#allocation2 + $0x120] sm:$0xff] }
  0xcd   :  { %4869 = vst [vmem:[#allocation9_spill] sm:$0xff] %v3840_v29  ;;  %v3842_v30 = vpop.f32.mrf.mxu0 }
  0xce   :  { %3067 = vmatmul.msk.f32.gmra.mxu2 %vm36_vm0, %v3834_v22 }
  0xcf   :  { %3085 = vmatmul.msk.f32.gmra.mxu3 %vm36_vm0, %v3648_v43 }
  0xd0   :  { %3103 = vmatmul.msk.f32.gmra.mxu0 %vm36_vm0, %v3646_v42 }
  0xd1   :  { %3121 = vmatmul.msk.f32.gmra.mxu1 %vm36_vm0, %v3848_v35  ;;  %v251_v40 = vpop.f32.mrf.mxu2 }
  0xd2   :  { %v367_v41 = vpop.f32.mrf.mxu3 }
  0xd3   :  { %v3854_v46 = vadd.f32 %v367_v41, %v251_v40  ;;  %v3888_v41 = vld [vmem:[#allocation2 + $0x121] sm:$0xff] }
  0xd5   :  { %4870 = vst [vmem:[#allocation10_spill] sm:$0xff] %v3854_v46  ;;  %v3856_v47 = vpop.f32.mrf.mxu0 }
  0xd6   :  { %3068 = vmatmul.msk.f32.gmra.mxu2 %vm36_vm0, %v3848_v35 }
  0xd7   :  { %3086 = vmatmul.msk.f32.gmra.mxu3 %vm36_vm0, %v3672_v49 }
  0xd8   :  { %3104 = vmatmul.msk.f32.gmra.mxu0 %vm36_vm0, %v3670_v48 }
  0xd9   :  { %3122 = vmatmul.msk.f32.gmra.mxu1 %vm36_vm0, %v3862_v56  ;;  %v254_v57 = vpop.f32.mrf.mxu2 }
  0xda   :  { %v370_v60 = vpop.f32.mrf.mxu3 }
  0xdb   :  { %v3868_v5 = vadd.f32 %v370_v60, %v254_v57  ;;  %v3890_v57 = vld [vmem:[#allocation2 + $0x122] sm:$0xff]  ;;  %v334_v60 = vpop.f32.mrf.mxu1 }
  0xdc   :  { %v335_v0 = vadd.f32 %v334_v60, %v3797_v10 }
  0xdd   :  { %4871 = vst [vmem:[#allocation11_spill] sm:$0xff] %v3868_v5  ;;  %v3870_v12 = vpop.f32.mrf.mxu0  ;;  %v332_v5 = vadd.f32 %v331_v13, %v3785_v6 }
  0xde   :  { %3069 = vmatmul.msk.f32.gmra.mxu2 %vm36_vm0, %v3862_v56 }
  0xdf   :  { %3087 = vmatmul.msk.f32.gmra.mxu3 %vm36_vm0, %v3688_v53 }
  0xe0   :  { %3105 = vmatmul.msk.f32.gmra.mxu0 %vm36_vm0, %v3686_v52 }
  0xe1   :  { %3123 = vmatmul.msk.f32.gmra.mxu1 %vm36_vm0, %v3876_v17  ;;  %v257_v18 = vpop.f32.mrf.mxu2 }
  0xe2   :  { %v373_v19 = vpop.f32.mrf.mxu3 }
  0xe3   :  { %v3882_v23 = vadd.f32 %v373_v19, %v257_v18  ;;  %v337_v20 = vpop.f32.mrf.mxu1 }
  0xe5   :  { %4872 = vst [vmem:[#allocation12_spill] sm:$0xff] %v3882_v23  ;;  %v3886_v40 = vpop.f32.mrf.mxu0 }
  0xe6   :  { %3070 = vmatmul.msk.f32.gmra.mxu2 %vm36_vm0, %v3876_v17 }
  0xe7   :  { %3088 = vmatmul.msk.f32.gmra.mxu3 %vm36_vm0, %v3884_v24 }
  0xe8   :  { %3106 = vmatmul.msk.f32.gmra.mxu0 %vm36_vm0, %v3888_v41 }
  0xe9   :  { %3124 = vmatmul.msk.f32.gmra.mxu1 %vm36_vm0, %v3890_v57  ;;  %v260_v9 = vpop.f32.mrf.mxu2 }
  0xea   :  { %v376_v18 = vpop.f32.mrf.mxu3 }
  0xeb   :  { %v3900_v19 = vadd.f32 %v376_v18, %v260_v9  ;;  %v340_v6 = vpop.f32.mrf.mxu1 }
  0xed   :  { %4873 = vst [vmem:[#allocation13_spill] sm:$0xff] %v3900_v19  ;;  %v765_v23 = vpop.f32.mrf.mxu0 }
  0xee   :  { %3127 = vmatmul.msk.f32.vlgmr.msra.gmra.mxu2 %vm36_vm0, %v3584_v28 }
  0xef   :  { %3145 = vmatmul.msk.f32.vlgmr.msra.gmra.mxu3 %vm36_vm0, %v3582_v27 }
  0xf0   :  { %3163 = vmatmul.msk.f32.vlgmr.msra.gmra.mxu0 %vm36_vm0, %v3711_v58 }
  0xf1   :  { %v465_v46 = vpop.f32.mrf.mxu2 }
  0xf2   :  { %v615_v29 = vpop.f32.mrf.mxu3  ;;  %v513_v14 = vadd.f32 %v465_v46, %v332_v5 }
  0xf3   :  { %v343_v60 = vpop.f32.mrf.mxu1 }
  0xf4   :  { %v663_v9 = vadd.f32 %v615_v29, %v513_v14  ;;  %v1571_v14 = vld [vmem:[#allocation4 + $0x68] sm:$0xff] }
  0xf5   :  { %v768_v18 = vpop.f32.mrf.mxu0  ;;  %1632 = vmatpush.msra.mxu1 %v1571_v14 }
  0xf6   :  { %v3909_v19 = vadd.f32 %v765_v23, %v663_v9  ;;  %3128 = vmatmul.msk.f32.gmra.mxu2 %vm36_vm0, %v3608_v34 }
  0xf7   :  { %3146 = vmatmul.msk.f32.gmra.mxu3 %vm36_vm0, %v3606_v33  ;;  %v338_v33 = vadd.f32 %v337_v20, %v3810_v15 }
  0xf8   :  { %3164 = vmatmul.msk.f32.gmra.mxu0 %vm36_vm0, %v3721_v59 }
  0xf9   :  { %v468_v27 = vpop.f32.mrf.mxu2 }
  0xfa   :  { %v618_v28 = vpop.f32.mrf.mxu3  ;;  %v514_v58 = vadd.f32 %v468_v27, %v335_v0 }
  0xfc   :  { %v664_v46 = vadd.f32 %v618_v28, %v514_v58 }
  0xfd   :  { %v771_v29 = vpop.f32.mrf.mxu0 }
  0xfe   :  { %v3918_v5 = vadd.f32 %v768_v18, %v664_v46  ;;  %3129 = vmatmul.msk.f32.gmra.mxu2 %vm36_vm0, %v3628_v39  ;;  %v1570_v18 = vld [vmem:[#allocation4 + $0x60] sm:$0xff] }
  0xff   :  { %3147 = vmatmul.msk.f32.gmra.mxu3 %vm36_vm0, %v3626_v38  ;;  %v341_v38 = vadd.f32 %v340_v6, %v3828_v21  ;;  %1633 = vmatpush.msra.mxu1 %v1570_v18 }
 0x100   :  { %3165 = vmatmul.msk.f32.gmra.mxu0 %vm36_vm0, %v3735_v61 }
 0x101   :  { %v471_v34 = vpop.f32.mrf.mxu2 }
 0x102   :  { %v621_v59 = vpop.f32.mrf.mxu3  ;;  %v515_v10 = vadd.f32 %v471_v34, %v338_v33  ;;  %v1569_v33 = vld [vmem:[#allocation4 + $0x58] sm:$0xff] }
 0x103   :  { %1634 = vmatpush.msra.mxu1 %v1569_v33  ;;  %v1543_v33 = vld [vmem:[#allocation4 + $0x10] sm:$0xff] }
 0x104   :  { %v665_v13 = vadd.f32 %v621_v59, %v515_v10  ;;  %v987_v10 = vld [vmem:[#allocation2 + $0x90] sm:$0xff] }
 0x105   :  { %v774_v23 = vpop.f32.mrf.mxu0 }
 0x106   :  { %v3927_v9 = vadd.f32 %v771_v29, %v665_v13  ;;  %3130 = vmatmul.msk.f32.gmra.mxu2 %vm36_vm0, %v3652_v45  ;;  %v346_v45 = vpop.f32.mrf.mxu1  ;;  %v1137_v13 = vld [vmem:[#allocation2 + $0x91] sm:$0xff] }
 0x107   :  { %3148 = vmatmul.msk.f32.gmra.mxu3 %vm36_vm0, %v3650_v44  ;;  %v344_v44 = vadd.f32 %v343_v60, %v3842_v30 }
 0x108   :  { %3166 = vmatmul.msk.f32.gmra.mxu0 %vm36_vm0, %v3745_v62 }
 0x109   :  { %v474_v39 = vpop.f32.mrf.mxu2 }
 0x10a   :  { %v624_v61 = vpop.f32.mrf.mxu3  ;;  %v516_v15 = vadd.f32 %v474_v39, %v341_v38  ;;  %v1287_v39 = vld [vmem:[#allocation2 + $0x92] sm:$0xff] }
 0x10c   :  { %v666_v20 = vadd.f32 %v624_v61, %v516_v15 }
 0x10d   :  { %v777_v0 = vpop.f32.mrf.mxu0 }
 0x10e   :  { %v3936_v27 = vadd.f32 %v774_v23, %v666_v20  ;;  %3131 = vmatmul.msk.f32.gmra.mxu2 %vm36_vm0, %v3676_v51  ;;  %v349_v14 = vpop.f32.mrf.mxu1  ;;  %v1568_v20 = vld [vmem:[#allocation4 + $0x50] sm:$0xff] }
 0x10f   :  { %3149 = vmatmul.msk.f32.gmra.mxu3 %vm36_vm0, %v3674_v50  ;;  %v347_v50 = vadd.f32 %v346_v45, %v3856_v47  ;;  %1635 = vmatpush.msra.mxu1 %v1568_v20 }
 0x110   :  { %3167 = vmatmul.msk.f32.gmra.mxu0 %vm36_vm0, %v3755_v63 }
 0x111   :  { %v477_v62 = vpop.f32.mrf.mxu2 }
 0x112   :  { %v627_v21 = vpop.f32.mrf.mxu3  ;;  %v517_v28 = vadd.f32 %v477_v62, %v344_v44 }
 0x114   :  { %v667_v58 = vadd.f32 %v627_v21, %v517_v28 }
 0x115   :  { %v780_v6 = vpop.f32.mrf.mxu0 }
 0x116   :  { %v3945_v46 = vadd.f32 %v777_v0, %v667_v58  ;;  %3132 = vmatmul.msk.f32.gmra.mxu2 %vm36_vm0, %v3692_v55  ;;  %v352_v60 = vpop.f32.mrf.mxu1 }
 0x117   :  { %3150 = vmatmul.msk.f32.gmra.mxu3 %vm36_vm0, %v3690_v54  ;;  %v350_v54 = vadd.f32 %v349_v14, %v3870_v12  ;;  %v1821_v14 = vld [vmem:[#allocation4 + $0xa0] sm:$0xff] }
 0x118   :  { %3168 = vmatmul.msk.f32.gmra.mxu0 %vm36_vm0, %v3765_v1 }
 0x119   :  { %v480_v51 = vpop.f32.mrf.mxu2 }
 0x11a   :  { %v630_v63 = vpop.f32.mrf.mxu3  ;;  %v518_v30 = vadd.f32 %v480_v51, %v347_v50  ;;  %v1823_v50 = vld [vmem:[#allocation4 + $0xb0] sm:$0xff]  ;;  %v1545_v51 = vld [vmem:[#allocation4 + $0x20] sm:$0xff] }
 0x11c   :  { %v668_v29 = vadd.f32 %v630_v63, %v518_v30  ;;  %v1544_v30 = vld [vmem:[#allocation4 + $0x18] sm:$0xff] }
 0x11d   :  { %v783_v34 = vpop.f32.mrf.mxu0 }
 0x11e   :  { %v3954_v59 = vadd.f32 %v780_v6, %v668_v29  ;;  %3133 = vmatmul.msk.f32.gmra.mxu2 %vm36_vm0, %v3771_v2  ;;  %v353_v2 = vadd.f32 %v352_v60, %v3886_v40  ;;  %v356_v40 = vadd.f32 %v3792_v8, %v3790_v7  ;;  %v1567_v7 = vld [vmem:[#allocation4 + $0x48] sm:$0xff]  ;;  %v4874_v29 = vmov 0.0  }
 0x11f   :  { %3151 = vmatmul.msk.f32.gmra.mxu3 %vm36_vm0, %v3773_v3  ;;  %1636 = vmatpush.msra.mxu1 %v1567_v7  ;;  %v1546_v6 = vld [vmem:[#allocation4 + $0x28] sm:$0xff]  ;;  %1470 = vst.msk [vmem:[#allocation3 + $0x10] sm:$0xff] %vm1466_vm3, %v4874_v29 }
 0x120   :  { %3169 = vmatmul.msk.f32.gmra.mxu0 %vm36_vm0, %v3775_v4  ;;  %1467 = vst.msk [vmem:[#allocation3] sm:$0xff] %vm1466_vm3, %v4874_v29 }
 0x121   :  { %v483_v55 = vpop.f32.mrf.mxu2  ;;  %1471 = vst.msk [vmem:[#allocation3 + $0x18] sm:$0x3] %vm1468_vm4, %v4874_v29 }
 0x122   :  { %v633_v1 = vpop.f32.mrf.mxu3  ;;  %v519_v47 = vadd.f32 %v483_v55, %v350_v54  ;;  %1469 = vst.msk [vmem:[#allocation3 + $0x8] sm:$0x3] %vm1468_vm4, %v4874_v29  ;;  %v1542_v54 = vld [vmem:[#allocation4 + $0x8] sm:$0xff]  ;;  %v1819_v55 = vld [vmem:[#allocation4 + $0x90] sm:$0xff] }
 0x123   :  { %1472 = vst.msk [vmem:[#allocation3 + $0x20] sm:$0xff] %vm1466_vm3, %v4874_v29 }
 0x124   :  { %v669_v23 = vadd.f32 %v633_v1, %v519_v47  ;;  %1473 = vst.msk [vmem:[#allocation3 + $0x28] sm:$0x3] %vm1468_vm4, %v4874_v29  ;;  %v1818_v1 = vld [vmem:[#allocation4 + $0x88] sm:$0xff]  ;;  %v1978_v47 = vld [vmem:[#allocation4 + $0xf8] sm:$0xff] }
 0x125   :  { %v786_v38 = vpop.f32.mrf.mxu0  ;;  %1474 = vst.msk [vmem:[#allocation3 + $0x30] sm:$0xff] %vm1466_vm3, %v4874_v29  ;;  %2035 = vmatpush.msrb.mxu0 %v1978_v47 }
 0x126   :  { %v3963_v61 = vadd.f32 %v783_v34, %v669_v23  ;;  %3134 = vmatmul.msk.f32.gmra.mxu2 %vm36_vm0, %v987_v10  ;;  %v1820_v34 = vld [vmem:[#allocation4 + $0x98] sm:$0xff]  ;;  %1475 = vst.msk [vmem:[#allocation3 + $0x38] sm:$0x3] %vm1468_vm4, %v4874_v29  ;;  %v1977_v23 = vld [vmem:[#allocation4 + $0xf0] sm:$0xff] }
 0x127   :  { %3152 = vmatmul.msk.f32.gmra.mxu3 %vm36_vm0, %v1137_v13  ;;  %1476 = vst.msk [vmem:[#allocation3 + $0x40] sm:$0xff] %vm1466_vm3, %v4874_v29  ;;  %v1817_v13 = vld [vmem:[#allocation4 + $0x80] sm:$0xff]  ;;  %2036 = vmatpush.msrb.mxu0 %v1977_v23 }
 0x128   :  { %3170 = vmatmul.msk.f32.gmra.mxu0 %vm36_vm0, %v1287_v39  ;;  %1477 = vst.msk [vmem:[#allocation3 + $0x48] sm:$0x3] %vm1468_vm4, %v4874_v29  ;;  %v1975_v39 = vld [vmem:[#allocation4 + $0xe0] sm:$0xff] }
 0x129   :  { %v486_v3 = vpop.f32.mrf.mxu2  ;;  %1478 = vst.msk [vmem:[#allocation3 + $0x50] sm:$0xff] %vm1466_vm3, %v4874_v29 }
 0x12a   :  { %v636_v4 = vpop.f32.mrf.mxu3  ;;  %v520_v12 = vadd.f32 %v486_v3, %v353_v2  ;;  %1479 = vst.msk [vmem:[#allocation3 + $0x58] sm:$0x3] %vm1468_vm4, %v4874_v29  ;;  %v2132_v2 = vld [vmem:[#allocation4 + $0x138] sm:$0xff] }
 0x12b   :  { %1480 = vst.msk [vmem:[#allocation3 + $0x60] sm:$0xff] %vm1466_vm3, %v4874_v29  ;;  %v1974_v3 = vld [vmem:[#allocation4 + $0xd8] sm:$0xff] }
 0x12c   :  { %v670_v15 = vadd.f32 %v636_v4, %v520_v12  ;;  %1481 = vst.msk [vmem:[#allocation3 + $0x68] sm:$0x3] %vm1468_vm4, %v4874_v29  ;;  %v1973_v12 = vld [vmem:[#allocation4 + $0xd0] sm:$0xff] }
 0x12d   :  { %v3969_v18 = vpop.f32.mrf.mxu0  ;;  %1482 = vst.msk [vmem:[#allocation3 + $0x70] sm:$0xff] %vm1466_vm3, %v4874_v29 }
 0x12e   :  { %v3971_v0 = vadd.f32 %v786_v38, %v670_v15  ;;  %3135 = vmatmul.msk.f32.gmra.mxu2 %vm36_vm0, %v3580_v26  ;;  %1483 = vst.msk [vmem:[#allocation3 + $0x78] sm:$0x3] %vm1468_vm4, %v4874_v29  ;;  %v1972_v15 = vld [vmem:[#allocation4 + $0xc8] sm:$0xff] }
 0x12f   :  { %3153 = vmatmul.msk.f32.gmra.mxu3 %vm36_vm0, %v3578_v25  ;;  %1484 = vst.msk [vmem:[#allocation3 + $0x80] sm:$0xff] %vm1466_vm3, %v4874_v29 }
 0x130   :  { %3171 = vmatmul.msk.f32.gmra.mxu0 %vm36_vm0, %v3802_v11  ;;  %1485 = vst.msk [vmem:[#allocation3 + $0x88] sm:$0x3] %vm1468_vm4, %v4874_v29 }
 0x131   :  { %v489_v44 = vpop.f32.mrf.mxu2  ;;  %1486 = vst.msk [vmem:[#allocation3 + $0x90] sm:$0xff] %vm1466_vm3, %v4874_v29 }
 0x132   :  { %v639_v45 = vpop.f32.mrf.mxu3  ;;  %v521_v62 = vadd.f32 %v489_v44, %v356_v40  ;;  %1487 = vst.msk [vmem:[#allocation3 + $0x98] sm:$0x3] %vm1468_vm4, %v4874_v29  ;;  %v1971_v40 = vld [vmem:[#allocation4 + $0xc0] sm:$0xff]  ;;  %v995_v44 = vld [vmem:[#allocation2 + $0x130] sm:$0xff] }
 0x133   :  { %1488 = vst.msk [vmem:[#allocation3 + $0xa0] sm:$0xff] %vm1466_vm3, %v4874_v29 }
 0x134   :  { %v3981_v21 = vadd.f32 %v639_v45, %v521_v62  ;;  %v1145_v45 = vld [vmem:[#allocation2 + $0x131] sm:$0xff]  ;;  %1489 = vst.msk [vmem:[#allocation3 + $0xa8] sm:$0x3] %vm1468_vm4, %v4874_v29 }
 0x135   :  { %v3983_v28 = vpop.f32.mrf.mxu0  ;;  %1490 = vst.msk [vmem:[#allocation3 + $0xb0] sm:$0xff] %vm1466_vm3, %v4874_v29  ;;  %v1295_v62 = vld [vmem:[#allocation2 + $0x132] sm:$0xff] }
 0x136   :  { %3136 = vmatmul.msk.f32.gmra.mxu2 %vm36_vm0, %v3604_v32  ;;  %1491 = vst.msk [vmem:[#allocation3 + $0xb8] sm:$0x3] %vm1468_vm4, %v4874_v29 }
 0x137   :  { %3154 = vmatmul.msk.f32.gmra.mxu3 %vm36_vm0, %v3602_v31  ;;  %1492 = vst.msk [vmem:[#allocation3 + $0xc0] sm:$0xff] %vm1466_vm3, %v4874_v29 }
 0x138   :  { %3172 = vmatmul.msk.f32.gmra.mxu0 %vm36_vm0, %v3816_v16  ;;  %v1548_v16 = vld [vmem:[#allocation4 + $0x38] sm:$0xff]  ;;  %1493 = vst.msk [vmem:[#allocation3 + $0xc8] sm:$0x3] %vm1468_vm4, %v4874_v29 }
 0x139   :  { %v3991_v25 = vpop.f32.mrf.mxu2  ;;  %1743 = vmatpush.msrb.mxu2 %v1548_v16  ;;  %1494 = vst.msk [vmem:[#allocation3 + $0xd0] sm:$0xff] %vm1466_vm3, %v4874_v29 }
 0x13a   :  { %v3993_v26 = vpop.f32.mrf.mxu3  ;;  %1495 = vst.msk [vmem:[#allocation3 + $0xd8] sm:$0x3] %vm1468_vm4, %v4874_v29 }
 0x13b   :  { %1496 = vst.msk [vmem:[#allocation3 + $0xe0] sm:$0xff] %vm1466_vm3, %v4874_v29 }
 0x13c   :  { %1497 = vst.msk [vmem:[#allocation3 + $0xe8] sm:$0x3] %vm1468_vm4, %v4874_v29 }
 0x13d   :  { %v3995_v8 = vpop.f32.mrf.mxu0  ;;  %1498 = vst.msk [vmem:[#allocation3 + $0xf0] sm:$0xff] %vm1466_vm3, %v4874_v29 }
 0x13e   :  { %3137 = vmatmul.msk.f32.gmra.mxu2 %vm36_vm0, %v3624_v37  ;;  %v1824_v37 = vld [vmem:[#allocation4 + $0xb8] sm:$0xff]  ;;  %1499 = vst.msk [vmem:[#allocation3 + $0xf8] sm:$0x3] %vm1468_vm4, %v4874_v29 }
 0x13f   :  { %3155 = vmatmul.msk.f32.gmra.mxu3 %vm36_vm0, %v3622_v36  ;;  %v1547_v36 = vld [vmem:[#allocation4 + $0x30] sm:$0xff]  ;;  %1500 = vst.msk [vmem:[#allocation3 + $0x100] sm:$0xff] %vm1466_vm3, %v4874_v29 }
 0x140   :  { %3173 = vmatmul.msk.f32.gmra.mxu0 %vm36_vm0, %v3834_v22  ;;  %1744 = vmatpush.msrb.mxu2 %v1547_v36  ;;  %v1525_v36 = vld [vmem:[#allocation3] sm:$0xff]  ;;  %1501 = vst.msk [vmem:[#allocation3 + $0x108] sm:$0x3] %vm1468_vm4, %v4874_v29 }
 0x141   :  { %v4003_v31 = vpop.f32.mrf.mxu2  ;;  %1881 = vmatpush.msrb.mxu3 %v1824_v37  ;;  %v1800_v37 = vld [vmem:[#allocation3 + $0x2] sm:$0xff]  ;;  %1502 = vst.msk [vmem:[#allocation3 + $0x110] sm:$0xff] %vm1466_vm3, %v4874_v29 }
 0x142   :  { %v4005_v32 = vpop.f32.mrf.mxu3  ;;  %1745 = vmatpush.msrb.mxu2 %v1546_v6  ;;  %1503 = vst.msk [vmem:[#allocation3 + $0x118] sm:$0x3] %vm1468_vm4, %v4874_v29 }
 0x143   :  { %1882 = vmatpush.msrb.mxu3 %v1823_v50  ;;  %1504 = vst.msk [vmem:[#allocation3 + $0x120] sm:$0xff] %vm1466_vm3, %v4874_v29 }
 0x144   :  { %1746 = vmatpush.msrb.mxu2 %v1545_v51  ;;  %1505 = vst.msk [vmem:[#allocation3 + $0x128] sm:$0x3] %vm1468_vm4, %v4874_v29 }
 0x145   :  { %v4007_v11 = vpop.f32.mrf.mxu0  ;;  %1506 = vst.msk [vmem:[#allocation3 + $0x130] sm:$0xff] %vm1466_vm3, %v4874_v29 }
 0x146   :  { %3138 = vmatmul.msk.f32.gmra.mxu2 %vm36_vm0, %v3648_v43  ;;  %v1566_v43 = vld [vmem:[#allocation4 + $0x40] sm:$0xff]  ;;  %1507 = vst.msk [vmem:[#allocation3 + $0x138] sm:$0x3] %vm1468_vm4, %v4874_v29 }
 0x147   :  { %3156 = vmatmul.msk.f32.gmra.mxu3 %vm36_vm0, %v3646_v42  ;;  %v1822_v42 = vld [vmem:[#allocation4 + $0xa8] sm:$0xff]  ;;  %1637 = vmatpush.msra.mxu1 %v1566_v43  ;;  %v2131_v43 = vld [vmem:[#allocation4 + $0x130] sm:$0xff] }
 0x148   :  { %3174 = vmatmul.msk.f32.gmra.mxu0 %vm36_vm0, %v3848_v35  ;;  %v4021_v35 = vpop.f32.mrf.mxu1  ;;  %1883 = vmatpush.msrb.mxu3 %v1822_v42 }
 0x149   :  { %v4015_v22 = vpop.f32.mrf.mxu2  ;;  %1747 = vmatpush.msrb.mxu2 %v1544_v30  ;;  %2189 = vmatpush.msrb.mxu1 %v2132_v2  ;;  %v963_v51 = vadd.f32 %v4021_v35, %v3909_v19  ;;  %v4152_v19 = vld [vmem:[%s4861_s2] ss:$0 sm:$0xff] }
 0x14a   :  { %v4017_v58 = vpop.f32.mrf.mxu3  ;;  %1884 = vmatpush.msrb.mxu3 %v1821_v14 }
 0x14b   :  { %1748 = vmatpush.msrb.mxu2 %v1543_v33  ;;  %2190 = vmatpush.msrb.mxu1 %v2131_v43 }
 0x14c   :  { %1885 = vmatpush.msrb.mxu3 %v1820_v34 }
 0x14d   :  { %v4019_v63 = vpop.f32.mrf.mxu0  ;;  %1749 = vmatpush.msrb.mxu2 %v1542_v54 }
 0x14e   :  { %3139 = vmatmul.msk.f32.gmra.mxu2 %vm36_vm0, %v3672_v49  ;;  %1886 = vmatpush.msrb.mxu3 %v1819_v55 }
 0x14f   :  { %3157 = vmatmul.msk.f32.gmra.mxu3 %vm36_vm0, %v3670_v48 }
 0x150   :  { %3175 = vmatmul.msk.f32.gmra.mxu0 %vm36_vm0, %v3862_v56  ;;  %v1541_v56 = vld [vmem:[#allocation4] sm:$0xff]  ;;  %1887 = vmatpush.msrb.mxu3 %v1818_v1  ;;  %v4059_v60 = vpop.f32.mrf.mxu1 }
 0x151   :  { %v4035_v48 = vpop.f32.mrf.mxu2  ;;  %1750 = vmatpush.msrb.mxu2 %v1541_v56  ;;  %v964_v55 = vadd.f32 %v4059_v60, %v3918_v5 }
 0x152   :  { %v4037_v49 = vpop.f32.mrf.mxu3  ;;  %1888 = vmatpush.msrb.mxu3 %v1817_v13 }
 0x155   :  { %v4047_v10 = vpop.f32.mrf.mxu0 }
 0x156   :  { %3140 = vmatmul.msk.f32.gmra.mxu2 %vm36_vm0, %v3688_v53  ;;  %v1976_v53 = vld [vmem:[#allocation4 + $0xe8] sm:$0xff] }
 0x157   :  { %3158 = vmatmul.msk.f32.gmra.mxu3 %vm36_vm0, %v3686_v52  ;;  %2037 = vmatpush.msrb.mxu0 %v1976_v53 }
 0x158   :  { %3176 = vmatmul.msk.f32.gmra.mxu0 %vm36_vm0, %v3876_v17  ;;  %v1549_v17 = vld [vmem:[#allocation3 + $0x1] sm:$0xff] }
 0x159   :  { %v4065_v52 = vpop.f32.mrf.mxu2  ;;  %3179 = vmatmul.msk.f32.vlgmr.msra.gmra.mxu1 %vm1466_vm3, %v1549_v17  ;;  %2038 = vmatpush.msrb.mxu0 %v1975_v39  ;;  %v2130_v17 = vld [vmem:[#allocation4 + $0x128] sm:$0xff] }
 0x15a   :  { %v4067_v38 = vpop.f32.mrf.mxu3  ;;  %2191 = vmatpush.msrb.mxu1 %v2130_v17 }
 0x15b   :  { %2039 = vmatpush.msrb.mxu0 %v1974_v3 }
 0x15d   :  { %v4078_v4 = vpop.f32.mrf.mxu0  ;;  %2040 = vmatpush.msrb.mxu0 %v1973_v12 }
 0x15e   :  { %3141 = vmatmul.msk.f32.gmra.mxu2 %vm36_vm0, %v3884_v24 }
 0x15f   :  { %3159 = vmatmul.msk.f32.gmra.mxu3 %vm36_vm0, %v3888_v41  ;;  %v921_v41 = vpop.f32.mrf.mxu1  ;;  %2041 = vmatpush.msrb.mxu0 %v1972_v15 }
 0x160   :  { %3177 = vmatmul.msk.f32.gmra.mxu0 %vm36_vm0, %v3890_v57  ;;  %v965_v29 = vadd.f32 %v921_v41, %v3927_v9 }
 0x161   :  { %v4094_v20 = vpop.f32.mrf.mxu2  ;;  %2042 = vmatpush.msrb.mxu0 %v1971_v40 }
 0x162   :  { %v4096_v24 = vpop.f32.mrf.mxu3 }
 0x165   :  { %v4106_v57 = vpop.f32.mrf.mxu0 }
 0x166   :  { %3142 = vmatmul.msk.f32.gmra.mxu2 %vm36_vm0, %v995_v44 }
 0x167   :  { %3160 = vmatmul.msk.f32.gmra.mxu3 %vm36_vm0, %v1145_v45  ;;  %v924_v6 = vpop.f32.mrf.mxu1 }
 0x168   :  { %3178 = vmatmul.msk.f32.gmra.mxu0 %vm36_vm0, %v1295_v62 }
 0x169   :  { %v4119_v7 = vpop.f32.mrf.mxu2 }
 0x16a   :  { %v4121_v16 = vpop.f32.mrf.mxu3 }
 0x16d   :  { %v1366_v50 = vpop.f32.mrf.mxu0 }
 0x16e   :  { %3195 = vmatmul.msk.f32.vlgmr.msrb.gmra.mxu2 %vm1466_vm3, %v1525_v36 }
 0x16f   :  { %3211 = vmatmul.msk.f32.vlgmr.msrb.gmra.mxu3 %vm1466_vm3, %v1800_v37  ;;  %v927_v34 = vpop.f32.mrf.mxu1  ;;  %v966_v37 = vadd.f32 %v924_v6, %v3936_v27  ;;  %v2129_v6 = vld [vmem:[#allocation4 + $0x120] sm:$0xff] }
 0x170   :  { %2192 = vmatpush.msrb.mxu1 %v2129_v6 }
 0x171   :  { %v1066_v42 = vpop.f32.mrf.mxu2 }
 0x172   :  { %v1216_v30 = vpop.f32.mrf.mxu3  ;;  %v1114_v14 = vadd.f32 %v1066_v42, %v963_v51 }
 0x174   :  { %v1264_v33 = vadd.f32 %v1216_v30, %v1114_v14 }
 0x175   :  { %v1369_v35 = vpop.f32.mrf.mxu0 }
 0x176   :  { %v1414_v54 = vadd.f32 %v1366_v50, %v1264_v33 }
 0x177   :  { %v930_v3 = vpop.f32.mrf.mxu1 }
 0x178   :  { %v1434_v56 = vadd.f32 %v4152_v19, %v1414_v54 }
 0x179   :  { %v1069_v1 = vpop.f32.mrf.mxu2 }
 0x17a   :  { %v1219_v47 = vpop.f32.mrf.mxu3  ;;  %v1450_v13 = vmax.f32 %v1434_v56, 0.0  ;;  %v1115_v23 = vadd.f32 %v1069_v1, %v964_v55  ;;  %v967_v1 = vadd.f32 %v927_v34, %v3945_v46 }
 0x17c   :  { %1509 = vst.msk [vmem:[#allocation3 + $0x11] sm:$0xff] %vm1466_vm3, %v1450_v13  ;;  %v1265_v53 = vadd.f32 %v1219_v47, %v1115_v23 }
 0x17d   :  { %v1372_v39 = vpop.f32.mrf.mxu0 }
 0x17e   :  { %v1415_v2 = vadd.f32 %v1369_v35, %v1265_v53 }
 0x17f   :  { %v933_v42 = vpop.f32.mrf.mxu1 }
 0x180   :  { %v1435_v12 = vadd.f32 %v4152_v19, %v1415_v2 }
 0x181   :  { %v1072_v15 = vpop.f32.mrf.mxu2 }
 0x182   :  { %v1222_v5 = vpop.f32.mrf.mxu3  ;;  %v1451_v60 = vmax.f32 %v1435_v12, 0.0  ;;  %v1116_v40 = vadd.f32 %v1072_v15, %v965_v29 }
 0x183   :  { %v4164_v44 = vld [vmem:[#allocation3 + $0x11] sm:$0xff] }
 0x184   :  { %v1526_v45 = vld [vmem:[#allocation3 + $0x10] sm:$0xff]  ;;  %1510 = vst.msk [vmem:[#allocation3 + $0x21] sm:$0xff] %vm1466_vm3, %v1451_v60  ;;  %v1266_v36 = vadd.f32 %v1222_v5, %v1116_v40  ;;  %3180 = vmatmul.msk.f32.gmra.mxu1 %vm1466_vm3, %v4164_v44  ;;  %v968_v5 = vadd.f32 %v930_v3, %v3954_v59  ;;  %v2128_v3 = vld [vmem:[#allocation4 + $0x118] sm:$0xff] }
 0x185   :  { %v4166_v62 = vld [vmem:[#allocation3 + $0x12] sm:$0xff]  ;;  %3196 = vmatmul.msk.f32.gmra.mxu2 %vm1466_vm3, %v1526_v45  ;;  %3227 = vmatmul.msk.f32.vlgmr.msrb.gmra.mxu0 %vm1466_vm3, %v1526_v45  ;;  %v1375_v9 = vpop.f32.mrf.mxu0 }
 0x186   :  { %3212 = vmatmul.msk.f32.gmra.mxu3 %vm1466_vm3, %v4166_v62  ;;  %v1416_v41 = vadd.f32 %v1372_v39, %v1266_v36  ;;  %2193 = vmatpush.msrb.mxu1 %v2128_v3  ;;  %v4875_v3 = vld [vmem:[#allocation7_spill] sm:$0xff] }
 0x187   :  { %v936_v12 = vpop.f32.mrf.mxu1 }
 0x188   :  { %v1436_v50 = vadd.f32 %v4152_v19, %v1416_v41 }
 0x189   :  { %v1075_v43 = vpop.f32.mrf.mxu2 }
 0x18a   :  { %v1225_v51 = vpop.f32.mrf.mxu3  ;;  %v1452_v30 = vmax.f32 %v1436_v50, 0.0  ;;  %v1117_v14 = vadd.f32 %v1075_v43, %v966_v37 }
 0x18b   :  { %v4177_v33 = vld [vmem:[#allocation3 + $0x21] sm:$0xff] }
 0x18c   :  { %v4179_v35 = vld [vmem:[#allocation3 + $0x20] sm:$0xff]  ;;  %1511 = vst.msk [vmem:[#allocation3 + $0x31] sm:$0xff] %vm1466_vm3, %v1452_v30  ;;  %v1267_v55 = vadd.f32 %v1225_v51, %v1117_v14  ;;  %3181 = vmatmul.msk.f32.gmra.mxu1 %vm1466_vm3, %v4177_v33  ;;  %v969_v14 = vadd.f32 %v933_v42, %v3963_v61 }
 0x18d   :  { %v4181_v54 = vld [vmem:[#allocation3 + $0x22] sm:$0xff]  ;;  %3197 = vmatmul.msk.f32.gmra.mxu2 %vm1466_vm3, %v4179_v35  ;;  %3228 = vmatmul.msk.f32.gmra.mxu0 %vm1466_vm3, %v4179_v35  ;;  %v1378_v27 = vpop.f32.mrf.mxu0 }
 0x18e   :  { %3213 = vmatmul.msk.f32.gmra.mxu3 %vm1466_vm3, %v4181_v54  ;;  %v1417_v56 = vadd.f32 %v1375_v9, %v1267_v55 }
 0x18f   :  { %v939_v51 = vpop.f32.mrf.mxu1 }
 0x190   :  { %v1437_v47 = vadd.f32 %v4152_v19, %v1417_v56 }
 0x191   :  { %v1078_v13 = vpop.f32.mrf.mxu2 }
 0x192   :  { %v1228_v23 = vpop.f32.mrf.mxu3  ;;  %v1453_v53 = vmax.f32 %v1437_v47, 0.0  ;;  %v1118_v39 = vadd.f32 %v1078_v13, %v967_v1 }
 0x193   :  { %v4194_v17 = vld [vmem:[#allocation3 + $0x31] sm:$0xff] }
 0x194   :  { %v4196_v2 = vld [vmem:[#allocation3 + $0x30] sm:$0xff]  ;;  %1512 = vst.msk [vmem:[#allocation3 + $0x41] sm:$0xff] %vm1466_vm3, %v1453_v53  ;;  %v1268_v15 = vadd.f32 %v1228_v23, %v1118_v39  ;;  %3182 = vmatmul.msk.f32.gmra.mxu1 %vm1466_vm3, %v4194_v17  ;;  %v970_v39 = vadd.f32 %v936_v12, %v3971_v0 }
 0x195   :  { %v4198_v29 = vld [vmem:[#allocation3 + $0x32] sm:$0xff]  ;;  %3198 = vmatmul.msk.f32.gmra.mxu2 %vm1466_vm3, %v4196_v2  ;;  %3229 = vmatmul.msk.f32.gmra.mxu0 %vm1466_vm3, %v4196_v2  ;;  %v1381_v46 = vpop.f32.mrf.mxu0 }
 0x196   :  { %3214 = vmatmul.msk.f32.gmra.mxu3 %vm1466_vm3, %v4198_v29  ;;  %v1418_v34 = vadd.f32 %v1378_v27, %v1268_v15 }
 0x197   :  { %v942_v15 = vpop.f32.mrf.mxu1 }
 0x198   :  { %v1438_v60 = vadd.f32 %v4152_v19, %v1418_v34 }
 0x199   :  { %v1081_v40 = vpop.f32.mrf.mxu2 }
 0x19a   :  { %v1231_v45 = vpop.f32.mrf.mxu3  ;;  %v1454_v36 = vmax.f32 %v1438_v60, 0.0  ;;  %v1119_v9 = vadd.f32 %v1081_v40, %v968_v5 }
 0x19b   :  { %v4211_v41 = vld [vmem:[#allocation3 + $0x41] sm:$0xff] }
 0x19c   :  { %v4213_v37 = vld [vmem:[#allocation3 + $0x40] sm:$0xff]  ;;  %1513 = vst.msk [vmem:[#allocation3 + $0x51] sm:$0xff] %vm1466_vm3, %v1454_v36  ;;  %v1269_v43 = vadd.f32 %v1231_v45, %v1119_v9  ;;  %3183 = vmatmul.msk.f32.gmra.mxu1 %vm1466_vm3, %v4211_v41 }
 0x19d   :  { %v4215_v50 = vld [vmem:[#allocation3 + $0x42] sm:$0xff]  ;;  %3199 = vmatmul.msk.f32.gmra.mxu2 %vm1466_vm3, %v4213_v37  ;;  %3230 = vmatmul.msk.f32.gmra.mxu0 %vm1466_vm3, %v4213_v37  ;;  %v1384_v59 = vpop.f32.mrf.mxu0 }
 0x19e   :  { %3215 = vmatmul.msk.f32.gmra.mxu3 %vm1466_vm3, %v4215_v50  ;;  %v1419_v30 = vadd.f32 %v1381_v46, %v1269_v43  ;;  %v821_v43 = vadd.f32 %v3969_v18, %v3981_v21  ;;  %v2127_v18 = vld [vmem:[#allocation4 + $0x110] sm:$0xff] }
 0x19f   :  { %2194 = vmatpush.msrb.mxu1 %v2127_v18 }
 0x1a0   :  { %v1439_v55 = vadd.f32 %v4152_v19, %v1419_v30 }
 0x1a1   :  { %v1084_v27 = vpop.f32.mrf.mxu2 }
 0x1a2   :  { %v1234_v6 = vpop.f32.mrf.mxu3  ;;  %v1455_v56 = vmax.f32 %v1439_v55, 0.0  ;;  %v1120_v1 = vadd.f32 %v1084_v27, %v969_v14 }
 0x1a3   :  { %v4228_v47 = vld [vmem:[#allocation3 + $0x51] sm:$0xff] }
 0x1a4   :  { %v4230_v13 = vld [vmem:[#allocation3 + $0x50] sm:$0xff]  ;;  %1514 = vst.msk [vmem:[#allocation3 + $0x61] sm:$0xff] %vm1466_vm3, %v1455_v56  ;;  %v1270_v53 = vadd.f32 %v1234_v6, %v1120_v1  ;;  %3184 = vmatmul.msk.f32.gmra.mxu1 %vm1466_vm3, %v4228_v47  ;;  %v945_v6 = vpop.f32.mrf.mxu1 }
 0x1a5   :  { %v4232_v23 = vld [vmem:[#allocation3 + $0x52] sm:$0xff]  ;;  %3200 = vmatmul.msk.f32.gmra.mxu2 %vm1466_vm3, %v4230_v13  ;;  %3231 = vmatmul.msk.f32.gmra.mxu0 %vm1466_vm3, %v4230_v13  ;;  %v1387_v61 = vpop.f32.mrf.mxu0 }
 0x1a6   :  { %3216 = vmatmul.msk.f32.gmra.mxu3 %vm1466_vm3, %v4232_v23  ;;  %v1420_v42 = vadd.f32 %v1384_v59, %v1270_v53  ;;  %v522_v59 = vadd.f32 %v3991_v25, %v4875_v3  ;;  %v971_v25 = vadd.f32 %v939_v51, %v821_v43  ;;  %v1557_v3 = vld [vmem:[#allocation3 + $0xa1] sm:$0xff] }
 0x1a8   :  { %v1440_v46 = vadd.f32 %v4152_v19, %v1420_v42  ;;  %v672_v30 = vadd.f32 %v3993_v26, %v522_v59  ;;  %v1533_v59 = vld [vmem:[#allocation3 + $0xa0] sm:$0xff] }
 0x1a9   :  { %v1087_v34 = vpop.f32.mrf.mxu2 }
 0x1aa   :  { %v1237_v5 = vpop.f32.mrf.mxu3  ;;  %v1456_v60 = vmax.f32 %v1440_v46, 0.0  ;;  %v1121_v40 = vadd.f32 %v1087_v34, %v970_v39  ;;  %v822_v46 = vadd.f32 %v3983_v28, %v672_v30 }
 0x1ab   :  { %v4245_v45 = vld [vmem:[#allocation3 + $0x61] sm:$0xff] }
 0x1ac   :  { %v4247_v36 = vld [vmem:[#allocation3 + $0x60] sm:$0xff]  ;;  %1515 = vst.msk [vmem:[#allocation3 + $0x71] sm:$0xff] %vm1466_vm3, %v1456_v60  ;;  %v1271_v0 = vadd.f32 %v1237_v5, %v1121_v40  ;;  %3185 = vmatmul.msk.f32.gmra.mxu1 %vm1466_vm3, %v4245_v45  ;;  %v972_v5 = vadd.f32 %v942_v15, %v822_v46 }
 0x1ad   :  { %v4249_v9 = vld [vmem:[#allocation3 + $0x62] sm:$0xff]  ;;  %3201 = vmatmul.msk.f32.gmra.mxu2 %vm1466_vm3, %v4247_v36  ;;  %3232 = vmatmul.msk.f32.gmra.mxu0 %vm1466_vm3, %v4247_v36  ;;  %v1390_v12 = vpop.f32.mrf.mxu0 }
 0x1ae   :  { %3217 = vmatmul.msk.f32.gmra.mxu3 %vm1466_vm3, %v4249_v9  ;;  %v1421_v21 = vadd.f32 %v1387_v61, %v1271_v0  ;;  %v4876_v61 = vld [vmem:[#allocation8_spill] sm:$0xff] }
 0x1af   :  { %v523_v51 = vadd.f32 %v4003_v31, %v4876_v61 }
 0x1b0   :  { %v1441_v14 = vadd.f32 %v4152_v19, %v1421_v21  ;;  %v1808_v21 = vld [vmem:[#allocation3 + $0xa2] sm:$0xff] }
 0x1b1   :  { %v1090_v55 = vpop.f32.mrf.mxu2  ;;  %v673_v31 = vadd.f32 %v4005_v32, %v523_v51 }
 0x1b2   :  { %v1240_v27 = vpop.f32.mrf.mxu3  ;;  %v1457_v56 = vmax.f32 %v1441_v14, 0.0  ;;  %v1122_v1 = vadd.f32 %v1090_v55, %v971_v25  ;;  %v4877_v14 = vld [vmem:[#allocation9_spill] sm:$0xff] }
 0x1b3   :  { %v4266_v53 = vld [vmem:[#allocation3 + $0x71] sm:$0xff]  ;;  %v823_v30 = vadd.f32 %v3995_v8, %v673_v31  ;;  %v524_v55 = vadd.f32 %v4015_v22, %v4877_v14 }
 0x1b4   :  { %v4268_v42 = vld [vmem:[#allocation3 + $0x70] sm:$0xff]  ;;  %1516 = vst.msk [vmem:[#allocation3 + $0x81] sm:$0xff] %vm1466_vm3, %v1457_v56  ;;  %v1272_v26 = vadd.f32 %v1240_v27, %v1122_v1  ;;  %3186 = vmatmul.msk.f32.gmra.mxu1 %vm1466_vm3, %v4266_v53  ;;  %v2126_v27 = vld [vmem:[#allocation4 + $0x108] sm:$0xff] }
 0x1b5   :  { %v4270_v39 = vld [vmem:[#allocation3 + $0x72] sm:$0xff]  ;;  %3202 = vmatmul.msk.f32.gmra.mxu2 %vm1466_vm3, %v4268_v42  ;;  %3233 = vmatmul.msk.f32.gmra.mxu0 %vm1466_vm3, %v4268_v42  ;;  %v1393_v34 = vpop.f32.mrf.mxu0  ;;  %v973_v8 = vadd.f32 %v945_v6, %v823_v30  ;;  %v674_v22 = vadd.f32 %v4017_v58, %v524_v55 }
 0x1b6   :  { %3218 = vmatmul.msk.f32.gmra.mxu3 %vm1466_vm3, %v4270_v39  ;;  %v1422_v28 = vadd.f32 %v1390_v12, %v1272_v26  ;;  %v948_v12 = vpop.f32.mrf.mxu1  ;;  %2195 = vmatpush.msrb.mxu1 %v2126_v27 }
 0x1b8   :  { %v1442_v60 = vadd.f32 %v4152_v19, %v1422_v28 }
 0x1b9   :  { %v1093_v40 = vpop.f32.mrf.mxu2 }
 0x1ba   :  { %v1243_v43 = vpop.f32.mrf.mxu3  ;;  %v1458_v0 = vmax.f32 %v1442_v60, 0.0  ;;  %v1123_v18 = vadd.f32 %v1093_v40, %v972_v5  ;;  %v824_v60 = vadd.f32 %v4007_v11, %v674_v22  ;;  %v4878_v40 = vld [vmem:[#allocation10_spill] sm:$0xff] }
 0x1bb   :  { %v4286_v25 = vld [vmem:[#allocation3 + $0x80] sm:$0xff]  ;;  %v2441_v22 = vld [vmem:[#allocation4 + $0x1b8] sm:$0xff] }
 0x1bc   :  { %1517 = vst.msk [vmem:[#allocation3 + $0xb1] sm:$0xff] %vm1466_vm3, %v1458_v0  ;;  %v1273_v32 = vadd.f32 %v1243_v43, %v1123_v18  ;;  %3187 = vmatmul.msk.f32.gmra.mxu1 %vm1466_vm3, %v1557_v3  ;;  %v974_v11 = vadd.f32 %v948_v12, %v824_v60  ;;  %2498 = vmatpush.msra.mxu3 %v2441_v22 }
 0x1bd   :  { %3203 = vmatmul.msk.f32.gmra.mxu2 %vm1466_vm3, %v1533_v59  ;;  %3234 = vmatmul.msk.f32.gmra.mxu0 %vm1466_vm3, %v4286_v25  ;;  %v1396_v15 = vpop.f32.mrf.mxu0 }
 0x1be   :  { %3219 = vmatmul.msk.f32.gmra.mxu3 %vm1466_vm3, %v1808_v21  ;;  %v1423_v56 = vadd.f32 %v1393_v34, %v1273_v32  ;;  %v525_v34 = vadd.f32 %v4035_v48, %v4878_v40  ;;  %v951_v43 = vpop.f32.mrf.mxu1 }
 0x1c0   :  { %v1443_v1 = vadd.f32 %v4152_v19, %v1423_v56  ;;  %v675_v59 = vadd.f32 %v4037_v49, %v525_v34  ;;  %v4879_v56 = vld [vmem:[#allocation11_spill] sm:$0xff]  ;;  %v2284_v34 = vld [vmem:[#allocation4 + $0x168] sm:$0xff] }
 0x1c1   :  { %v1096_v46 = vpop.f32.mrf.mxu2 }
 0x1c2   :  { %v1246_v61 = vpop.f32.mrf.mxu3  ;;  %v1459_v51 = vmax.f32 %v1443_v1, 0.0  ;;  %v1124_v26 = vadd.f32 %v1096_v46, %v973_v8  ;;  %v825_v27 = vadd.f32 %v4019_v63, %v675_v59  ;;  %v2125_v63 = vld [vmem:[#allocation4 + $0x100] sm:$0xff]  ;;  %v2286_v8 = vld [vmem:[#allocation4 + $0x178] sm:$0xff]  ;;  %v2285_v1 = vld [vmem:[#allocation4 + $0x170] sm:$0xff] }
 0x1c3   :  { %v4299_v28 = vld [vmem:[#allocation3 + $0xb1] sm:$0xff]  ;;  %2196 = vmatpush.msrb.mxu1 %v2125_v63  ;;  %2343 = vmatpush.msra.mxu2 %v2286_v8 }
 0x1c4   :  { %v1534_v5 = vld [vmem:[#allocation3 + $0xb0] sm:$0xff]  ;;  %1518 = vst.msk [vmem:[#allocation3 + $0xc1] sm:$0xff] %vm1466_vm3, %v1459_v51  ;;  %v1274_v6 = vadd.f32 %v1246_v61, %v1124_v26  ;;  %3188 = vmatmul.msk.f32.gmra.mxu1 %vm1466_vm3, %v4299_v28  ;;  %v975_v61 = vadd.f32 %v951_v43, %v825_v27  ;;  %v4880_v43 = vld [vmem:[#allocation12_spill] sm:$0xff]  ;;  %v2437_v27 = vld [vmem:[#allocation4 + $0x198] sm:$0xff] }
 0x1c5   :  { %v4301_v31 = vld [vmem:[#allocation3 + $0xb2] sm:$0xff]  ;;  %3204 = vmatmul.msk.f32.gmra.mxu2 %vm1466_vm3, %v1534_v5  ;;  %3235 = vmatmul.msk.f32.gmra.mxu0 %vm1466_vm3, %v1534_v5  ;;  %v1399_v58 = vpop.f32.mrf.mxu0 }
 0x1c6   :  { %3220 = vmatmul.msk.f32.gmra.mxu3 %vm1466_vm3, %v4301_v31  ;;  %v1424_v3 = vadd.f32 %v1396_v15, %v1274_v6  ;;  %v526_v15 = vadd.f32 %v4065_v52, %v4879_v56  ;;  %v2440_v46 = vld [vmem:[#allocation4 + $0x1b0] sm:$0xff]  ;;  %v954_v26 = vpop.f32.mrf.mxu1  ;;  %2344 = vmatpush.msra.mxu2 %v2285_v1  ;;  %v2439_v6 = vld [vmem:[#allocation4 + $0x1a8] sm:$0xff] }
 0x1c7   :  { %2499 = vmatpush.msra.mxu3 %v2440_v46  ;;  %v2281_v63 = vld [vmem:[#allocation4 + $0x150] sm:$0xff]  ;;  %v2593_v46 = vld [vmem:[#allocation4 + $0x1e8] sm:$0xff] }
 0x1c8   :  { %v1444_v48 = vadd.f32 %v4152_v19, %v1424_v3  ;;  %v676_v51 = vadd.f32 %v4067_v38, %v526_v15  ;;  %2345 = vmatpush.msra.mxu2 %v2284_v34  ;;  %v2436_v8 = vld [vmem:[#allocation4 + $0x190] sm:$0xff] }
 0x1c9   :  { %v1099_v0 = vpop.f32.mrf.mxu2  ;;  %2500 = vmatpush.msra.mxu3 %v2439_v6 }
 0x1ca   :  { %v1249_v18 = vpop.f32.mrf.mxu3  ;;  %v1460_v21 = vmax.f32 %v1444_v48, 0.0  ;;  %v1125_v30 = vadd.f32 %v1099_v0, %v974_v11  ;;  %v826_v38 = vadd.f32 %v4047_v10, %v676_v51  ;;  %v527_v0 = vadd.f32 %v4094_v20, %v4880_v43  ;;  %v2282_v10 = vld [vmem:[#allocation4 + $0x158] sm:$0xff] }
 0x1cb   :  { %v4315_v14 = vld [vmem:[#allocation3 + $0xc1] sm:$0xff]  ;;  %v2595_v20 = vld [vmem:[#allocation4 + $0x1f8] sm:$0xff] }
 0x1cc   :  { %v4317_v55 = vld [vmem:[#allocation3 + $0xc0] sm:$0xff]  ;;  %1519 = vst.msk [vmem:[#allocation3 + $0xd1] sm:$0xff] %vm1466_vm3, %v1460_v21  ;;  %v1275_v49 = vadd.f32 %v1249_v18, %v1125_v30  ;;  %3189 = vmatmul.msk.f32.gmra.mxu1 %vm1466_vm3, %v4315_v14  ;;  %2652 = vmatpush.msra.mxu0 %v2595_v20  ;;  %v976_v22 = vadd.f32 %v954_v26, %v826_v38 }
 0x1cd   :  { %v4319_v32 = vld [vmem:[#allocation3 + $0xc2] sm:$0xff]  ;;  %3205 = vmatmul.msk.f32.gmra.mxu2 %vm1466_vm3, %v4317_v55  ;;  %3236 = vmatmul.msk.f32.gmra.mxu0 %vm1466_vm3, %v4317_v55  ;;  %v1402_v12 = vpop.f32.mrf.mxu0 }
 0x1ce   :  { %3221 = vmatmul.msk.f32.gmra.mxu3 %vm1466_vm3, %v4319_v32  ;;  %v1425_v52 = vadd.f32 %v1399_v58, %v1275_v49  ;;  %v2283_v21 = vld [vmem:[#allocation4 + $0x160] sm:$0xff]  ;;  %v2594_v49 = vld [vmem:[#allocation4 + $0x1f0] sm:$0xff]  ;;  %v957_v34 = vpop.f32.mrf.mxu1 }
 0x1cf   :  { %v2438_v30 = vld [vmem:[#allocation4 + $0x1a0] sm:$0xff]  ;;  %2346 = vmatpush.msra.mxu2 %v2283_v21  ;;  %2653 = vmatpush.msra.mxu0 %v2594_v49  ;;  %v2749_v21 = vld [vmem:[#allocation4 + $0x238] sm:$0xff]  ;;  %v2590_v49 = vld [vmem:[#allocation4 + $0x1d0] sm:$0xff] }
 0x1d0   :  { %v1445_v5 = vadd.f32 %v4152_v19, %v1425_v52  ;;  %2501 = vmatpush.msra.mxu3 %v2438_v30  ;;  %v677_v52 = vadd.f32 %v4096_v24, %v527_v0  ;;  %v2592_v0 = vld [vmem:[#allocation4 + $0x1e0] sm:$0xff]  ;;  %v2591_v30 = vld [vmem:[#allocation4 + $0x1d8] sm:$0xff]  ;;  %2806 = vmatpush.msra.mxu1 %v2749_v21 }
 0x1d1   :  { %v1102_v60 = vpop.f32.mrf.mxu2  ;;  %2347 = vmatpush.msra.mxu2 %v2282_v10  ;;  %2654 = vmatpush.msra.mxu0 %v2593_v46 }
 0x1d2   :  { %v1252_v40 = vpop.f32.mrf.mxu3  ;;  %v1461_v3 = vmax.f32 %v1445_v5, 0.0  ;;  %v1126_v11 = vadd.f32 %v1102_v60, %v975_v61  ;;  %2502 = vmatpush.msra.mxu3 %v2437_v27  ;;  %v2280_v60 = vld [vmem:[#allocation4 + $0x148] sm:$0xff] }
 0x1d3   :  { %v4335_v58 = vld [vmem:[#allocation3 + $0xd1] sm:$0xff]  ;;  %2348 = vmatpush.msra.mxu2 %v2281_v63  ;;  %2655 = vmatpush.msra.mxu0 %v2592_v0 }
 0x1d4   :  { %v4337_v59 = vld [vmem:[#allocation3 + $0xd0] sm:$0xff]  ;;  %1520 = vst.msk [vmem:[#allocation3 + $0xe1] sm:$0xff] %vm1466_vm3, %v1461_v3  ;;  %v1276_v18 = vadd.f32 %v1252_v40, %v1126_v11  ;;  %3190 = vmatmul.msk.f32.gmra.mxu1 %vm1466_vm3, %v4335_v58  ;;  %2503 = vmatpush.msra.mxu3 %v2436_v8  ;;  %v2435_v40 = vld [vmem:[#allocation4 + $0x188] sm:$0xff]  ;;  %v827_v3 = vadd.f32 %v4078_v4, %v677_v52  ;;  %v2279_v4 = vld [vmem:[#allocation4 + $0x140] sm:$0xff] }
 0x1d5   :  { %v4339_v48 = vld [vmem:[#allocation3 + $0xd2] sm:$0xff]  ;;  %3206 = vmatmul.msk.f32.gmra.mxu2 %vm1466_vm3, %v4337_v59  ;;  %3237 = vmatmul.msk.f32.gmra.mxu0 %vm1466_vm3, %v4337_v59  ;;  %v1405_v15 = vpop.f32.mrf.mxu0 }
 0x1d6   :  { %3222 = vmatmul.msk.f32.gmra.mxu3 %vm1466_vm3, %v4339_v48  ;;  %v1426_v56 = vadd.f32 %v1402_v12, %v1276_v18  ;;  %v4881_v11 = vld [vmem:[#allocation13_spill] sm:$0xff]  ;;  %v2434_v18 = vld [vmem:[#allocation4 + $0x180] sm:$0xff]  ;;  %2349 = vmatpush.msra.mxu2 %v2280_v60  ;;  %v977_v10 = vadd.f32 %v957_v34, %v827_v3 }
 0x1d7   :  { %v528_v38 = vadd.f32 %v4119_v7, %v4881_v11  ;;  %2504 = vmatpush.msra.mxu3 %v2435_v40  ;;  %2656 = vmatpush.msra.mxu0 %v2591_v30 }
 0x1d8   :  { %v1446_v1 = vadd.f32 %v4152_v19, %v1426_v56  ;;  %2350 = vmatpush.msra.mxu2 %v2279_v4 }
 0x1d9   :  { %v1105_v61 = vpop.f32.mrf.mxu2  ;;  %v678_v27 = vadd.f32 %v4121_v16, %v528_v38  ;;  %2505 = vmatpush.msra.mxu3 %v2434_v18  ;;  %2657 = vmatpush.msra.mxu0 %v2590_v49 }
 0x1da   :  { %v1255_v51 = vpop.f32.mrf.mxu3  ;;  %v1462_v5 = vmax.f32 %v1446_v1, 0.0  ;;  %v1127_v12 = vadd.f32 %v1105_v61, %v976_v22 }
 0x1db   :  { %v4355_v6 = vld [vmem:[#allocation3 + $0xe1] sm:$0xff]  ;;  %v828_v16 = vadd.f32 %v4106_v57, %v678_v27 }
 0x1dc   :  { %v4357_v26 = vld [vmem:[#allocation3 + $0xe0] sm:$0xff]  ;;  %1521 = vst.msk [vmem:[#allocation3 + $0xf1] sm:$0xff] %vm1466_vm3, %v1462_v5  ;;  %v1277_v43 = vadd.f32 %v1255_v51, %v1127_v12  ;;  %3191 = vmatmul.msk.f32.gmra.mxu1 %vm1466_vm3, %v4355_v6  ;;  %v960_v5 = vpop.f32.mrf.mxu1 }
 0x1dd   :  { %v4359_v24 = vld [vmem:[#allocation3 + $0xe2] sm:$0xff]  ;;  %3207 = vmatmul.msk.f32.gmra.mxu2 %vm1466_vm3, %v4357_v26  ;;  %3238 = vmatmul.msk.f32.gmra.mxu0 %vm1466_vm3, %v4357_v26  ;;  %v1408_v56 = vpop.f32.mrf.mxu0  ;;  %v978_v57 = vadd.f32 %v960_v5, %v828_v16 }
 0x1de   :  { %3223 = vmatmul.msk.f32.gmra.mxu3 %vm1466_vm3, %v4359_v24  ;;  %v1427_v7 = vadd.f32 %v1405_v15, %v1277_v43  ;;  %v2589_v15 = vld [vmem:[#allocation4 + $0x1c8] sm:$0xff]  ;;  %v2588_v12 = vld [vmem:[#allocation4 + $0x1c0] sm:$0xff] }
 0x1df   :  { %2658 = vmatpush.msra.mxu0 %v2589_v15 }
 0x1e0   :  { %v1447_v20 = vadd.f32 %v4152_v19, %v1427_v7  ;;  %v2748_v7 = vld [vmem:[#allocation4 + $0x230] sm:$0xff] }
 0x1e1   :  { %v1108_v63 = vpop.f32.mrf.mxu2  ;;  %2659 = vmatpush.msra.mxu0 %v2588_v12  ;;  %2807 = vmatpush.msra.mxu1 %v2748_v7 }
 0x1e2   :  { %v1258_v8 = vpop.f32.mrf.mxu3  ;;  %v1463_v22 = vmax.f32 %v1447_v20, 0.0  ;;  %v1128_v52 = vadd.f32 %v1108_v63, %v977_v10 }
 0x1e3   :  { %v4375_v1 = vld [vmem:[#allocation3 + $0xf1] sm:$0xff] }
 0x1e4   :  { %v4377_v46 = vld [vmem:[#allocation3 + $0xf0] sm:$0xff]  ;;  %1522 = vst.msk [vmem:[#allocation3 + $0x101] sm:$0xff] %vm1466_vm3, %v1463_v22  ;;  %v1278_v51 = vadd.f32 %v1258_v8, %v1128_v52  ;;  %3192 = vmatmul.msk.f32.gmra.mxu1 %vm1466_vm3, %v4375_v1  ;;  %v2747_v8 = vld [vmem:[#allocation4 + $0x228] sm:$0xff] }
 0x1e5   :  { %v4379_v61 = vld [vmem:[#allocation3 + $0xf2] sm:$0xff]  ;;  %3208 = vmatmul.msk.f32.gmra.mxu2 %vm1466_vm3, %v4377_v46  ;;  %3239 = vmatmul.msk.f32.gmra.mxu0 %vm1466_vm3, %v4377_v46  ;;  %v1411_v18 = vpop.f32.mrf.mxu0 }
 0x1e6   :  { %3224 = vmatmul.msk.f32.gmra.mxu3 %vm1466_vm3, %v4379_v61  ;;  %v1428_v60 = vadd.f32 %v1408_v56, %v1278_v51  ;;  %2808 = vmatpush.msra.mxu1 %v2747_v8 }
 0x1e8   :  { %v1448_v40 = vadd.f32 %v4152_v19, %v1428_v60 }
 0x1e9   :  { %v1111_v34 = vpop.f32.mrf.mxu2 }
 0x1ea   :  { %v1261_v3 = vpop.f32.mrf.mxu3  ;;  %v1464_v11 = vmax.f32 %v1448_v40, 0.0  ;;  %v1129_v38 = vadd.f32 %v1111_v34, %v978_v57 }
 0x1eb   :  { %v4392_v43 = vld [vmem:[#allocation3 + $0x101] sm:$0xff] }
 0x1ec   :  { %v4394_v0 = vld [vmem:[#allocation3 + $0x100] sm:$0xff]  ;;  %1523 = vst.msk [vmem:[#allocation3 + $0x111] sm:$0xff] %vm1466_vm3, %v1464_v11  ;;  %v1279_v21 = vadd.f32 %v1261_v3, %v1129_v38  ;;  %3193 = vmatmul.msk.f32.gmra.mxu1 %vm1466_vm3, %v4392_v43 }
 0x1ed   :  { %v4396_v4 = vld [vmem:[#allocation3 + $0x102] sm:$0xff]  ;;  %3209 = vmatmul.msk.f32.gmra.mxu2 %vm1466_vm3, %v4394_v0  ;;  %3240 = vmatmul.msk.f32.gmra.mxu0 %vm1466_vm3, %v4394_v0 }
 0x1ee   :  { %3225 = vmatmul.msk.f32.gmra.mxu3 %vm1466_vm3, %v4396_v4  ;;  %v1429_v30 = vadd.f32 %v1411_v18, %v1279_v21 }
 0x1f0   :  { %v1449_v10 = vadd.f32 %v4152_v19, %v1429_v30  ;;  %v4423_v19 = vpop.f32.mrf.mxu1 }
 0x1f1   :  { %v4435_v22 = vpop.f32.mrf.mxu2 }
 0x1f2   :  { %v1465_v27 = vmax.f32 %v1449_v10, 0.0  ;;  %v4437_v52 = vpop.f32.mrf.mxu3 }
 0x1f3   :  { %v4408_v20 = vld [vmem:[#allocation3 + $0x111] sm:$0xff] }
 0x1f4   :  { %v4410_v56 = vld [vmem:[#allocation3 + $0x110] sm:$0xff]  ;;  %1524 = vst.msk [vmem:[#allocation3 + $0x121] sm:$0xff] %vm1466_vm3, %v1465_v27  ;;  %3194 = vmatmul.msk.f32.gmra.mxu1 %vm1466_vm3, %v4408_v20 }
 0x1f5   :  { %v4412_v49 = vld [vmem:[#allocation3 + $0x112] sm:$0xff]  ;;  %3210 = vmatmul.msk.f32.gmra.mxu2 %vm1466_vm3, %v4410_v56  ;;  %3241 = vmatmul.msk.f32.gmra.mxu0 %vm1466_vm3, %v4410_v56 }
 0x1f6   :  { %3226 = vmatmul.msk.f32.gmra.mxu3 %vm1466_vm3, %v4412_v49 }
 0x1fb   :  { %v4425_v63 = vld [vmem:[#allocation3 + $0x120] sm:$0xff] }
 0x1fc   :  { %3243 = vmatmul.msk.f32.vlgmr.msrb.gmra.mxu1 %vm1466_vm3, %v4164_v44 }
 0x1fd   :  { %3259 = vmatmul.msk.f32.vlgmr.msra.gmra.mxu2 %vm1466_vm3, %v4166_v62  ;;  %3242 = vmatmul.msk.f32.gmra.mxu0 %vm1466_vm3, %v4425_v63 }
 0x1fe   :  { %3275 = vmatmul.msk.f32.vlgmr.msra.gmra.mxu3 %vm1466_vm3, %v4179_v35 }
 0x201   :  { %v1642_v15 = vpop.f32.mrf.mxu1 }
 0x202   :  { %v4439_v16 = vpop.f32.mrf.mxu0 }
 0x204   :  { %3244 = vmatmul.msk.f32.gmra.mxu1 %vm1466_vm3, %v4177_v33 }
 0x205   :  { %3260 = vmatmul.msk.f32.gmra.mxu2 %vm1466_vm3, %v4181_v54  ;;  %3291 = vmatmul.msk.f32.vlgmr.msra.gmra.mxu0 %vm1466_vm3, %v4177_v33  ;;  %v2746_v33 = vld [vmem:[#allocation4 + $0x220] sm:$0xff] }
 0x206   :  { %3276 = vmatmul.msk.f32.gmra.mxu3 %vm1466_vm3, %v4196_v2  ;;  %2809 = vmatpush.msra.mxu1 %v2746_v33  ;;  %v2424_v33 = vld [vmem:[#allocation3 + $0x90] sm:$0xff] }
 0x208   :  { %v1755_v44 = vpop.f32.mrf.mxu2 }
 0x209   :  { %v1756_v62 = vadd.f32 %v1755_v44, %v1642_v15  ;;  %v1893_v35 = vpop.f32.mrf.mxu3  ;;  %v1645_v51 = vpop.f32.mrf.mxu1 }
 0x20a   :  { %v4451_v12 = vpop.f32.mrf.mxu0 }
 0x20b   :  { %v4449_v5 = vadd.f32 %v1893_v35, %v1756_v62 }
 0x20c   :  { %3245 = vmatmul.msk.f32.gmra.mxu1 %vm1466_vm3, %v4194_v17 }
 0x20d   :  { %3261 = vmatmul.msk.f32.gmra.mxu2 %vm1466_vm3, %v4198_v29  ;;  %3292 = vmatmul.msk.f32.gmra.mxu0 %vm1466_vm3, %v4194_v17 }
 0x20e   :  { %3277 = vmatmul.msk.f32.gmra.mxu3 %vm1466_vm3, %v4213_v37 }
 0x210   :  { %v1758_v54 = vpop.f32.mrf.mxu2 }
 0x211   :  { %v1759_v2 = vadd.f32 %v1758_v54, %v1645_v51  ;;  %v1896_v60 = vpop.f32.mrf.mxu3  ;;  %v1648_v57 = vpop.f32.mrf.mxu1  ;;  %v2115_v54 = vld [vmem:[#allocation3 + $0x81] sm:$0xff] }
 0x212   :  { %v4463_v34 = vpop.f32.mrf.mxu0 }
 0x213   :  { %v4461_v40 = vadd.f32 %v1896_v60, %v1759_v2  ;;  %v4513_v2 = vld [vmem:[#allocation3 + $0x82] sm:$0xff] }
 0x214   :  { %3246 = vmatmul.msk.f32.gmra.mxu1 %vm1466_vm3, %v4211_v41 }
 0x215   :  { %3262 = vmatmul.msk.f32.gmra.mxu2 %vm1466_vm3, %v4215_v50  ;;  %3293 = vmatmul.msk.f32.gmra.mxu0 %vm1466_vm3, %v4211_v41  ;;  %v2745_v41 = vld [vmem:[#allocation4 + $0x218] sm:$0xff] }
 0x216   :  { %3278 = vmatmul.msk.f32.gmra.mxu3 %vm1466_vm3, %v4230_v13  ;;  %2810 = vmatpush.msra.mxu1 %v2745_v41 }
 0x218   :  { %v1761_v17 = vpop.f32.mrf.mxu2 }
 0x219   :  { %v1762_v29 = vadd.f32 %v1761_v17, %v1648_v57  ;;  %v1899_v37 = vpop.f32.mrf.mxu3  ;;  %v1651_v3 = vpop.f32.mrf.mxu1 }
 0x21a   :  { %v4475_v38 = vpop.f32.mrf.mxu0 }
 0x21b   :  { %v4473_v11 = vadd.f32 %v1899_v37, %v1762_v29  ;;  %v2578_v37 = vld [vmem:[#allocation3 + $0x91] sm:$0xff] }
 0x21c   :  { %3247 = vmatmul.msk.f32.gmra.mxu1 %vm1466_vm3, %v4228_v47 }
 0x21d   :  { %3263 = vmatmul.msk.f32.gmra.mxu2 %vm1466_vm3, %v4232_v23  ;;  %3294 = vmatmul.msk.f32.gmra.mxu0 %vm1466_vm3, %v4228_v47 }
 0x21e   :  { %3279 = vmatmul.msk.f32.gmra.mxu3 %vm1466_vm3, %v4247_v36 }
 0x220   :  { %v1764_v50 = vpop.f32.mrf.mxu2 }
 0x221   :  { %v1765_v13 = vadd.f32 %v1764_v50, %v1651_v3  ;;  %v1902_v18 = vpop.f32.mrf.mxu3  ;;  %v1654_v21 = vpop.f32.mrf.mxu1  ;;  %v2743_v3 = vld [vmem:[#allocation4 + $0x208] sm:$0xff] }
 0x222   :  { %v4487_v30 = vpop.f32.mrf.mxu0 }
 0x223   :  { %v4485_v7 = vadd.f32 %v1902_v18, %v1765_v13 }
 0x224   :  { %3248 = vmatmul.msk.f32.gmra.mxu1 %vm1466_vm3, %v4245_v45 }
 0x225   :  { %3264 = vmatmul.msk.f32.gmra.mxu2 %vm1466_vm3, %v4249_v9  ;;  %3295 = vmatmul.msk.f32.gmra.mxu0 %vm1466_vm3, %v4245_v45  ;;  %v2744_v45 = vld [vmem:[#allocation4 + $0x210] sm:$0xff] }
 0x226   :  { %3280 = vmatmul.msk.f32.gmra.mxu3 %vm1466_vm3, %v4268_v42  ;;  %2811 = vmatpush.msra.mxu1 %v2744_v45 }
 0x228   :  { %v1767_v47 = vpop.f32.mrf.mxu2  ;;  %2812 = vmatpush.msra.mxu1 %v2743_v3 }
 0x229   :  { %v1768_v23 = vadd.f32 %v1767_v47, %v1654_v21  ;;  %v1905_v36 = vpop.f32.mrf.mxu3  ;;  %v1657_v10 = vpop.f32.mrf.mxu1 }
 0x22a   :  { %v4499_v8 = vpop.f32.mrf.mxu0 }
 0x22b   :  { %v4497_v27 = vadd.f32 %v1905_v36, %v1768_v23 }
 0x22c   :  { %3249 = vmatmul.msk.f32.gmra.mxu1 %vm1466_vm3, %v4266_v53 }
 0x22d   :  { %3265 = vmatmul.msk.f32.gmra.mxu2 %vm1466_vm3, %v4270_v39  ;;  %3296 = vmatmul.msk.f32.gmra.mxu0 %vm1466_vm3, %v4266_v53 }
 0x22e   :  { %3281 = vmatmul.msk.f32.gmra.mxu3 %vm1466_vm3, %v4286_v25 }
 0x230   :  { %v1770_v42 = vpop.f32.mrf.mxu2 }
 0x231   :  { %v1771_v15 = vadd.f32 %v1770_v42, %v1657_v10  ;;  %v1908_v44 = vpop.f32.mrf.mxu3  ;;  %v1660_v62 = vpop.f32.mrf.mxu1 }
 0x232   :  { %v4511_v51 = vpop.f32.mrf.mxu0 }
 0x233   :  { %v4509_v35 = vadd.f32 %v1908_v44, %v1771_v15 }
 0x234   :  { %3250 = vmatmul.msk.f32.gmra.mxu1 %vm1466_vm3, %v2115_v54 }
 0x235   :  { %3266 = vmatmul.msk.f32.gmra.mxu2 %vm1466_vm3, %v4513_v2  ;;  %3297 = vmatmul.msk.f32.gmra.mxu0 %vm1466_vm3, %v2115_v54 }
 0x236   :  { %3282 = vmatmul.msk.f32.gmra.mxu3 %vm1466_vm3, %v2424_v33 }
 0x238   :  { %v1773_v53 = vpop.f32.mrf.mxu2 }
 0x239   :  { %v1774_v25 = vadd.f32 %v1773_v53, %v1660_v62  ;;  %v1911_v60 = vpop.f32.mrf.mxu3  ;;  %v1663_v57 = vpop.f32.mrf.mxu1 }
 0x23a   :  { %v4522_v29 = vpop.f32.mrf.mxu0 }
 0x23b   :  { %v4520_v17 = vadd.f32 %v1911_v60, %v1774_v25 }
 0x23c   :  { %3251 = vmatmul.msk.f32.gmra.mxu1 %vm1466_vm3, %v4299_v28 }
 0x23d   :  { %3267 = vmatmul.msk.f32.gmra.mxu2 %vm1466_vm3, %v4301_v31  ;;  %3298 = vmatmul.msk.f32.gmra.mxu0 %vm1466_vm3, %v2578_v37 }
 0x23e   :  { %3283 = vmatmul.msk.f32.gmra.mxu3 %vm1466_vm3, %v4317_v55 }
 0x240   :  { %v1776_v41 = vpop.f32.mrf.mxu2 }
 0x241   :  { %v1777_v50 = vadd.f32 %v1776_v41, %v1663_v57  ;;  %v1914_v13 = vpop.f32.mrf.mxu3  ;;  %v1666_v18 = vpop.f32.mrf.mxu1 }
 0x242   :  { %v2068_v47 = vpop.f32.mrf.mxu0 }
 0x243   :  { %v1946_v21 = vadd.f32 %v1914_v13, %v1777_v50 }
 0x244   :  { %3252 = vmatmul.msk.f32.gmra.mxu1 %vm1466_vm3, %v4315_v14 }
 0x245   :  { %v4531_v23 = vadd.f32 %v2068_v47, %v1946_v21  ;;  %3268 = vmatmul.msk.f32.gmra.mxu2 %vm1466_vm3, %v4319_v32  ;;  %3299 = vmatmul.msk.f32.gmra.mxu0 %vm1466_vm3, %v4315_v14  ;;  %v2742_v14 = vld [vmem:[#allocation4 + $0x200] sm:$0xff] }
 0x246   :  { %3284 = vmatmul.msk.f32.gmra.mxu3 %vm1466_vm3, %v4337_v59  ;;  %2813 = vmatpush.msra.mxu1 %v2742_v14 }
 0x248   :  { %v1779_v28 = vpop.f32.mrf.mxu2 }
 0x249   :  { %v1780_v31 = vadd.f32 %v1779_v28, %v1666_v18  ;;  %v1917_v55 = vpop.f32.mrf.mxu3  ;;  %v1669_v36 = vpop.f32.mrf.mxu1 }
 0x24a   :  { %v2071_v45 = vpop.f32.mrf.mxu0 }
 0x24b   :  { %v1947_v10 = vadd.f32 %v1917_v55, %v1780_v31 }
 0x24c   :  { %3253 = vmatmul.msk.f32.gmra.mxu1 %vm1466_vm3, %v4335_v58 }
 0x24d   :  { %v4541_v42 = vadd.f32 %v2071_v45, %v1947_v10  ;;  %3269 = vmatmul.msk.f32.gmra.mxu2 %vm1466_vm3, %v4339_v48  ;;  %3300 = vmatmul.msk.f32.gmra.mxu0 %vm1466_vm3, %v4335_v58 }
 0x24e   :  { %3285 = vmatmul.msk.f32.gmra.mxu3 %vm1466_vm3, %v4357_v26 }
 0x250   :  { %v1782_v59 = vpop.f32.mrf.mxu2 }
 0x251   :  { %v1783_v15 = vadd.f32 %v1782_v59, %v1669_v36  ;;  %v1920_v44 = vpop.f32.mrf.mxu3  ;;  %v1672_v62 = vpop.f32.mrf.mxu1 }
 0x252   :  { %v2074_v54 = vpop.f32.mrf.mxu0 }
 0x253   :  { %v1948_v33 = vadd.f32 %v1920_v44, %v1783_v15  ;;  %v2432_v15 = vld [vmem:[#allocation3 + $0x130] sm:$0xff]  ;;  %v2123_v44 = vld [vmem:[#allocation3 + $0x121] sm:$0xff] }
 0x254   :  { %3254 = vmatmul.msk.f32.gmra.mxu1 %vm1466_vm3, %v4355_v6 }
 0x255   :  { %v4551_v53 = vadd.f32 %v2074_v54, %v1948_v33  ;;  %3270 = vmatmul.msk.f32.gmra.mxu2 %vm1466_vm3, %v4359_v24  ;;  %3301 = vmatmul.msk.f32.gmra.mxu0 %vm1466_vm3, %v4355_v6 }
 0x256   :  { %3286 = vmatmul.msk.f32.gmra.mxu3 %vm1466_vm3, %v4377_v46 }
 0x258   :  { %v1785_v58 = vpop.f32.mrf.mxu2 }
 0x259   :  { %v1786_v26 = vadd.f32 %v1785_v58, %v1672_v62  ;;  %v1923_v25 = vpop.f32.mrf.mxu3  ;;  %v1675_v60 = vpop.f32.mrf.mxu1  ;;  %v4591_v62 = vld [vmem:[#allocation3 + $0x122] sm:$0xff] }
 0x25a   :  { %v2077_v37 = vpop.f32.mrf.mxu0 }
 0x25b   :  { %v1949_v57 = vadd.f32 %v1923_v25, %v1786_v26  ;;  %v2586_v25 = vld [vmem:[#allocation3 + $0x131] sm:$0xff] }
 0x25c   :  { %3255 = vmatmul.msk.f32.gmra.mxu1 %vm1466_vm3, %v4375_v1 }
 0x25d   :  { %v4561_v3 = vadd.f32 %v2077_v37, %v1949_v57  ;;  %3271 = vmatmul.msk.f32.gmra.mxu2 %vm1466_vm3, %v4379_v61  ;;  %3302 = vmatmul.msk.f32.gmra.mxu0 %vm1466_vm3, %v4375_v1  ;;  %v2725_v57 = vld [vmem:[#allocation3 + $0x22] sm:$0xff] }
 0x25e   :  { %3287 = vmatmul.msk.f32.gmra.mxu3 %vm1466_vm3, %v4394_v0 }
 0x260   :  { %v1788_v6 = vpop.f32.mrf.mxu2 }
 0x261   :  { %v1789_v46 = vadd.f32 %v1788_v6, %v1675_v60  ;;  %v1926_v41 = vpop.f32.mrf.mxu3  ;;  %v1678_v50 = vpop.f32.mrf.mxu1 }
 0x262   :  { %v2080_v18 = vpop.f32.mrf.mxu0 }
 0x263   :  { %v1950_v13 = vadd.f32 %v1926_v41, %v1789_v46  ;;  %v2726_v46 = vld [vmem:[#allocation3 + $0x32] sm:$0xff] }
 0x264   :  { %3256 = vmatmul.msk.f32.gmra.mxu1 %vm1466_vm3, %v4392_v43 }
 0x265   :  { %v4571_v21 = vadd.f32 %v2080_v18, %v1950_v13  ;;  %3272 = vmatmul.msk.f32.gmra.mxu2 %vm1466_vm3, %v4396_v4  ;;  %3303 = vmatmul.msk.f32.gmra.mxu0 %vm1466_vm3, %v4392_v43  ;;  %v2728_v18 = vld [vmem:[#allocation3 + $0x52] sm:$0xff] }
 0x266   :  { %3288 = vmatmul.msk.f32.gmra.mxu3 %vm1466_vm3, %v4410_v56 }
 0x268   :  { %v1791_v1 = vpop.f32.mrf.mxu2 }
 0x269   :  { %v1792_v0 = vadd.f32 %v1791_v1, %v1678_v50  ;;  %v1929_v47 = vpop.f32.mrf.mxu3  ;;  %v1681_v28 = vpop.f32.mrf.mxu1  ;;  %v2727_v50 = vld [vmem:[#allocation3 + $0x42] sm:$0xff] }
 0x26a   :  { %v2083_v55 = vpop.f32.mrf.mxu0 }
 0x26b   :  { %v1951_v31 = vadd.f32 %v1929_v47, %v1792_v0 }
 0x26c   :  { %3257 = vmatmul.msk.f32.gmra.mxu1 %vm1466_vm3, %v4408_v20 }
 0x26d   :  { %v4581_v36 = vadd.f32 %v2083_v55, %v1951_v31  ;;  %3273 = vmatmul.msk.f32.gmra.mxu2 %vm1466_vm3, %v4412_v49  ;;  %3304 = vmatmul.msk.f32.gmra.mxu0 %vm1466_vm3, %v4408_v20  ;;  %v2732_v31 = vld [vmem:[#allocation3 + $0x92] sm:$0xff] }
 0x26e   :  { %3289 = vmatmul.msk.f32.gmra.mxu3 %vm1466_vm3, %v4425_v63 }
 0x270   :  { %v1794_v43 = vpop.f32.mrf.mxu2 }
 0x271   :  { %v1795_v56 = vadd.f32 %v1794_v43, %v1681_v28  ;;  %v1932_v10 = vpop.f32.mrf.mxu3  ;;  %v1684_v45 = vpop.f32.mrf.mxu1 }
 0x272   :  { %v2086_v59 = vpop.f32.mrf.mxu0 }
 0x273   :  { %v1952_v14 = vadd.f32 %v1932_v10, %v1795_v56 }
 0x274   :  { %3258 = vmatmul.msk.f32.gmra.mxu1 %vm1466_vm3, %v2123_v44 }
 0x275   :  { %v4593_v33 = vadd.f32 %v2086_v59, %v1952_v14  ;;  %3274 = vmatmul.msk.f32.gmra.mxu2 %vm1466_vm3, %v4591_v62  ;;  %3305 = vmatmul.msk.f32.gmra.mxu0 %vm1466_vm3, %v2123_v44 }
 0x276   :  { %3290 = vmatmul.msk.f32.gmra.mxu3 %vm1466_vm3, %v2432_v15 }
 0x278   :  { %v1797_v20 = vpop.f32.mrf.mxu2 }
 0x279   :  { %v1798_v63 = vadd.f32 %v1797_v20, %v1684_v45  ;;  %v1935_v54 = vpop.f32.mrf.mxu3  ;;  %v2198_v58 = vpop.f32.mrf.mxu1 }
 0x27a   :  { %v2089_v60 = vpop.f32.mrf.mxu0 }
 0x27b   :  { %v1953_v26 = vadd.f32 %v1935_v54, %v1798_v63 }
 0x27c   :  { %3307 = vmatmul.msk.f32.vlgmr.msra.gmra.mxu1 %vm1466_vm3, %v2725_v57  ;;  %v2740_v57 = vld [vmem:[#allocation3 + $0x132] sm:$0xff] }
 0x27d   :  { %v2107_v37 = vadd.f32 %v2089_v60, %v1953_v26  ;;  %3306 = vmatmul.msk.f32.gmra.mxu0 %vm1466_vm3, %v2586_v25 }
 0x280   :  { %v2352_v10 = vpop.f32.mrf.mxu2 }
 0x281   :  { %v2201_v6 = vpop.f32.mrf.mxu1 }
 0x284   :  { %3308 = vmatmul.msk.f32.gmra.mxu1 %vm1466_vm3, %v2726_v46 }
 0x288   :  { %v2355_v14 = vpop.f32.mrf.mxu2 }
 0x289   :  { %v4603_v41 = vpop.f32.mrf.mxu1 }
 0x28c   :  { %3309 = vmatmul.msk.f32.gmra.mxu1 %vm1466_vm3, %v2727_v50 }
 0x291   :  { %v4606_v13 = vpop.f32.mrf.mxu1 }
 0x294   :  { %3310 = vmatmul.msk.f32.gmra.mxu1 %vm1466_vm3, %v2728_v18 }
 0x299   :  { %v4609_v1 = vpop.f32.mrf.mxu1 }
 0x29c   :  { %3311 = vmatmul.msk.f32.gmra.mxu1 %vm1466_vm3, %v4249_v9 }
 0x2a1   :  { %v4613_v0 = vpop.f32.mrf.mxu1 }
 0x2a4   :  { %3312 = vmatmul.msk.f32.gmra.mxu1 %vm1466_vm3, %v4270_v39 }
 0x2a9   :  { %v4617_v47 = vpop.f32.mrf.mxu1 }
 0x2ac   :  { %3313 = vmatmul.msk.f32.gmra.mxu1 %vm1466_vm3, %v4513_v2 }
 0x2b1   :  { %v4621_v28 = vpop.f32.mrf.mxu1 }
 0x2b4   :  { %3314 = vmatmul.msk.f32.gmra.mxu1 %vm1466_vm3, %v2732_v31 }
 0x2b9   :  { %v2222_v55 = vpop.f32.mrf.mxu1 }
 0x2ba   :  { %v4625_v43 = vadd.f32 %v2222_v55, %v4531_v23  ;;  %v2094_v55 = vadd.f32 %v4463_v34, %v4461_v40 }
 0x2bc   :  { %3315 = vmatmul.msk.f32.gmra.mxu1 %vm1466_vm3, %v4319_v32  ;;  %v2507_v32 = vpop.f32.mrf.mxu3 }
 0x2c1   :  { %v2225_v9 = vpop.f32.mrf.mxu1 }
 0x2c2   :  { %v4630_v39 = vadd.f32 %v2225_v9, %v4541_v42  ;;  %v2661_v42 = vpop.f32.mrf.mxu0 }
 0x2c4   :  { %3316 = vmatmul.msk.f32.gmra.mxu1 %vm1466_vm3, %v4339_v48 }
 0x2c9   :  { %v2228_v2 = vpop.f32.mrf.mxu1 }
 0x2ca   :  { %v4635_v56 = vadd.f32 %v2228_v2, %v4551_v53  ;;  %v2510_v53 = vpop.f32.mrf.mxu3  ;;  %v2664_v15 = vpop.f32.mrf.mxu0 }
 0x2cc   :  { %3317 = vmatmul.msk.f32.gmra.mxu1 %vm1466_vm3, %v4359_v24 }
 0x2d1   :  { %v2231_v23 = vpop.f32.mrf.mxu1 }
 0x2d2   :  { %v4640_v45 = vadd.f32 %v2231_v23, %v4561_v3  ;;  %v2358_v3 = vpop.f32.mrf.mxu2  ;;  %v2513_v20 = vpop.f32.mrf.mxu3 }
 0x2d3   :  { %v2667_v26 = vpop.f32.mrf.mxu0 }
 0x2d4   :  { %3318 = vmatmul.msk.f32.gmra.mxu1 %vm1466_vm3, %v4379_v61  ;;  %v1753_v61 = vadd.f32 %v4435_v22, %v4423_v19  ;;  %v2093_v22 = vadd.f32 %v4451_v12, %v4449_v5 }
 0x2d9   :  { %v2234_v59 = vpop.f32.mrf.mxu1 }
 0x2da   :  { %v4645_v48 = vadd.f32 %v2234_v59, %v4571_v21  ;;  %v1938_v21 = vadd.f32 %v4437_v52, %v1753_v61  ;;  %v2516_v19 = vpop.f32.mrf.mxu3 }
 0x2dc   :  { %3319 = vmatmul.msk.f32.gmra.mxu1 %vm1466_vm3, %v4396_v4  ;;  %v2092_v4 = vadd.f32 %v4439_v16, %v1938_v21  ;;  %v2670_v16 = vpop.f32.mrf.mxu0 }
 0x2de   :  { %v2246_v25 = vadd.f32 %v2198_v58, %v2092_v4 }
 0x2e0   :  { %v2400_v60 = vadd.f32 %v2352_v10, %v2246_v25 }
 0x2e1   :  { %v2237_v24 = vpop.f32.mrf.mxu1 }
 0x2e2   :  { %v4650_v44 = vadd.f32 %v2237_v24, %v4581_v36  ;;  %v2361_v36 = vpop.f32.mrf.mxu2  ;;  %v2555_v52 = vadd.f32 %v2507_v32, %v2400_v60  ;;  %v2519_v12 = vpop.f32.mrf.mxu3 }
 0x2e4   :  { %3320 = vmatmul.msk.f32.gmra.mxu1 %vm1466_vm3, %v4412_v49  ;;  %v2709_v18 = vadd.f32 %v2661_v42, %v2555_v52  ;;  %v2673_v32 = vpop.f32.mrf.mxu0 }
 0x2e9   :  { %v2240_v63 = vpop.f32.mrf.mxu1 }
 0x2ea   :  { %v4658_v54 = vadd.f32 %v2240_v63, %v4593_v33  ;;  %v2247_v33 = vadd.f32 %v2201_v6, %v2093_v22  ;;  %v2364_v50 = vpop.f32.mrf.mxu2  ;;  %v2248_v6 = vadd.f32 %v4603_v41, %v2094_v55 }
 0x2ec   :  { %3321 = vmatmul.msk.f32.gmra.mxu1 %vm1466_vm3, %v4591_v62  ;;  %v2401_v31 = vadd.f32 %v2355_v14, %v2247_v33  ;;  %v4671_v62 = vld [vmem:[%s4863_s4] ss:$0 sm:$0xff]  ;;  %v2402_v23 = vadd.f32 %v2358_v3, %v2248_v6  ;;  %v2095_v14 = vadd.f32 %v4475_v38, %v4473_v11  ;;  %v2676_v21 = vpop.f32.mrf.mxu0  ;;  %v2096_v38 = vadd.f32 %v4487_v30, %v4485_v7 }
 0x2ed   :  { %v2097_v7 = vadd.f32 %v4499_v8, %v4497_v27  ;;  %v2098_v8 = vadd.f32 %v4511_v51, %v4509_v35  ;;  %v2099_v35 = vadd.f32 %v4522_v29, %v4520_v17 }
 0x2ee   :  { %v2556_v9 = vadd.f32 %v2510_v53, %v2401_v31  ;;  %v2557_v59 = vadd.f32 %v2513_v20, %v2402_v23  ;;  %v2249_v53 = vadd.f32 %v4606_v13, %v2095_v14 }
 0x2ef   :  { %v2251_v33 = vadd.f32 %v4613_v0, %v2097_v7  ;;  %v2252_v0 = vadd.f32 %v4617_v47, %v2098_v8 }
 0x2f0   :  { %v2710_v10 = vadd.f32 %v2664_v15, %v2556_v9  ;;  %v2522_v15 = vpop.f32.mrf.mxu3  ;;  %v2711_v3 = vadd.f32 %v2667_v26, %v2557_v59  ;;  %v2403_v61 = vadd.f32 %v2361_v36, %v2249_v53  ;;  %v2250_v26 = vadd.f32 %v4609_v1, %v2096_v38 }
 0x2f1   :  { %v2243_v49 = vpop.f32.mrf.mxu1 }
 0x2f2   :  { %v4663_v46 = vadd.f32 %v2243_v49, %v2107_v37  ;;  %v2367_v40 = vpop.f32.mrf.mxu2  ;;  %v2558_v20 = vadd.f32 %v2516_v19, %v2403_v61  ;;  %v2404_v60 = vadd.f32 %v2364_v50, %v2250_v26 }
 0x2f4   :  { %3322 = vmatmul.msk.f32.gmra.mxu1 %vm1466_vm3, %v2740_v57  ;;  %v2712_v25 = vadd.f32 %v2670_v16, %v2558_v20  ;;  %v2559_v30 = vadd.f32 %v2519_v12, %v2404_v60  ;;  %v2679_v19 = vpop.f32.mrf.mxu0 }
 0x2f6   :  { %v2713_v50 = vadd.f32 %v2673_v32, %v2559_v30 }
 0x2f8   :  { %v2525_v49 = vpop.f32.mrf.mxu3 }
 0x2f9   :  { %v2815_v58 = vpop.f32.mrf.mxu1 }
 0x2fa   :  { %v2863_v37 = vadd.f32 %v2815_v58, %v2709_v18  ;;  %v2370_v11 = vpop.f32.mrf.mxu2  ;;  %v2405_v18 = vadd.f32 %v2367_v40, %v2251_v33  ;;  %v2253_v40 = vadd.f32 %v4621_v28, %v2099_v35 }
 0x2fc   :  { %v2883_v5 = vadd.f32 %v4671_v62, %v2863_v37  ;;  %v2560_v37 = vadd.f32 %v2522_v15, %v2405_v18  ;;  %v2682_v9 = vpop.f32.mrf.mxu0 }
 0x2fe   :  { %v2899_v2 = vmax.f32 %v2883_v5, 0.0  ;;  %v2714_v6 = vadd.f32 %v2676_v21, %v2560_v37 }
 0x300   :  { %2948 = vrot.lane.b32.xlu0 %v2899_v2, %s3378_s24  ;;  %2916 = vst.msk [vmem:[%s4864_s5] sm:$0xff] %vm2915_vm5, %v2899_v2  ;;  %v2528_v27 = vpop.f32.mrf.mxu3  ;;  %v2406_v2 = vadd.f32 %v2370_v11, %v2252_v0 }
 0x301   :  { %v2818_v34 = vpop.f32.mrf.mxu1 }
 0x302   :  { %v2864_v42 = vadd.f32 %v2818_v34, %v2710_v10  ;;  %v2373_v52 = vpop.f32.mrf.mxu2  ;;  %v2561_v51 = vadd.f32 %v2525_v49, %v2406_v2 }
 0x303   :  { %v2407_v14 = vadd.f32 %v2373_v52, %v2253_v40 }
 0x304   :  { %v2884_v41 = vadd.f32 %v4671_v62, %v2864_v42  ;;  %v2715_v42 = vadd.f32 %v2679_v19, %v2561_v51  ;;  %v2685_v59 = vpop.f32.mrf.mxu0 }
 0x305   :  { %v2562_v29 = vadd.f32 %v2528_v27, %v2407_v14 }
 0x306   :  { %v2900_v24 = vmax.f32 %v2884_v41, 0.0 }
 0x307   :  { %v2716_v28 = vadd.f32 %v2682_v9, %v2562_v29 }
 0x308   :  { %2917 = vst.msk [vmem:[%s4864_s5 + $0x8] sm:$0xff] %vm2915_vm5, %v2900_v24  ;;  %2950 = vrot.lane.b32.xlu0 %v2900_v24, %s3378_s24  ;;  %v2531_v32 = vpop.f32.mrf.mxu3 }
 0x309   :  { %v2821_v63 = vpop.f32.mrf.mxu1 }
 0x30a   :  { %v2865_v4 = vadd.f32 %v2821_v63, %v2711_v3  ;;  %v2376_v12 = vpop.f32.mrf.mxu2 }
 0x30b   :  { %v2408_v61 = vadd.f32 %v2376_v12, %v4625_v43 }
 0x30c   :  { %v2885_v13 = vadd.f32 %v4671_v62, %v2865_v4  ;;  %v2688_v21 = vpop.f32.mrf.mxu0 }
 0x30d   :  { %v2563_v38 = vadd.f32 %v2531_v32, %v2408_v61 }
 0x30e   :  { %v2901_v36 = vmax.f32 %v2885_v13, 0.0 }
 0x30f   :  { %v2717_v26 = vadd.f32 %v2685_v59, %v2563_v38 }
 0x310   :  { %2952 = vrot.lane.b32.xlu1 %v2901_v36, %s3378_s24  ;;  %2918 = vst.msk [vmem:[%s4864_s5 + $0x10] sm:$0xff] %vm2915_vm5, %v2901_v36  ;;  %v2534_v3 = vpop.f32.mrf.mxu3 }
 0x311   :  { %v2824_v57 = vpop.f32.mrf.mxu1 }
 0x312   :  { %v2866_v22 = vadd.f32 %v2824_v57, %v2712_v25  ;;  %v2379_v41 = vpop.f32.mrf.mxu2 }
 0x313   :  { %v2409_v36 = vadd.f32 %v2379_v41, %v4630_v39 }
 0x314   :  { %v2886_v1 = vadd.f32 %v4671_v62, %v2866_v22  ;;  %v2691_v57 = vpop.f32.mrf.mxu0 }
 0x315   :  { %v2564_v49 = vadd.f32 %v2534_v3, %v2409_v36 }
 0x316   :  { %v2902_v16 = vmax.f32 %v2886_v1, 0.0 }
 0x317   :  { %v2718_v19 = vadd.f32 %v2688_v21, %v2564_v49 }
 0x318   :  { %2919 = vst.msk [vmem:[%s4864_s5 + $0x18] sm:$0xff] %vm2915_vm5, %v2902_v16  ;;  %2954 = vrot.lane.b32.xlu1 %v2902_v16, %s3378_s24  ;;  %v2537_v43 = vpop.f32.mrf.mxu3 }
 0x319   :  { %v2827_v31 = vpop.f32.mrf.mxu1 }
 0x31a   :  { %v2867_v58 = vadd.f32 %v2827_v31, %v2713_v50  ;;  %v2382_v11 = vpop.f32.mrf.mxu2 }
 0x31b   :  { %v2410_v1 = vadd.f32 %v2382_v11, %v4635_v56 }
 0x31c   :  { %v2887_v55 = vadd.f32 %v4671_v62, %v2867_v58  ;;  %v2694_v18 = vpop.f32.mrf.mxu0 }
 0x31d   :  { %v2565_v16 = vadd.f32 %v2537_v43, %v2410_v1 }
 0x31e   :  { %v2903_v5 = vmax.f32 %v2887_v55, 0.0 }
 0x31f   :  { %v2719_v27 = vadd.f32 %v2691_v57, %v2565_v16 }
 0x320   :  { %2956 = vrot.lane.b32.xlu2 %v2903_v5, %s3378_s24  ;;  %2920 = vst.msk [vmem:[%s4864_s5 + $0x20] sm:$0xff] %vm2915_vm5, %v2903_v5  ;;  %v2540_v33 = vpop.f32.mrf.mxu3 }
 0x321   :  { %v2830_v10 = vpop.f32.mrf.mxu1 }
 0x322   :  { %v2868_v23 = vadd.f32 %v2830_v10, %v2714_v6  ;;  %v2385_v7 = vpop.f32.mrf.mxu2 }
 0x323   :  { %v2411_v8 = vadd.f32 %v2385_v7, %v4640_v45 }
 0x324   :  { %v2888_v47 = vadd.f32 %v4671_v62, %v2868_v23  ;;  %v2697_v2 = vpop.f32.mrf.mxu0 }
 0x325   :  { %v2566_v55 = vadd.f32 %v2540_v33, %v2411_v8 }
 0x326   :  { %v2904_v34 = vmax.f32 %v2888_v47, 0.0 }
 0x327   :  { %v2720_v12 = vadd.f32 %v2694_v18, %v2566_v55 }
 0x328   :  { %2921 = vst.msk [vmem:[%s4864_s5 + $0x28] sm:$0xff] %vm2915_vm5, %v2904_v34  ;;  %2958 = vrot.lane.b32.xlu2 %v2904_v34, %s3378_s24  ;;  %v2543_v9 = vpop.f32.mrf.mxu3 }
 0x329   :  { %v2833_v53 = vpop.f32.mrf.mxu1 }
 0x32a   :  { %v2869_v17 = vadd.f32 %v2833_v53, %v2715_v42  ;;  %v2388_v58 = vpop.f32.mrf.mxu2 }
 0x32b   :  { %v2412_v6 = vadd.f32 %v2388_v58, %v4645_v48 }
 0x32c   :  { %v2889_v24 = vadd.f32 %v4671_v62, %v2869_v17  ;;  %v2700_v14 = vpop.f32.mrf.mxu0 }
 0x32d   :  { %v2567_v35 = vadd.f32 %v2543_v9, %v2412_v6 }
 0x32e   :  { %v2905_v15 = vmax.f32 %v2889_v24, 0.0 }
 0x32f   :  { %v2721_v40 = vadd.f32 %v2697_v2, %v2567_v35 }
 0x330   :  { %2922 = vst.msk [vmem:[%s4864_s5 + $0x30] sm:$0xff] %vm2915_vm5, %v2905_v15  ;;  %2960 = vrot.lane.b32.xlu0 %v2905_v15, %s3378_s24  ;;  %v2546_v32 = vpop.f32.mrf.mxu3 }
 0x331   :  { %v2836_v63 = vpop.f32.mrf.mxu1 }
 0x332   :  { %v2870_v4 = vadd.f32 %v2836_v63, %v2716_v28  ;;  %v2391_v45 = vpop.f32.mrf.mxu2 }
 0x333   :  { %v2413_v34 = vadd.f32 %v2391_v45, %v4650_v44 }
 0x334   :  { %v2890_v20 = vadd.f32 %v4671_v62, %v2870_v4  ;;  %v2703_v63 = vpop.f32.mrf.mxu0 }
 0x335   :  { %v2568_v41 = vadd.f32 %v2546_v32, %v2413_v34 }
 0x336   :  { %v2906_v13 = vmax.f32 %v2890_v20, 0.0 }
 0x337   :  { %v2722_v29 = vadd.f32 %v2700_v14, %v2568_v41 }
 0x338   :  { %2923 = vst.msk [vmem:[%s4864_s5 + $0x38] sm:$0xff] %vm2915_vm5, %v2906_v13  ;;  %2962 = vrot.lane.b32.xlu1 %v2906_v13, %s3378_s24  ;;  %v2549_v44 = vpop.f32.mrf.mxu3 }
 0x339   :  { %v2839_v25 = vpop.f32.mrf.mxu1 }
 0x33a   :  { %v2871_v60 = vadd.f32 %v2839_v25, %v2717_v26  ;;  %v2394_v59 = vpop.f32.mrf.mxu2 }
 0x33b   :  { %v2414_v24 = vadd.f32 %v2394_v59, %v4658_v54 }
 0x33c   :  { %v2891_v22 = vadd.f32 %v4671_v62, %v2871_v60  ;;  %v2706_v43 = vpop.f32.mrf.mxu0 }
 0x33d   :  { %v2569_v28 = vadd.f32 %v2549_v44, %v2414_v24 }
 0x33e   :  { %v2907_v30 = vmax.f32 %v2891_v22, 0.0 }
 0x33f   :  { %v2723_v11 = vadd.f32 %v2703_v63, %v2569_v28 }
 0x340   :  { %2924 = vst.msk [vmem:[%s4864_s5 + $0x40] sm:$0xff] %vm2915_vm5, %v2907_v30  ;;  %2964 = vrot.lane.b32.xlu2 %v2907_v30, %s3378_s24  ;;  %v2552_v54 = vpop.f32.mrf.mxu3 }
 0x341   :  { %v2842_v39 = vpop.f32.mrf.mxu1 }
 0x342   :  { %v2872_v52 = vadd.f32 %v2842_v39, %v2718_v19  ;;  %v2397_v21 = vpop.f32.mrf.mxu2 }
 0x343   :  { %v2415_v38 = vadd.f32 %v2397_v21, %v4663_v46 }
 0x344   :  { %v2892_v50 = vadd.f32 %v4671_v62, %v2872_v52 }
 0x345   :  { %v2570_v26 = vadd.f32 %v2552_v54, %v2415_v38 }
 0x346   :  { %v2908_v31 = vmax.f32 %v2892_v50, 0.0 }
 0x347   :  { %v2724_v60 = vadd.f32 %v2706_v43, %v2570_v26 }
 0x348   :  { %2925 = vst.msk [vmem:[%s4864_s5 + $0x48] sm:$0xff] %vm2915_vm5, %v2908_v31  ;;  %2966 = vrot.lane.b32.xlu0 %v2908_v31, %s3378_s24 }
 0x349   :  { %v2845_v56 = vpop.f32.mrf.mxu1 }
 0x34a   :  { %v2873_v37 = vadd.f32 %v2845_v56, %v2719_v27 }
 0x34c   :  { %v2893_v0 = vadd.f32 %v4671_v62, %v2873_v37 }
 0x34e   :  { %v2909_v5 = vmax.f32 %v2893_v0, 0.0 }
 0x350   :  { %2926 = vst.msk [vmem:[%s4864_s5 + $0x50] sm:$0xff] %vm2915_vm5, %v2909_v5  ;;  %2968 = vrot.lane.b32.xlu1 %v2909_v5, %s3378_s24 }
 0x351   :  { %v2848_v10 = vpop.f32.mrf.mxu1 }
 0x352   :  { %v2874_v23 = vadd.f32 %v2848_v10, %v2720_v12 }
 0x354   :  { %v2894_v51 = vadd.f32 %v4671_v62, %v2874_v23 }
 0x356   :  { %v2910_v47 = vmax.f32 %v2894_v51, 0.0 }
 0x358   :  { %2927 = vst.msk [vmem:[%s4864_s5 + $0x58] sm:$0xff] %vm2915_vm5, %v2910_v47  ;;  %2970 = vrot.lane.b32.xlu2 %v2910_v47, %s3378_s24 }
 0x359   :  { %v2851_v48 = vpop.f32.mrf.mxu1 }
 0x35a   :  { %v2875_v42 = vadd.f32 %v2851_v48, %v2721_v40 }
 0x35c   :  { %v2895_v53 = vadd.f32 %v4671_v62, %v2875_v42 }
 0x35e   :  { %v2911_v17 = vmax.f32 %v2895_v53, 0.0 }
 0x360   :  { %2928 = vst.msk [vmem:[%s4864_s5 + $0x60] sm:$0xff] %vm2915_vm5, %v2911_v17  ;;  %2972 = vrot.lane.b32.xlu0 %v2911_v17, %s3378_s24 }
 0x361   :  { %v2854_v15 = vpop.f32.mrf.mxu1 }
 0x362   :  { %v2876_v3 = vadd.f32 %v2854_v15, %v2722_v29 }
 0x364   :  { %v2896_v61 = vadd.f32 %v4671_v62, %v2876_v3 }
 0x366   :  { %v2912_v4 = vmax.f32 %v2896_v61, 0.0 }
 0x368   :  { %2929 = vst.msk [vmem:[%s4864_s5 + $0x68] sm:$0xff] %vm2915_vm5, %v2912_v4  ;;  %2974 = vrot.lane.b32.xlu1 %v2912_v4, %s3378_s24 }
 0x369   :  { %v2857_v20 = vpop.f32.mrf.mxu1 }
 0x36a   :  { %v2877_v13 = vadd.f32 %v2857_v20, %v2723_v11 }
 0x36c   :  { %v2897_v36 = vadd.f32 %v4671_v62, %v2877_v13 }
 0x36e   :  { %v2913_v25 = vmax.f32 %v2897_v36, 0.0 }
 0x370   :  { %2930 = vst.msk [vmem:[%s4864_s5 + $0x70] sm:$0xff] %vm2915_vm5, %v2913_v25  ;;  %2976 = vrot.lane.b32.xlu2 %v2913_v25, %s3378_s24 }
 0x371   :  { %v2860_v46 = vpop.f32.mrf.mxu1 }
 0x372   :  { %v2878_v49 = vadd.f32 %v2860_v46, %v2724_v60  ;;  %v2949_v57 = vpop.permute.xlu0 %2948 }
 0x373   :  { %3323 = vst.msk [vmem:[%s4864_s5 + $0x80] sm:$0xff] %vm2915_vm5, %v2949_v57 }
 0x374   :  { %v2898_v22 = vadd.f32 %v4671_v62, %v2878_v49 }
 0x376   :  { %v2914_v7 = vmax.f32 %v2898_v22, 0.0 }
 0x378   :  { %2931 = vst.msk [vmem:[%s4864_s5 + $0x78] sm:$0xff] %vm2915_vm5, %v2914_v7  ;;  %2978 = vrot.lane.b32.xlu0 %v2914_v7, %s3378_s24 }
 0x37a   :  { %v2957_v30 = vpop.permute.xlu2 %2956  ;;  %v2951_v19 = vpop.permute.xlu0 %2950 }
 0x37b   :  { %3327 = vst.msk [vmem:[%s4864_s5 + $0xa0] sm:$0xff] %vm2915_vm5, %v2957_v30 }
 0x37c   :  { %3324 = vst.msk [vmem:[%s4864_s5 + $0x88] sm:$0xff] %vm2915_vm5, %v2951_v19 }
 0x382   :  { %v2959_v62 = vpop.permute.xlu2 %2958  ;;  %v2953_v1 = vpop.permute.xlu1 %2952 }
 0x383   :  { %3328 = vst.msk [vmem:[%s4864_s5 + $0xa8] sm:$0xff] %vm2915_vm5, %v2959_v62 }
 0x384   :  { %3325 = vst.msk [vmem:[%s4864_s5 + $0x90] sm:$0xff] %vm2915_vm5, %v2953_v1 }
 0x38a   :  { %v2955_v39 = vpop.permute.xlu1 %2954 }
 0x38b   :  { %3326 = vst.msk [vmem:[%s4864_s5 + $0x98] sm:$0xff] %vm2915_vm5, %v2955_v39 }
 0x39a   :  { %v2965_v52 = vpop.permute.xlu2 %2964 }
 0x39b   :  { %3331 = vst.msk [vmem:[%s4864_s5 + $0xc0] sm:$0xff] %vm2915_vm5, %v2965_v52 }
 0x3a2   :  { %v2961_v33 = vpop.permute.xlu0 %2960 }
 0x3a3   :  { %3329 = vst.msk [vmem:[%s4864_s5 + $0xb0] sm:$0xff] %vm2915_vm5, %v2961_v33 }
 0x3aa   :  { %v2963_v16 = vpop.permute.xlu1 %2962 }
 0x3ab   :  { %3330 = vst.msk [vmem:[%s4864_s5 + $0xb8] sm:$0xff] %vm2915_vm5, %v2963_v16 }
 0x3b2   :  { %v2971_v50 = vpop.permute.xlu2 %2970 }
 0x3b3   :  { %3334 = vst.msk [vmem:[%s4864_s5 + $0xd8] sm:$0xff] %vm2915_vm5, %v2971_v50 }
 0x3ba   :  { %v2967_v18 = vpop.permute.xlu0 %2966 }
 0x3bb   :  { %3332 = vst.msk [vmem:[%s4864_s5 + $0xc8] sm:$0xff] %vm2915_vm5, %v2967_v18 }
 0x3c2   :  { %v2969_v31 = vpop.permute.xlu1 %2968 }
 0x3c3   :  { %3333 = vst.msk [vmem:[%s4864_s5 + $0xd0] sm:$0xff] %vm2915_vm5, %v2969_v31 }
 0x3ca   :  { %v2977_v58 = vpop.permute.xlu2 %2976 }
 0x3cb   :  { %3337 = vst.msk [vmem:[%s4864_s5 + $0xf0] sm:$0xff] %vm2915_vm5, %v2977_v58 }
 0x3d2   :  { %v2973_v27 = vpop.permute.xlu0 %2972 }
 0x3d3   :  { %3335 = vst.msk [vmem:[%s4864_s5 + $0xe0] sm:$0xff] %vm2915_vm5, %v2973_v27 }
 0x3da   :  { %v2975_v8 = vpop.permute.xlu1 %2974 }
 0x3db   :  { %3336 = vst.msk [vmem:[%s4864_s5 + $0xe8] sm:$0xff] %vm2915_vm5, %v2975_v8 }
 0x3ea   :  { %v2979_v56 = vpop.permute.xlu0 %2978 }
 0x3eb   :  { %3338 = vst.msk [vmem:[%s4864_s5 + $0xf8] sm:$0xff] %vm2915_vm5, %v2979_v56 }
 0x3ec   :  { %3017 = vsyncpa [#allocation5], 1 }

</bundles_post_ra>
